<compile_context>
chip_gen: v7x
topology: tpu7x:2x2x1
jax: 0.10.0
libtpu: 0.0.40
codegen_flags: <defaults>
</compile_context>

<pallas_src>
import functools

import jax
import jax.numpy as jnp
from jax import lax
from jax.experimental import pallas as pl
from jax.experimental.pallas import tpu as pltpu


# ----------------------------------------------------------------------------
# Fused forward kernel (runs once per batch tile of `bt` images)
# ----------------------------------------------------------------------------
def _fused_net_kernel(x_ref, m1_ref, p1h_ref, pv1_ref, m2_ref, p2h_ref,
                      pv2_ref, gm1_ref, gm2_ref, f1_ref, f2_ref, f3_ref,
                      vec_ref, o_ref):
    f32, bf16 = jnp.float32, jnp.bfloat16
    bt = x_ref.shape[0] // 32          # images per tile (static)

    # ---- 5x5 conv as one wide-K matmul: 5 vertical-tap slices, lane concat.
    def conv_block(slab3, m_ref, bias):
        rows = slab3.shape[1]
        taps = [slab3]
        for i in range(1, 5):
            tap = slab3[:, i:, :]                                  # (bt, R-i, 128)
            tap = jnp.concatenate(
                [tap, jnp.zeros((bt, i, 128), slab3.dtype)], axis=1)
            taps.append(tap)
        cat = jnp.concatenate(taps, axis=2)                        # (bt, R, 640)
        cat = cat.reshape(bt * rows, 5 * 128).astype(bf16)
        y = jnp.dot(cat, m_ref[...], preferred_element_type=f32)
        return jnp.tanh(y + bias)                                  # (bt*R, Nout) f32

    # ---- GroupNorm: sublane/lane reductions + pure-VPU broadcast.
    # p: (bt*rows, 128); invalid rows and pad lanes are exactly zero.
    def group_norm(p, rows, count, gm, gamma, beta, groups):
        p3 = p.reshape(bt, rows, 128)
        rsum = jnp.sum(p3, axis=1)                                 # (bt, 128)
        rsq = jnp.sum(p3 * p3, axis=1)
        mean_l = jnp.zeros((bt, 128), f32)
        inv_l = jnp.zeros((bt, 128), f32)
        for g in range(groups):
            mask = gm[g:g + 1, :]                                  # (1, 128)
            s1 = jnp.sum(rsum * mask, axis=1, keepdims=True)       # (bt, 1)
            s2 = jnp.sum(rsq * mask, axis=1, keepdims=True)
            mean = s1 * (1.0 / count)
            var = s2 * (1.0 / count) - mean * mean
            inv = lax.rsqrt(var + 1e-5)
            mean_l = mean_l + mean * mask
            inv_l = inv_l + inv * mask
        return (p3 - mean_l[:, None, :]) * inv_l[:, None, :] * gamma + beta

    # ---- conv1 (3->6) + tanh ------------------------------------------------
    # input slab: rows = image*32 + h, lanes = w*3 + c (96 real, padded to 128)
    x3 = x_ref[...].reshape(bt, 32, 128)
    a = conv_block(x3, m1_ref, vec_ref[0:1, 0:168])                # (bt*32, 168)

    # ---- 2x2 avg pool: vertical via per-image batched matmul, horiz. matmul
    a3 = a.reshape(bt, 32, 168)
    a3 = jnp.einsum('bij,bjl->bil', pv1_ref[...], a3,
                    preferred_element_type=f32)                    # (bt, 16, 168)
    p1 = jnp.dot(a3.reshape(bt * 16, 168), p1h_ref[...],
                 preferred_element_type=f32)                       # (bt*16, 128)

    # ---- GroupNorm(2, 6): 14*14*3 = 588 valid elems per group ---------------
    g1 = group_norm(p1, 16, 588.0, gm1_ref[...],
                    vec_ref[1:2, 0:128], vec_ref[2:3, 0:128], 2)   # (bt, 16, 128)

    # ---- conv2 (6->16) + tanh ------------------------------------------------
    c = conv_block(g1, m2_ref, vec_ref[3:4, 0:160])                # (bt*16, 160)

    # ---- 2x2 avg pool --------------------------------------------------------
    c3 = c.reshape(bt, 16, 160)
    c3 = jnp.einsum('bij,bjl->bil', pv2_ref[...], c3,
                    preferred_element_type=f32)                    # (bt, 8, 160)
    p2 = jnp.dot(c3.reshape(bt * 8, 160), p2h_ref[...],
                 preferred_element_type=f32)                       # (bt*8, 128)

    # ---- GroupNorm(4, 16): 5*5*4 = 100 valid elems per group ----------------
    g2 = group_norm(p2, 8, 100.0, gm2_ref[...],
                    vec_ref[4:5, 0:128], vec_ref[5:6, 0:128], 4)   # (bt, 8, 128)

    # ---- fc1: NCHW flatten = 5 masked row extractions + lane concat ---------
    row_idx = lax.broadcasted_iota(jnp.int32, (bt, 8, 128), 1)
    pieces = [jnp.sum(jnp.where(row_idx == h, g2, 0.0), axis=1)    # (bt, 128)
              for h in range(5)]
    flat = jnp.concatenate(pieces, axis=-1).astype(bf16)           # (bt, 640)

    h1 = jnp.tanh(jnp.dot(flat, f1_ref[...], preferred_element_type=f32)
                  + vec_ref[6:7, 0:120])                           # (bt, 120)
    h2 = jnp.tanh(jnp.dot(h1.astype(bf16), f2_ref[...],
                          preferred_element_type=f32)
                  + vec_ref[7:8, 0:84])                            # (bt, 84)
    logits = jnp.dot(h2.astype(bf16), f3_ref[...],
                     preferred_element_type=f32) + vec_ref[8:9, 0:128]
    o_ref[...] = logits.astype(o_ref.dtype)                        # (bt, 128)


# ----------------------------------------------------------------------------
# One-time parameter preprocessing -> VMEM-resident constants
# ----------------------------------------------------------------------------
def prepare_net(params, batch_tile=32):
    f32, bf16 = jnp.float32, jnp.bfloat16
    bt = batch_tile

    def band(w_in, w_out):
        a = jnp.arange(w_in)[None, :, None]
        b = jnp.arange(w_out)[None, None, :]
        j = jnp.arange(5)[:, None, None]
        return (a == b + j).astype(f32)

    def conv_mat(w, w_in, w_out):
        # rows: tap_i*128 + (w_in_pos*Cin + c_in); cols: w_out_pos*Cout + c_out
        co, ci = w.shape[0], w.shape[1]
        m = jnp.einsum("jab,ocij->iacbo", band(w_in, w_out), w.astype(f32))
        m = m.reshape(5, w_in * ci, w_out * co)
        m = jnp.pad(m, ((0, 0), (0, 128 - w_in * ci), (0, 0)))
        return m.reshape(5 * 128, w_out * co).astype(bf16)

    def pool_v(rows_out, rows_in, valid_out):
        ho = jnp.arange(rows_out)[:, None]
        hi = jnp.arange(rows_in)[None, :]
        m = (((hi == 2 * ho) | (hi == 2 * ho + 1)) &
             (ho < valid_out)).astype(f32) * 0.5
        return jnp.broadcast_to(m, (bt, rows_out, rows_in)) + 0.0   # materialize

    def pool_h(w_in, w_out, ch):
        wi = jnp.arange(w_in)[:, None]
        wo = jnp.arange(w_out)[None, :]
        m = ((wi == 2 * wo) | (wi == 2 * wo + 1)).astype(f32) * 0.5
        m = jnp.kron(m, jnp.eye(ch, dtype=f32))                     # (w_in*ch, w_out*ch)
        return jnp.pad(m, ((0, 0), (0, 128 - w_out * ch)))

    def group_mask(width, ch, groups):
        lane = jnp.arange(128)
        g = (lane % ch) // (ch // groups)
        real = lane < width * ch
        return ((g[None, :] == jnp.arange(groups)[:, None]) &
                real[None, :]).astype(f32)                          # (groups, 128)

    def lane_vec(v, width):
        t = jnp.tile(v.astype(f32), width)
        return jnp.pad(t, (0, 256 - t.shape[0]))

    def pad_vec(v):
        v = v.astype(f32)
        return jnp.pad(v, (0, 256 - v.shape[0]))

    m1 = conv_mat(params["conv1_w"], 32, 28)        # (640, 168) bf16
    m2 = conv_mat(params["conv2_w"], 14, 10)        # (640, 160) bf16
    pv1b = pool_v(16, 32, 14)                       # (bt, 16, 32) f32
    pv2b = pool_v(8, 16, 5)                         # (bt, 8, 16)  f32
    p1h = pool_h(28, 14, 6)                         # (168, 128)   f32
    p2h = pool_h(10, 5, 16)                         # (160, 128)   f32
    gm1 = group_mask(14, 6, 2)                      # (2, 128)
    gm2 = group_mask(5, 16, 4)                      # (4, 128)

    # fc1 weight permuted to our (h, w, c) lane-concat order (= NCHW flatten)
    w1 = params["fc1_w"].astype(f32).reshape(120, 16, 5, 5)
    f1 = jnp.transpose(w1, (2, 3, 1, 0)).reshape(5, 80, 120)
    f1 = jnp.pad(f1, ((0, 0), (0, 48), (0, 0))).reshape(640, 120).astype(bf16)
    f2w = params["fc2_w"].astype(f32).T.astype(bf16)                # (120, 84)
    f3w = jnp.zeros((84, 128), f32).at[:, :10].set(
        params["fc3_w"].astype(f32).T).astype(bf16)                 # (84, 128)

    # all small per-lane vectors packed into one constant (sliced in-kernel)
    vecs = jnp.stack([
        lane_vec(params["conv1_b"], 28),    # row 0: conv1 bias   (168)
        lane_vec(params["gn1_g"], 14),      # row 1: gn1 gamma    (84)
        lane_vec(params["gn1_b"], 14),      # row 2: gn1 beta     (84)
        lane_vec(params["conv2_b"], 10),    # row 3: conv2 bias   (160)
        lane_vec(params["gn2_g"], 5),       # row 4: gn2 gamma    (80)
        lane_vec(params["gn2_b"], 5),       # row 5: gn2 beta     (80)
        pad_vec(params["fc1_b"]),           # row 6: fc1 bias     (120)
        pad_vec(params["fc2_b"]),           # row 7: fc2 bias     (84)
        pad_vec(params["fc3_b"]),           # row 8: fc3 bias     (10)
    ])                                      # (9, 256) f32

    return (m1, p1h, pv1b, m2, p2h, pv2b, gm1, gm2, f1, f2w, f3w, vecs)


def _const_index(ndim, i):
    return (0,) * ndim


# ----------------------------------------------------------------------------
# Public forward pass
# ----------------------------------------------------------------------------
def net_forward(x_nchw, consts, batch_tile=32):
    """Forward pass of `Net` for NCHW float32 input (B, 3, 32, 32)."""
    assert x_nchw.shape[1:] == (3, 32, 32), x_nchw.shape
    assert batch_tile % 8 == 0
    bt = batch_tile
    b = x_nchw.shape[0]
    n_tiles = (b + bt - 1) // bt
    b_pad = n_tiles * bt

    # NCHW -> NHWC -> 2-D slab: rows = image*32 + h, lanes = w*3 + c (pad->128)
    x = jnp.transpose(x_nchw.astype(jnp.float32), (0, 2, 3, 1)).reshape(b * 32, 96)
    x = jnp.pad(x, ((0, (b_pad - b) * 32), (0, 32)))

    in_specs = [pl.BlockSpec((bt * 32, 128), lambda i: (i, 0))]
    for arr in consts:  # constant-index specs -> resident in VMEM across tiles
        in_specs.append(
            pl.BlockSpec(arr.shape, functools.partial(_const_index, arr.ndim)))

    out = pl.pallas_call(
        _fused_net_kernel,
        out_shape=jax.ShapeDtypeStruct((b_pad, 128), jnp.float32),
        grid=(n_tiles,),
        in_specs=in_specs,
        out_specs=pl.BlockSpec((bt, 128), lambda i: (i, 0)),
        compiler_params=pltpu.CompilerParams(
            dimension_semantics=("parallel",),
            vmem_limit_bytes=32 * 1024 * 1024),
    )(x, *consts)

    return out[:b, :10]


# ----------------------------------------------------------------------------
# Pure-JAX reference (mirrors the PyTorch module) used for self-checking
# ----------------------------------------------------------------------------
def net_forward_reference(x_nchw, params):
    def conv(x, w, b):
        y = lax.conv_general_dilated(
            x, jnp.transpose(w, (2, 3, 1, 0)), (1, 1), "VALID",
            dimension_numbers=("NHWC", "HWIO", "NHWC"))
        return y + b

    def pool(x):
        n, hh, ww, c = x.shape
        return x.reshape(n, hh // 2, 2, ww // 2, 2, c).mean(axis=(2, 4))

    def gn(x, groups, g, b, eps=1e-5):
        n, hh, ww, c = x.shape
        xg = x.reshape(n, hh, ww, groups, c // groups)
        mu = xg.mean(axis=(1, 2, 4), keepdims=True)
        var = ((xg - mu) ** 2).mean(axis=(1, 2, 4), keepdims=True)
        xn = ((xg - mu) * lax.rsqrt(var + eps)).reshape(n, hh, ww, c)
        return xn * g + b

    x = jnp.transpose(x_nchw, (0, 2, 3, 1))
    x = gn(pool(jnp.tanh(conv(x, params["conv1_w"], params["conv1_b"]))),
           2, params["gn1_g"], params["gn1_b"])
    x = gn(pool(jnp.tanh(conv(x, params["conv2_w"], params["conv2_b"]))),
           4, params["gn2_g"], params["gn2_b"])
    n = x.shape[0]
    x = jnp.transpose(x, (0, 3, 1, 2)).reshape(n, 400)   # PyTorch NCHW flatten
    x = jnp.tanh(x @ params["fc1_w"].T + params["fc1_b"])
    x = jnp.tanh(x @ params["fc2_w"].T + params["fc2_b"])
    return x @ params["fc3_w"].T + params["fc3_b"]


def init_params(key):
    ks = jax.random.split(key, 10)

    def u(k, shape, fan_in):
        bound = 1.0 / jnp.sqrt(float(fan_in))
        return jax.random.uniform(k, shape, jnp.float32, -bound, bound)

    return {
        "conv1_w": u(ks[0], (6, 3, 5, 5), 3 * 5 * 5),
        "conv1_b": u(ks[1], (6,), 3 * 5 * 5),
        "gn1_g": jnp.ones((6,), jnp.float32),
        "gn1_b": jnp.zeros((6,), jnp.float32),
        "conv2_w": u(ks[2], (16, 6, 5, 5), 6 * 5 * 5),
        "conv2_b": u(ks[3], (16,), 6 * 5 * 5),
        "gn2_g": jnp.ones((16,), jnp.float32),
        "gn2_b": jnp.zeros((16,), jnp.float32),
        "fc1_w": u(ks[4], (120, 400), 400),
        "fc1_b": u(ks[5], (120,), 400),
        "fc2_w": u(ks[6], (84, 120), 120),
        "fc2_b": u(ks[7], (84,), 120),
        "fc3_w": u(ks[8], (10, 84), 84),
        "fc3_b": u(ks[9], (10,), 84),
    }


if __name__ == "__main__":
    key = jax.random.PRNGKey(0)
    k_x, k_p = jax.random.split(key)
    params = init_params(k_p)

    # Small test shapes: 12 images, batch_tile=8 -> 2 grid tiles (one padded).
    batch, bt = 12, 8
    x = jax.random.normal(k_x, (batch, 3, 32, 32), jnp.float32)

    consts = prepare_net(params, batch_tile=bt)          # one-time preprocessing
    fwd = jax.jit(functools.partial(net_forward, batch_tile=bt))
    out = jax.block_until_ready(fwd(x, consts))

    assert out.shape == (batch, 10), out.shape
    assert bool(jnp.all(jnp.isfinite(out)))

    # Loose tolerance: conv/fc matmuls use bf16 MXU operands (f32 accumulation).
    ref = jax.jit(net_forward_reference)(x, params)
    err = float(jnp.max(jnp.abs(out - ref)))
    assert err < 5e-2, f"mismatch vs reference: max abs err = {err}"
    print("KERNEL_OK")
</pallas_src>

<mosaic_0001>
module attributes {stable_mosaic.version = 11 : i64} {
  func.func @_fused_net_kernel(%arg0: i32, %arg1: memref<256x128xf32, #tpu.memory_space<vmem>>, %arg2: memref<640x168xbf16, #tpu.memory_space<vmem>>, %arg3: memref<168x128xf32, #tpu.memory_space<vmem>>, %arg4: memref<8x16x32xf32, #tpu.memory_space<vmem>>, %arg5: memref<640x160xbf16, #tpu.memory_space<vmem>>, %arg6: memref<160x128xf32, #tpu.memory_space<vmem>>, %arg7: memref<8x8x16xf32, #tpu.memory_space<vmem>>, %arg8: memref<2x128xf32, #tpu.memory_space<vmem>>, %arg9: memref<4x128xf32, #tpu.memory_space<vmem>>, %arg10: memref<640x120xbf16, #tpu.memory_space<vmem>>, %arg11: memref<120x84xbf16, #tpu.memory_space<vmem>>, %arg12: memref<84x128xbf16, #tpu.memory_space<vmem>>, %arg13: memref<9x256xf32, #tpu.memory_space<vmem>>, %arg14: memref<8x128xf32, #tpu.memory_space<vmem>>) attributes {dimension_semantics = [#tpu.dimension_semantics<parallel>], iteration_bounds = array<i64: 2>, scalar_prefetch = 0 : i64, scratch_operands = 0 : i64, tpu.core_type = #tpu.core_type<tc>, window_params = [{transform_indices = @transform_0, window_bounds = array<i64: 256, 128>}, {pipeline_mode = #tpu.pipeline_mode<synchronous>, transform_indices = @transform_1, window_bounds = array<i64: 640, 168>}, {pipeline_mode = #tpu.pipeline_mode<synchronous>, transform_indices = @transform_2, window_bounds = array<i64: 168, 128>}, {pipeline_mode = #tpu.pipeline_mode<synchronous>, transform_indices = @transform_3, window_bounds = array<i64: 8, 16, 32>}, {pipeline_mode = #tpu.pipeline_mode<synchronous>, transform_indices = @transform_4, window_bounds = array<i64: 640, 160>}, {pipeline_mode = #tpu.pipeline_mode<synchronous>, transform_indices = @transform_5, window_bounds = array<i64: 160, 128>}, {pipeline_mode = #tpu.pipeline_mode<synchronous>, transform_indices = @transform_6, window_bounds = array<i64: 8, 8, 16>}, {pipeline_mode = #tpu.pipeline_mode<synchronous>, transform_indices = @transform_7, window_bounds = array<i64: 2, 128>}, {pipeline_mode = #tpu.pipeline_mode<synchronous>, transform_indices = @transform_8, window_bounds = array<i64: 4, 128>}, {pipeline_mode = #tpu.pipeline_mode<synchronous>, transform_indices = @transform_9, window_bounds = array<i64: 640, 120>}, {pipeline_mode = #tpu.pipeline_mode<synchronous>, transform_indices = @transform_10, window_bounds = array<i64: 120, 84>}, {pipeline_mode = #tpu.pipeline_mode<synchronous>, transform_indices = @transform_11, window_bounds = array<i64: 84, 128>}, {pipeline_mode = #tpu.pipeline_mode<synchronous>, transform_indices = @transform_12, window_bounds = array<i64: 9, 256>}, {transform_indices = @transform_13, window_bounds = array<i64: 8, 128>}]} {
    %c0 = arith.constant 0 : index
    %c0_0 = arith.constant 0 : index
    %0 = vector.load %arg1[%c0, %c0_0] : memref<256x128xf32, #tpu.memory_space<vmem>>, vector<256x128xf32>
    %1 = vector.shape_cast %0 : vector<256x128xf32> to vector<8x32x128xf32>
    %c0_1 = arith.constant 0 : index
    %c0_2 = arith.constant 0 : index
    %2 = vector.load %arg13[%c0_1, %c0_2] : memref<9x256xf32, #tpu.memory_space<vmem>>, vector<1x168xf32>
    %3 = vector.extract_strided_slice %1 {offsets = [0, 1, 0], sizes = [8, 31, 128], strides = [1, 1, 1]} : vector<8x32x128xf32> to vector<8x31x128xf32>
    %cst = arith.constant 0.000000e+00 : f32
    %4 = vector.broadcast %cst : f32 to vector<8x1x128xf32>
    %5 = tpu.concatenate %3, %4 in 1 : vector<8x31x128xf32>, vector<8x1x128xf32> -> vector<8x32x128xf32>
    %6 = vector.extract_strided_slice %1 {offsets = [0, 2, 0], sizes = [8, 30, 128], strides = [1, 1, 1]} : vector<8x32x128xf32> to vector<8x30x128xf32>
    %cst_3 = arith.constant 0.000000e+00 : f32
    %7 = vector.broadcast %cst_3 : f32 to vector<8x2x128xf32>
    %8 = tpu.concatenate %6, %7 in 1 : vector<8x30x128xf32>, vector<8x2x128xf32> -> vector<8x32x128xf32>
    %9 = vector.extract_strided_slice %1 {offsets = [0, 3, 0], sizes = [8, 29, 128], strides = [1, 1, 1]} : vector<8x32x128xf32> to vector<8x29x128xf32>
    %cst_4 = arith.constant 0.000000e+00 : f32
    %10 = vector.broadcast %cst_4 : f32 to vector<8x3x128xf32>
    %11 = tpu.concatenate %9, %10 in 1 : vector<8x29x128xf32>, vector<8x3x128xf32> -> vector<8x32x128xf32>
    %12 = vector.extract_strided_slice %1 {offsets = [0, 4, 0], sizes = [8, 28, 128], strides = [1, 1, 1]} : vector<8x32x128xf32> to vector<8x28x128xf32>
    %cst_5 = arith.constant 0.000000e+00 : f32
    %13 = vector.broadcast %cst_5 : f32 to vector<8x4x128xf32>
    %14 = tpu.concatenate %12, %13 in 1 : vector<8x28x128xf32>, vector<8x4x128xf32> -> vector<8x32x128xf32>
    %15 = tpu.concatenate %1, %5, %8, %11, %14 in 2 : vector<8x32x128xf32>, vector<8x32x128xf32>, vector<8x32x128xf32>, vector<8x32x128xf32>, vector<8x32x128xf32> -> vector<8x32x640xf32>
    %16 = vector.shape_cast %15 : vector<8x32x640xf32> to vector<256x640xf32>
    %17 = arith.truncf %16 : vector<256x640xf32> to vector<256x640xbf16>
    %c0_6 = arith.constant 0 : index
    %c0_7 = arith.constant 0 : index
    %18 = vector.load %arg2[%c0_6, %c0_7] : memref<640x168xbf16, #tpu.memory_space<vmem>>, vector<640x168xbf16>
    %cst_8 = arith.constant dense<0.000000e+00> : vector<256x168xf32>
    %19 = tpu.matmul %17, %18, %cst_8 {dimension_numbers = #tpu.dot_dimension_numbers<[1], [0], [0], [1], [0, 0, 1, 1], [], []>} : vector<256x640xbf16>, vector<640x168xbf16>, vector<256x168xf32> -> vector<256x168xf32>
    %20 = vector.broadcast %2 : vector<1x168xf32> to vector<256x168xf32>
    %21 = arith.addf %19, %20 : vector<256x168xf32>
    %22 = math.tanh %21 : vector<256x168xf32>
    %23 = vector.shape_cast %22 : vector<256x168xf32> to vector<8x32x168xf32>
    %c0_9 = arith.constant 0 : index
    %c0_10 = arith.constant 0 : index
    %c0_11 = arith.constant 0 : index
    %24 = vector.load %arg4[%c0_9, %c0_10, %c0_11] : memref<8x16x32xf32, #tpu.memory_space<vmem>>, vector<8x16x32xf32>
    "tpu.trace_start"() <{level = 10 : i32, message = "bij,bjl->bil"}> : () -> ()
    %cst_12 = arith.constant dense<0.000000e+00> : vector<8x16x168xf32>
    %25 = tpu.matmul %24, %23, %cst_12 {dimension_numbers = #tpu.dot_dimension_numbers<[2], [1], [1], [2], [0, 0, 0, 1, 1, 2], [0], [0]>} : vector<8x16x32xf32>, vector<8x32x168xf32>, vector<8x16x168xf32> -> vector<8x16x168xf32>
    "tpu.trace_stop"() : () -> ()
    %26 = vector.shape_cast %25 : vector<8x16x168xf32> to vector<128x168xf32>
    %c0_13 = arith.constant 0 : index
    %c0_14 = arith.constant 0 : index
    %27 = vector.load %arg3[%c0_13, %c0_14] : memref<168x128xf32, #tpu.memory_space<vmem>>, vector<168x128xf32>
    %cst_15 = arith.constant dense<0.000000e+00> : vector<128x128xf32>
    %28 = tpu.matmul %26, %27, %cst_15 {dimension_numbers = #tpu.dot_dimension_numbers<[1], [0], [0], [1], [0, 0, 1, 1], [], []>} : vector<128x168xf32>, vector<168x128xf32>, vector<128x128xf32> -> vector<128x128xf32>
    %c0_16 = arith.constant 0 : index
    %c0_17 = arith.constant 0 : index
    %29 = vector.load %arg8[%c0_16, %c0_17] : memref<2x128xf32, #tpu.memory_space<vmem>>, vector<2x128xf32>
    %c1 = arith.constant 1 : index
    %c0_18 = arith.constant 0 : index
    %30 = vector.load %arg13[%c1, %c0_18] : memref<9x256xf32, #tpu.memory_space<vmem>>, vector<1x128xf32>
    %c2 = arith.constant 2 : index
    %c0_19 = arith.constant 0 : index
    %31 = vector.load %arg13[%c2, %c0_19] : memref<9x256xf32, #tpu.memory_space<vmem>>, vector<1x128xf32>
    %32 = vector.shape_cast %28 : vector<128x128xf32> to vector<8x16x128xf32>
    %cst_20 = arith.constant dense<0.000000e+00> : vector<8x128xf32>
    %33 = vector.multi_reduction <add>, %32, %cst_20 [1] : vector<8x16x128xf32> to vector<8x128xf32>
    %34 = arith.mulf %32, %32 : vector<8x16x128xf32>
    %cst_21 = arith.constant dense<0.000000e+00> : vector<8x128xf32>
    %35 = vector.multi_reduction <add>, %34, %cst_21 [1] : vector<8x16x128xf32> to vector<8x128xf32>
    %cst_22 = arith.constant 0.000000e+00 : f32
    %36 = vector.broadcast %cst_22 : f32 to vector<8x128xf32>
    %cst_23 = arith.constant 0.000000e+00 : f32
    %37 = vector.broadcast %cst_23 : f32 to vector<8x128xf32>
    %38 = vector.extract_strided_slice %29 {offsets = [0, 0], sizes = [1, 128], strides = [1, 1]} : vector<2x128xf32> to vector<1x128xf32>
    %39 = vector.broadcast %38 : vector<1x128xf32> to vector<8x128xf32>
    %40 = arith.mulf %33, %39 : vector<8x128xf32>
    %cst_24 = arith.constant dense<0.000000e+00> : vector<8xf32>
    %41 = vector.multi_reduction <add>, %40, %cst_24 [1] : vector<8x128xf32> to vector<8xf32>
    %42 = vector.shape_cast %41 : vector<8xf32> to vector<8x1xf32>
    %43 = vector.broadcast %38 : vector<1x128xf32> to vector<8x128xf32>
    %44 = arith.mulf %35, %43 : vector<8x128xf32>
    %cst_25 = arith.constant dense<0.000000e+00> : vector<8xf32>
    %45 = vector.multi_reduction <add>, %44, %cst_25 [1] : vector<8x128xf32> to vector<8xf32>
    %46 = vector.shape_cast %45 : vector<8xf32> to vector<8x1xf32>
    %cst_26 = arith.constant 0.00170068024 : f32
    %47 = vector.broadcast %cst_26 : f32 to vector<8x1xf32>
    %48 = arith.mulf %42, %47 : vector<8x1xf32>
    %cst_27 = arith.constant 0.00170068024 : f32
    %49 = vector.broadcast %cst_27 : f32 to vector<8x1xf32>
    %50 = arith.mulf %46, %49 : vector<8x1xf32>
    %51 = arith.mulf %48, %48 : vector<8x1xf32>
    %52 = arith.subf %50, %51 : vector<8x1xf32>
    %cst_28 = arith.constant 9.99999974E-6 : f32
    %53 = vector.broadcast %cst_28 : f32 to vector<8x1xf32>
    %54 = arith.addf %52, %53 : vector<8x1xf32>
    %55 = math.rsqrt %54 : vector<8x1xf32>
    %56 = vector.broadcast %48 : vector<8x1xf32> to vector<8x128xf32>
    %57 = vector.broadcast %38 : vector<1x128xf32> to vector<8x128xf32>
    %58 = arith.mulf %56, %57 : vector<8x128xf32>
    %59 = arith.addf %36, %58 : vector<8x128xf32>
    %60 = vector.broadcast %55 : vector<8x1xf32> to vector<8x128xf32>
    %61 = vector.broadcast %38 : vector<1x128xf32> to vector<8x128xf32>
    %62 = arith.mulf %60, %61 : vector<8x128xf32>
    %63 = arith.addf %37, %62 : vector<8x128xf32>
    %64 = vector.extract_strided_slice %29 {offsets = [1, 0], sizes = [1, 128], strides = [1, 1]} : vector<2x128xf32> to vector<1x128xf32>
    %65 = vector.broadcast %64 : vector<1x128xf32> to vector<8x128xf32>
    %66 = arith.mulf %33, %65 : vector<8x128xf32>
    %cst_29 = arith.constant dense<0.000000e+00> : vector<8xf32>
    %67 = vector.multi_reduction <add>, %66, %cst_29 [1] : vector<8x128xf32> to vector<8xf32>
    %68 = vector.shape_cast %67 : vector<8xf32> to vector<8x1xf32>
    %69 = vector.broadcast %64 : vector<1x128xf32> to vector<8x128xf32>
    %70 = arith.mulf %35, %69 : vector<8x128xf32>
    %cst_30 = arith.constant dense<0.000000e+00> : vector<8xf32>
    %71 = vector.multi_reduction <add>, %70, %cst_30 [1] : vector<8x128xf32> to vector<8xf32>
    %72 = vector.shape_cast %71 : vector<8xf32> to vector<8x1xf32>
    %cst_31 = arith.constant 0.00170068024 : f32
    %73 = vector.broadcast %cst_31 : f32 to vector<8x1xf32>
    %74 = arith.mulf %68, %73 : vector<8x1xf32>
    %cst_32 = arith.constant 0.00170068024 : f32
    %75 = vector.broadcast %cst_32 : f32 to vector<8x1xf32>
    %76 = arith.mulf %72, %75 : vector<8x1xf32>
    %77 = arith.mulf %74, %74 : vector<8x1xf32>
    %78 = arith.subf %76, %77 : vector<8x1xf32>
    %cst_33 = arith.constant 9.99999974E-6 : f32
    %79 = vector.broadcast %cst_33 : f32 to vector<8x1xf32>
    %80 = arith.addf %78, %79 : vector<8x1xf32>
    %81 = math.rsqrt %80 : vector<8x1xf32>
    %82 = vector.broadcast %74 : vector<8x1xf32> to vector<8x128xf32>
    %83 = vector.broadcast %64 : vector<1x128xf32> to vector<8x128xf32>
    %84 = arith.mulf %82, %83 : vector<8x128xf32>
    %85 = arith.addf %59, %84 : vector<8x128xf32>
    %86 = vector.broadcast %81 : vector<8x1xf32> to vector<8x128xf32>
    %87 = vector.broadcast %64 : vector<1x128xf32> to vector<8x128xf32>
    %88 = arith.mulf %86, %87 : vector<8x128xf32>
    %89 = arith.addf %63, %88 : vector<8x128xf32>
    %90 = vector.shape_cast %85 : vector<8x128xf32> to vector<8x1x128xf32>
    %91 = vector.broadcast %90 : vector<8x1x128xf32> to vector<8x16x128xf32>
    %92 = arith.subf %32, %91 : vector<8x16x128xf32>
    %93 = vector.shape_cast %89 : vector<8x128xf32> to vector<8x1x128xf32>
    %94 = vector.broadcast %93 : vector<8x1x128xf32> to vector<8x16x128xf32>
    %95 = arith.mulf %92, %94 : vector<8x16x128xf32>
    %96 = vector.shape_cast %30 : vector<1x128xf32> to vector<1x1x128xf32>
    %97 = vector.broadcast %96 : vector<1x1x128xf32> to vector<8x16x128xf32>
    %98 = arith.mulf %95, %97 : vector<8x16x128xf32>
    %99 = vector.shape_cast %31 : vector<1x128xf32> to vector<1x1x128xf32>
    %100 = vector.broadcast %99 : vector<1x1x128xf32> to vector<8x16x128xf32>
    %101 = arith.addf %98, %100 : vector<8x16x128xf32>
    %c3 = arith.constant 3 : index
    %c0_34 = arith.constant 0 : index
    %102 = vector.load %arg13[%c3, %c0_34] : memref<9x256xf32, #tpu.memory_space<vmem>>, vector<1x160xf32>
    %103 = vector.extract_strided_slice %101 {offsets = [0, 1, 0], sizes = [8, 15, 128], strides = [1, 1, 1]} : vector<8x16x128xf32> to vector<8x15x128xf32>
    %cst_35 = arith.constant 0.000000e+00 : f32
    %104 = vector.broadcast %cst_35 : f32 to vector<8x1x128xf32>
    %105 = tpu.concatenate %103, %104 in 1 : vector<8x15x128xf32>, vector<8x1x128xf32> -> vector<8x16x128xf32>
    %106 = vector.extract_strided_slice %101 {offsets = [0, 2, 0], sizes = [8, 14, 128], strides = [1, 1, 1]} : vector<8x16x128xf32> to vector<8x14x128xf32>
    %cst_36 = arith.constant 0.000000e+00 : f32
    %107 = vector.broadcast %cst_36 : f32 to vector<8x2x128xf32>
    %108 = tpu.concatenate %106, %107 in 1 : vector<8x14x128xf32>, vector<8x2x128xf32> -> vector<8x16x128xf32>
    %109 = vector.extract_strided_slice %101 {offsets = [0, 3, 0], sizes = [8, 13, 128], strides = [1, 1, 1]} : vector<8x16x128xf32> to vector<8x13x128xf32>
    %cst_37 = arith.constant 0.000000e+00 : f32
    %110 = vector.broadcast %cst_37 : f32 to vector<8x3x128xf32>
    %111 = tpu.concatenate %109, %110 in 1 : vector<8x13x128xf32>, vector<8x3x128xf32> -> vector<8x16x128xf32>
    %112 = vector.extract_strided_slice %101 {offsets = [0, 4, 0], sizes = [8, 12, 128], strides = [1, 1, 1]} : vector<8x16x128xf32> to vector<8x12x128xf32>
    %cst_38 = arith.constant 0.000000e+00 : f32
    %113 = vector.broadcast %cst_38 : f32 to vector<8x4x128xf32>
    %114 = tpu.concatenate %112, %113 in 1 : vector<8x12x128xf32>, vector<8x4x128xf32> -> vector<8x16x128xf32>
    %115 = tpu.concatenate %101, %105, %108, %111, %114 in 2 : vector<8x16x128xf32>, vector<8x16x128xf32>, vector<8x16x128xf32>, vector<8x16x128xf32>, vector<8x16x128xf32> -> vector<8x16x640xf32>
    %116 = vector.shape_cast %115 : vector<8x16x640xf32> to vector<128x640xf32>
    %117 = arith.truncf %116 : vector<128x640xf32> to vector<128x640xbf16>
    %c0_39 = arith.constant 0 : index
    %c0_40 = arith.constant 0 : index
    %118 = vector.load %arg5[%c0_39, %c0_40] : memref<640x160xbf16, #tpu.memory_space<vmem>>, vector<640x160xbf16>
    %cst_41 = arith.constant dense<0.000000e+00> : vector<128x160xf32>
    %119 = tpu.matmul %117, %118, %cst_41 {dimension_numbers = #tpu.dot_dimension_numbers<[1], [0], [0], [1], [0, 0, 1, 1], [], []>} : vector<128x640xbf16>, vector<640x160xbf16>, vector<128x160xf32> -> vector<128x160xf32>
    %120 = vector.broadcast %102 : vector<1x160xf32> to vector<128x160xf32>
    %121 = arith.addf %119, %120 : vector<128x160xf32>
    %122 = math.tanh %121 : vector<128x160xf32>
    %123 = vector.shape_cast %122 : vector<128x160xf32> to vector<8x16x160xf32>
    %c0_42 = arith.constant 0 : index
    %c0_43 = arith.constant 0 : index
    %c0_44 = arith.constant 0 : index
    %124 = vector.load %arg7[%c0_42, %c0_43, %c0_44] : memref<8x8x16xf32, #tpu.memory_space<vmem>>, vector<8x8x16xf32>
    "tpu.trace_start"() <{level = 10 : i32, message = "bij,bjl->bil"}> : () -> ()
    %cst_45 = arith.constant dense<0.000000e+00> : vector<8x8x160xf32>
    %125 = tpu.matmul %124, %123, %cst_45 {dimension_numbers = #tpu.dot_dimension_numbers<[2], [1], [1], [2], [0, 0, 0, 1, 1, 2], [0], [0]>} : vector<8x8x16xf32>, vector<8x16x160xf32>, vector<8x8x160xf32> -> vector<8x8x160xf32>
    "tpu.trace_stop"() : () -> ()
    %126 = vector.shape_cast %125 : vector<8x8x160xf32> to vector<64x160xf32>
    %c0_46 = arith.constant 0 : index
    %c0_47 = arith.constant 0 : index
    %127 = vector.load %arg6[%c0_46, %c0_47] : memref<160x128xf32, #tpu.memory_space<vmem>>, vector<160x128xf32>
    %cst_48 = arith.constant dense<0.000000e+00> : vector<64x128xf32>
    %128 = tpu.matmul %126, %127, %cst_48 {dimension_numbers = #tpu.dot_dimension_numbers<[1], [0], [0], [1], [0, 0, 1, 1], [], []>} : vector<64x160xf32>, vector<160x128xf32>, vector<64x128xf32> -> vector<64x128xf32>
    %c0_49 = arith.constant 0 : index
    %c0_50 = arith.constant 0 : index
    %129 = vector.load %arg9[%c0_49, %c0_50] : memref<4x128xf32, #tpu.memory_space<vmem>>, vector<4x128xf32>
    %c4 = arith.constant 4 : index
    %c0_51 = arith.constant 0 : index
    %130 = vector.load %arg13[%c4, %c0_51] : memref<9x256xf32, #tpu.memory_space<vmem>>, vector<1x128xf32>
    %c5 = arith.constant 5 : index
    %c0_52 = arith.constant 0 : index
    %131 = vector.load %arg13[%c5, %c0_52] : memref<9x256xf32, #tpu.memory_space<vmem>>, vector<1x128xf32>
    %132 = vector.shape_cast %128 : vector<64x128xf32> to vector<8x8x128xf32>
    %cst_53 = arith.constant dense<0.000000e+00> : vector<8x128xf32>
    %133 = vector.multi_reduction <add>, %132, %cst_53 [1] : vector<8x8x128xf32> to vector<8x128xf32>
    %134 = arith.mulf %132, %132 : vector<8x8x128xf32>
    %cst_54 = arith.constant dense<0.000000e+00> : vector<8x128xf32>
    %135 = vector.multi_reduction <add>, %134, %cst_54 [1] : vector<8x8x128xf32> to vector<8x128xf32>
    %cst_55 = arith.constant 0.000000e+00 : f32
    %136 = vector.broadcast %cst_55 : f32 to vector<8x128xf32>
    %cst_56 = arith.constant 0.000000e+00 : f32
    %137 = vector.broadcast %cst_56 : f32 to vector<8x128xf32>
    %138 = vector.extract_strided_slice %129 {offsets = [0, 0], sizes = [1, 128], strides = [1, 1]} : vector<4x128xf32> to vector<1x128xf32>
    %139 = vector.broadcast %138 : vector<1x128xf32> to vector<8x128xf32>
    %140 = arith.mulf %133, %139 : vector<8x128xf32>
    %cst_57 = arith.constant dense<0.000000e+00> : vector<8xf32>
    %141 = vector.multi_reduction <add>, %140, %cst_57 [1] : vector<8x128xf32> to vector<8xf32>
    %142 = vector.shape_cast %141 : vector<8xf32> to vector<8x1xf32>
    %143 = vector.broadcast %138 : vector<1x128xf32> to vector<8x128xf32>
    %144 = arith.mulf %135, %143 : vector<8x128xf32>
    %cst_58 = arith.constant dense<0.000000e+00> : vector<8xf32>
    %145 = vector.multi_reduction <add>, %144, %cst_58 [1] : vector<8x128xf32> to vector<8xf32>
    %146 = vector.shape_cast %145 : vector<8xf32> to vector<8x1xf32>
    %cst_59 = arith.constant 0.00999999977 : f32
    %147 = vector.broadcast %cst_59 : f32 to vector<8x1xf32>
    %148 = arith.mulf %142, %147 : vector<8x1xf32>
    %cst_60 = arith.constant 0.00999999977 : f32
    %149 = vector.broadcast %cst_60 : f32 to vector<8x1xf32>
    %150 = arith.mulf %146, %149 : vector<8x1xf32>
    %151 = arith.mulf %148, %148 : vector<8x1xf32>
    %152 = arith.subf %150, %151 : vector<8x1xf32>
    %cst_61 = arith.constant 9.99999974E-6 : f32
    %153 = vector.broadcast %cst_61 : f32 to vector<8x1xf32>
    %154 = arith.addf %152, %153 : vector<8x1xf32>
    %155 = math.rsqrt %154 : vector<8x1xf32>
    %156 = vector.broadcast %148 : vector<8x1xf32> to vector<8x128xf32>
    %157 = vector.broadcast %138 : vector<1x128xf32> to vector<8x128xf32>
    %158 = arith.mulf %156, %157 : vector<8x128xf32>
    %159 = arith.addf %136, %158 : vector<8x128xf32>
    %160 = vector.broadcast %155 : vector<8x1xf32> to vector<8x128xf32>
    %161 = vector.broadcast %138 : vector<1x128xf32> to vector<8x128xf32>
    %162 = arith.mulf %160, %161 : vector<8x128xf32>
    %163 = arith.addf %137, %162 : vector<8x128xf32>
    %164 = vector.extract_strided_slice %129 {offsets = [1, 0], sizes = [1, 128], strides = [1, 1]} : vector<4x128xf32> to vector<1x128xf32>
    %165 = vector.broadcast %164 : vector<1x128xf32> to vector<8x128xf32>
    %166 = arith.mulf %133, %165 : vector<8x128xf32>
    %cst_62 = arith.constant dense<0.000000e+00> : vector<8xf32>
    %167 = vector.multi_reduction <add>, %166, %cst_62 [1] : vector<8x128xf32> to vector<8xf32>
    %168 = vector.shape_cast %167 : vector<8xf32> to vector<8x1xf32>
    %169 = vector.broadcast %164 : vector<1x128xf32> to vector<8x128xf32>
    %170 = arith.mulf %135, %169 : vector<8x128xf32>
    %cst_63 = arith.constant dense<0.000000e+00> : vector<8xf32>
    %171 = vector.multi_reduction <add>, %170, %cst_63 [1] : vector<8x128xf32> to vector<8xf32>
    %172 = vector.shape_cast %171 : vector<8xf32> to vector<8x1xf32>
    %cst_64 = arith.constant 0.00999999977 : f32
    %173 = vector.broadcast %cst_64 : f32 to vector<8x1xf32>
    %174 = arith.mulf %168, %173 : vector<8x1xf32>
    %cst_65 = arith.constant 0.00999999977 : f32
    %175 = vector.broadcast %cst_65 : f32 to vector<8x1xf32>
    %176 = arith.mulf %172, %175 : vector<8x1xf32>
    %177 = arith.mulf %174, %174 : vector<8x1xf32>
    %178 = arith.subf %176, %177 : vector<8x1xf32>
    %cst_66 = arith.constant 9.99999974E-6 : f32
    %179 = vector.broadcast %cst_66 : f32 to vector<8x1xf32>
    %180 = arith.addf %178, %179 : vector<8x1xf32>
    %181 = math.rsqrt %180 : vector<8x1xf32>
    %182 = vector.broadcast %174 : vector<8x1xf32> to vector<8x128xf32>
    %183 = vector.broadcast %164 : vector<1x128xf32> to vector<8x128xf32>
    %184 = arith.mulf %182, %183 : vector<8x128xf32>
    %185 = arith.addf %159, %184 : vector<8x128xf32>
    %186 = vector.broadcast %181 : vector<8x1xf32> to vector<8x128xf32>
    %187 = vector.broadcast %164 : vector<1x128xf32> to vector<8x128xf32>
    %188 = arith.mulf %186, %187 : vector<8x128xf32>
    %189 = arith.addf %163, %188 : vector<8x128xf32>
    %190 = vector.extract_strided_slice %129 {offsets = [2, 0], sizes = [1, 128], strides = [1, 1]} : vector<4x128xf32> to vector<1x128xf32>
    %191 = vector.broadcast %190 : vector<1x128xf32> to vector<8x128xf32>
    %192 = arith.mulf %133, %191 : vector<8x128xf32>
    %cst_67 = arith.constant dense<0.000000e+00> : vector<8xf32>
    %193 = vector.multi_reduction <add>, %192, %cst_67 [1] : vector<8x128xf32> to vector<8xf32>
    %194 = vector.shape_cast %193 : vector<8xf32> to vector<8x1xf32>
    %195 = vector.broadcast %190 : vector<1x128xf32> to vector<8x128xf32>
    %196 = arith.mulf %135, %195 : vector<8x128xf32>
    %cst_68 = arith.constant dense<0.000000e+00> : vector<8xf32>
    %197 = vector.multi_reduction <add>, %196, %cst_68 [1] : vector<8x128xf32> to vector<8xf32>
    %198 = vector.shape_cast %197 : vector<8xf32> to vector<8x1xf32>
    %cst_69 = arith.constant 0.00999999977 : f32
    %199 = vector.broadcast %cst_69 : f32 to vector<8x1xf32>
    %200 = arith.mulf %194, %199 : vector<8x1xf32>
    %cst_70 = arith.constant 0.00999999977 : f32
    %201 = vector.broadcast %cst_70 : f32 to vector<8x1xf32>
    %202 = arith.mulf %198, %201 : vector<8x1xf32>
    %203 = arith.mulf %200, %200 : vector<8x1xf32>
    %204 = arith.subf %202, %203 : vector<8x1xf32>
    %cst_71 = arith.constant 9.99999974E-6 : f32
    %205 = vector.broadcast %cst_71 : f32 to vector<8x1xf32>
    %206 = arith.addf %204, %205 : vector<8x1xf32>
    %207 = math.rsqrt %206 : vector<8x1xf32>
    %208 = vector.broadcast %200 : vector<8x1xf32> to vector<8x128xf32>
    %209 = vector.broadcast %190 : vector<1x128xf32> to vector<8x128xf32>
    %210 = arith.mulf %208, %209 : vector<8x128xf32>
    %211 = arith.addf %185, %210 : vector<8x128xf32>
    %212 = vector.broadcast %207 : vector<8x1xf32> to vector<8x128xf32>
    %213 = vector.broadcast %190 : vector<1x128xf32> to vector<8x128xf32>
    %214 = arith.mulf %212, %213 : vector<8x128xf32>
    %215 = arith.addf %189, %214 : vector<8x128xf32>
    %216 = vector.extract_strided_slice %129 {offsets = [3, 0], sizes = [1, 128], strides = [1, 1]} : vector<4x128xf32> to vector<1x128xf32>
    %217 = vector.broadcast %216 : vector<1x128xf32> to vector<8x128xf32>
    %218 = arith.mulf %133, %217 : vector<8x128xf32>
    %cst_72 = arith.constant dense<0.000000e+00> : vector<8xf32>
    %219 = vector.multi_reduction <add>, %218, %cst_72 [1] : vector<8x128xf32> to vector<8xf32>
    %220 = vector.shape_cast %219 : vector<8xf32> to vector<8x1xf32>
    %221 = vector.broadcast %216 : vector<1x128xf32> to vector<8x128xf32>
    %222 = arith.mulf %135, %221 : vector<8x128xf32>
    %cst_73 = arith.constant dense<0.000000e+00> : vector<8xf32>
    %223 = vector.multi_reduction <add>, %222, %cst_73 [1] : vector<8x128xf32> to vector<8xf32>
    %224 = vector.shape_cast %223 : vector<8xf32> to vector<8x1xf32>
    %cst_74 = arith.constant 0.00999999977 : f32
    %225 = vector.broadcast %cst_74 : f32 to vector<8x1xf32>
    %226 = arith.mulf %220, %225 : vector<8x1xf32>
    %cst_75 = arith.constant 0.00999999977 : f32
    %227 = vector.broadcast %cst_75 : f32 to vector<8x1xf32>
    %228 = arith.mulf %224, %227 : vector<8x1xf32>
    %229 = arith.mulf %226, %226 : vector<8x1xf32>
    %230 = arith.subf %228, %229 : vector<8x1xf32>
    %cst_76 = arith.constant 9.99999974E-6 : f32
    %231 = vector.broadcast %cst_76 : f32 to vector<8x1xf32>
    %232 = arith.addf %230, %231 : vector<8x1xf32>
    %233 = math.rsqrt %232 : vector<8x1xf32>
    %234 = vector.broadcast %226 : vector<8x1xf32> to vector<8x128xf32>
    %235 = vector.broadcast %216 : vector<1x128xf32> to vector<8x128xf32>
    %236 = arith.mulf %234, %235 : vector<8x128xf32>
    %237 = arith.addf %211, %236 : vector<8x128xf32>
    %238 = vector.broadcast %233 : vector<8x1xf32> to vector<8x128xf32>
    %239 = vector.broadcast %216 : vector<1x128xf32> to vector<8x128xf32>
    %240 = arith.mulf %238, %239 : vector<8x128xf32>
    %241 = arith.addf %215, %240 : vector<8x128xf32>
    %242 = vector.shape_cast %237 : vector<8x128xf32> to vector<8x1x128xf32>
    %243 = vector.broadcast %242 : vector<8x1x128xf32> to vector<8x8x128xf32>
    %244 = arith.subf %132, %243 : vector<8x8x128xf32>
    %245 = vector.shape_cast %241 : vector<8x128xf32> to vector<8x1x128xf32>
    %246 = vector.broadcast %245 : vector<8x1x128xf32> to vector<8x8x128xf32>
    %247 = arith.mulf %244, %246 : vector<8x8x128xf32>
    %248 = vector.shape_cast %130 : vector<1x128xf32> to vector<1x1x128xf32>
    %249 = vector.broadcast %248 : vector<1x1x128xf32> to vector<8x8x128xf32>
    %250 = arith.mulf %247, %249 : vector<8x8x128xf32>
    %251 = vector.shape_cast %131 : vector<1x128xf32> to vector<1x1x128xf32>
    %252 = vector.broadcast %251 : vector<1x1x128xf32> to vector<8x8x128xf32>
    %253 = arith.addf %250, %252 : vector<8x8x128xf32>
    %254 = tpu.iota {dimensions = array<i32: 1>} : vector<8x8x128xi32>
    %c0_i32 = arith.constant 0 : i32
    %255 = vector.broadcast %c0_i32 : i32 to vector<8x8x128xi32>
    %256 = arith.cmpi eq, %254, %255 : vector<8x8x128xi32>
    %cst_77 = arith.constant 0.000000e+00 : f32
    %257 = vector.broadcast %cst_77 : f32 to vector<8x8x128xf32>
    %258 = arith.select %256, %253, %257 : vector<8x8x128xi1>, vector<8x8x128xf32>
    %cst_78 = arith.constant dense<0.000000e+00> : vector<8x128xf32>
    %259 = vector.multi_reduction <add>, %258, %cst_78 [1] : vector<8x8x128xf32> to vector<8x128xf32>
    %c1_i32 = arith.constant 1 : i32
    %260 = vector.broadcast %c1_i32 : i32 to vector<8x8x128xi32>
    %261 = arith.cmpi eq, %254, %260 : vector<8x8x128xi32>
    %cst_79 = arith.constant 0.000000e+00 : f32
    %262 = vector.broadcast %cst_79 : f32 to vector<8x8x128xf32>
    %263 = arith.select %261, %253, %262 : vector<8x8x128xi1>, vector<8x8x128xf32>
    %cst_80 = arith.constant dense<0.000000e+00> : vector<8x128xf32>
    %264 = vector.multi_reduction <add>, %263, %cst_80 [1] : vector<8x8x128xf32> to vector<8x128xf32>
    %c2_i32 = arith.constant 2 : i32
    %265 = vector.broadcast %c2_i32 : i32 to vector<8x8x128xi32>
    %266 = arith.cmpi eq, %254, %265 : vector<8x8x128xi32>
    %cst_81 = arith.constant 0.000000e+00 : f32
    %267 = vector.broadcast %cst_81 : f32 to vector<8x8x128xf32>
    %268 = arith.select %266, %253, %267 : vector<8x8x128xi1>, vector<8x8x128xf32>
    %cst_82 = arith.constant dense<0.000000e+00> : vector<8x128xf32>
    %269 = vector.multi_reduction <add>, %268, %cst_82 [1] : vector<8x8x128xf32> to vector<8x128xf32>
    %c3_i32 = arith.constant 3 : i32
    %270 = vector.broadcast %c3_i32 : i32 to vector<8x8x128xi32>
    %271 = arith.cmpi eq, %254, %270 : vector<8x8x128xi32>
    %cst_83 = arith.constant 0.000000e+00 : f32
    %272 = vector.broadcast %cst_83 : f32 to vector<8x8x128xf32>
    %273 = arith.select %271, %253, %272 : vector<8x8x128xi1>, vector<8x8x128xf32>
    %cst_84 = arith.constant dense<0.000000e+00> : vector<8x128xf32>
    %274 = vector.multi_reduction <add>, %273, %cst_84 [1] : vector<8x8x128xf32> to vector<8x128xf32>
    %c4_i32 = arith.constant 4 : i32
    %275 = vector.broadcast %c4_i32 : i32 to vector<8x8x128xi32>
    %276 = arith.cmpi eq, %254, %275 : vector<8x8x128xi32>
    %cst_85 = arith.constant 0.000000e+00 : f32
    %277 = vector.broadcast %cst_85 : f32 to vector<8x8x128xf32>
    %278 = arith.select %276, %253, %277 : vector<8x8x128xi1>, vector<8x8x128xf32>
    %cst_86 = arith.constant dense<0.000000e+00> : vector<8x128xf32>
    %279 = vector.multi_reduction <add>, %278, %cst_86 [1] : vector<8x8x128xf32> to vector<8x128xf32>
    %280 = tpu.concatenate %259, %264, %269, %274, %279 in 1 : vector<8x128xf32>, vector<8x128xf32>, vector<8x128xf32>, vector<8x128xf32>, vector<8x128xf32> -> vector<8x640xf32>
    %281 = arith.truncf %280 : vector<8x640xf32> to vector<8x640xbf16>
    %c0_87 = arith.constant 0 : index
    %c0_88 = arith.constant 0 : index
    %282 = vector.load %arg10[%c0_87, %c0_88] : memref<640x120xbf16, #tpu.memory_space<vmem>>, vector<640x120xbf16>
    %cst_89 = arith.constant dense<0.000000e+00> : vector<8x120xf32>
    %283 = tpu.matmul %281, %282, %cst_89 {dimension_numbers = #tpu.dot_dimension_numbers<[1], [0], [0], [1], [0, 0, 1, 1], [], []>} : vector<8x640xbf16>, vector<640x120xbf16>, vector<8x120xf32> -> vector<8x120xf32>
    %c6 = arith.constant 6 : index
    %c0_90 = arith.constant 0 : index
    %284 = vector.load %arg13[%c6, %c0_90] : memref<9x256xf32, #tpu.memory_space<vmem>>, vector<1x120xf32>
    %285 = vector.broadcast %284 : vector<1x120xf32> to vector<8x120xf32>
    %286 = arith.addf %283, %285 : vector<8x120xf32>
    %287 = math.tanh %286 : vector<8x120xf32>
    %288 = arith.truncf %287 : vector<8x120xf32> to vector<8x120xbf16>
    %c0_91 = arith.constant 0 : index
    %c0_92 = arith.constant 0 : index
    %289 = vector.load %arg11[%c0_91, %c0_92] : memref<120x84xbf16, #tpu.memory_space<vmem>>, vector<120x84xbf16>
    %cst_93 = arith.constant dense<0.000000e+00> : vector<8x84xf32>
    %290 = tpu.matmul %288, %289, %cst_93 {dimension_numbers = #tpu.dot_dimension_numbers<[1], [0], [0], [1], [0, 0, 1, 1], [], []>} : vector<8x120xbf16>, vector<120x84xbf16>, vector<8x84xf32> -> vector<8x84xf32>
    %c7 = arith.constant 7 : index
    %c0_94 = arith.constant 0 : index
    %291 = vector.load %arg13[%c7, %c0_94] : memref<9x256xf32, #tpu.memory_space<vmem>>, vector<1x84xf32>
    %292 = vector.broadcast %291 : vector<1x84xf32> to vector<8x84xf32>
    %293 = arith.addf %290, %292 : vector<8x84xf32>
    %294 = math.tanh %293 : vector<8x84xf32>
    %295 = arith.truncf %294 : vector<8x84xf32> to vector<8x84xbf16>
    %c0_95 = arith.constant 0 : index
    %c0_96 = arith.constant 0 : index
    %296 = vector.load %arg12[%c0_95, %c0_96] : memref<84x128xbf16, #tpu.memory_space<vmem>>, vector<84x128xbf16>
    %cst_97 = arith.constant dense<0.000000e+00> : vector<8x128xf32>
    %297 = tpu.matmul %295, %296, %cst_97 {dimension_numbers = #tpu.dot_dimension_numbers<[1], [0], [0], [1], [0, 0, 1, 1], [], []>} : vector<8x84xbf16>, vector<84x128xbf16>, vector<8x128xf32> -> vector<8x128xf32>
    %c8 = arith.constant 8 : index
    %c0_98 = arith.constant 0 : index
    %298 = vector.load %arg13[%c8, %c0_98] : memref<9x256xf32, #tpu.memory_space<vmem>>, vector<1x128xf32>
    %299 = vector.broadcast %298 : vector<1x128xf32> to vector<8x128xf32>
    %300 = arith.addf %297, %299 : vector<8x128xf32>
    %c0_99 = arith.constant 0 : index
    %c0_100 = arith.constant 0 : index
    %301 = vector.load %arg14[%c0_99, %c0_100] : memref<8x128xf32, #tpu.memory_space<vmem>>, vector<8x128xf32>
    tpu.vector_store %arg14[%c0_99, %c0_100], %300 {strides = array<i32>} : memref<8x128xf32, #tpu.memory_space<vmem>>, vector<8x128xf32>,
    return
  }
  func.func @transform_0(%arg0: i32) -> (i32, i32) {
    %c0_i32 = arith.constant 0 : i32
    %c0_i32_0 = arith.constant 0 : i32
    return %arg0, %c0_i32 : i32, i32
  }
  func.func @transform_1(%arg0: i32) -> (i32, i32) {
    %c0_i32 = arith.constant 0 : i32
    %c0_i32_0 = arith.constant 0 : i32
    %c0_i32_1 = arith.constant 0 : i32
    return %c0_i32, %c0_i32_0 : i32, i32
  }
  func.func @transform_2(%arg0: i32) -> (i32, i32) {
    %c0_i32 = arith.constant 0 : i32
    %c0_i32_0 = arith.constant 0 : i32
    %c0_i32_1 = arith.constant 0 : i32
    return %c0_i32, %c0_i32_0 : i32, i32
  }
  func.func @transform_3(%arg0: i32) -> (i32, i32, i32) {
    %c0_i32 = arith.constant 0 : i32
    %c0_i32_0 = arith.constant 0 : i32
    %c0_i32_1 = arith.constant 0 : i32
    %c0_i32_2 = arith.constant 0 : i32
    return %c0_i32, %c0_i32_0, %c0_i32_1 : i32, i32, i32
  }
  func.func @transform_4(%arg0: i32) -> (i32, i32) {
    %c0_i32 = arith.constant 0 : i32
    %c0_i32_0 = arith.constant 0 : i32
    %c0_i32_1 = arith.constant 0 : i32
    return %c0_i32, %c0_i32_0 : i32, i32
  }
  func.func @transform_5(%arg0: i32) -> (i32, i32) {
    %c0_i32 = arith.constant 0 : i32
    %c0_i32_0 = arith.constant 0 : i32
    %c0_i32_1 = arith.constant 0 : i32
    return %c0_i32, %c0_i32_0 : i32, i32
  }
  func.func @transform_6(%arg0: i32) -> (i32, i32, i32) {
    %c0_i32 = arith.constant 0 : i32
    %c0_i32_0 = arith.constant 0 : i32
    %c0_i32_1 = arith.constant 0 : i32
    %c0_i32_2 = arith.constant 0 : i32
    return %c0_i32, %c0_i32_0, %c0_i32_1 : i32, i32, i32
  }
  func.func @transform_7(%arg0: i32) -> (i32, i32) {
    %c0_i32 = arith.constant 0 : i32
    %c0_i32_0 = arith.constant 0 : i32
    %c0_i32_1 = arith.constant 0 : i32
    return %c0_i32, %c0_i32_0 : i32, i32
  }
  func.func @transform_8(%arg0: i32) -> (i32, i32) {
    %c0_i32 = arith.constant 0 : i32
    %c0_i32_0 = arith.constant 0 : i32
    %c0_i32_1 = arith.constant 0 : i32
    return %c0_i32, %c0_i32_0 : i32, i32
  }
  func.func @transform_9(%arg0: i32) -> (i32, i32) {
    %c0_i32 = arith.constant 0 : i32
    %c0_i32_0 = arith.constant 0 : i32
    %c0_i32_1 = arith.constant 0 : i32
    return %c0_i32, %c0_i32_0 : i32, i32
  }
  func.func @transform_10(%arg0: i32) -> (i32, i32) {
    %c0_i32 = arith.constant 0 : i32
    %c0_i32_0 = arith.constant 0 : i32
    %c0_i32_1 = arith.constant 0 : i32
    return %c0_i32, %c0_i32_0 : i32, i32
  }
  func.func @transform_11(%arg0: i32) -> (i32, i32) {
    %c0_i32 = arith.constant 0 : i32
    %c0_i32_0 = arith.constant 0 : i32
    %c0_i32_1 = arith.constant 0 : i32
    return %c0_i32, %c0_i32_0 : i32, i32
  }
  func.func @transform_12(%arg0: i32) -> (i32, i32) {
    %c0_i32 = arith.constant 0 : i32
    %c0_i32_0 = arith.constant 0 : i32
    %c0_i32_1 = arith.constant 0 : i32
    return %c0_i32, %c0_i32_0 : i32, i32
  }
  func.func @transform_13(%arg0: i32) -> (i32, i32) {
    %c0_i32 = arith.constant 0 : i32
    %c0_i32_0 = arith.constant 0 : i32
    return %arg0, %c0_i32 : i32, i32
  }
}

</mosaic_0001>

<bundles_post_ra>
// kernel: net_forward.1
= control target key start
LH: loop header
LB: loop body
LE: loop exit
PB: predicated region body
PF: predicated region fallthrough
CT: control target
= control target key end

     0   :  { %18 = vsyncpa [#allocation3], 0  ;;  %s11654_s0 = inlined_call_operand.vmem [shape: f32[512,128], index: 0, kind: input, shape index: {}]   ;;  %s11655_s1 = inlined_call_operand.vmem [shape: bf16[640,168], index: 1, kind: input, shape index: {}]   ;;  %s11656_s2 = inlined_call_operand.vmem [shape: f32[168,128], index: 2, kind: input, shape index: {}]   ;;  %s11657_s3 = inlined_call_operand.vmem [shape: f32[8,16,32], index: 3, kind: input, shape index: {}]   ;;  %s11658_s4 = inlined_call_operand.vmem [shape: bf16[640,160], index: 4, kind: input, shape index: {}]   ;;  %s11659_s5 = inlined_call_operand.vmem [shape: f32[160,128], index: 5, kind: input, shape index: {}]   ;;  %s11660_s6 = inlined_call_operand.vmem [shape: f32[8,8,16], index: 6, kind: input, shape index: {}]   ;;  %s11661_s7 = inlined_call_operand.vmem [shape: f32[2,128], index: 7, kind: input, shape index: {}]   ;;  %s11662_s8 = inlined_call_operand.vmem [shape: f32[4,128], index: 8, kind: input, shape index: {}]   ;;  %s11663_s9 = inlined_call_operand.vmem [shape: bf16[640,120], index: 9, kind: input, shape index: {}]   ;;  %s11664_s10 = inlined_call_operand.vmem [shape: bf16[120,84], index: 10, kind: input, shape index: {}]   ;;  %s11665_s11 = inlined_call_operand.vmem [shape: bf16[84,128], index: 11, kind: input, shape index: {}]   ;;  %s11666_s12 = inlined_call_operand.vmem [shape: f32[9,256], index: 12, kind: input, shape index: {}]   ;;  %s11667_s13 = inlined_call_operand.hbm [shape: f32[16,128], index: 13, kind: output, shape index: {}]  }
   0x1   :  { %20 = vsyncpa [#allocation3 + $0x1], 0  ;;  %s8880_s25 = smov 0   ;;  %s8882_s26 = smov 0  }
   0x2   :  { %s8884_s27 = smov 0   ;;  %s8886_s28 = smov 0  }
   0x3 LB: > { %11673 = sst [smem:[#allocation5_spill]] %s8797_s27  ;;  %s8901_s29 = sadd.s32 4294967295, %s8801_s28   ;;  %s8801_s28 = sphi %s8886_s28, %s11687_s28   ;;  %s8797_s27 = sphi %s8884_s27, %s11692_s27   ;;  %s8793_s26 = sphi %s8882_s26, %s11691_s26   ;;  %s8789_s25 = sphi %s8880_s25, %s11690_s25  }
   0x4   : > { %s7140_s30 = sadd.s32 4294967294, %s8801_s28   ;;  %s8905_s14 = sadd.s32 1, %s8801_s28  }
   0x5   : > { %11674 = sst [smem:[#allocation6_spill]] %s8905_s14  ;;  %s311_s15 = sadd.s32 1, %s8797_s27 }
   0x6   : > { %s308_s16 = ssub.s32 %s8801_s28, %s8905_s14  ;;  %p321_p0 = scmp.ne.s32.totalorder %s8797_s27, %s8793_s26 }
   0x7   : > { %p309_p1 = scmp.eq.s32.totalorder %s308_s16, 0  ;;  %p322_p2 = scmp.eq.s32.totalorder %s8901_s29, 1 }
   0x8   : > { %p327_p3 = scmp.ne.s32.totalorder %s8793_s26, %s8789_s25  ;;  %p328_p4 = scmp.eq.s32.totalorder %s7140_s30, 1 }
   0x9   : > { %s8916_s17 = scalar_select %p309_p1, %s8797_s27, %s311_s15  }
   0xa   : > { %p8918_p5 = por %p322_p2, %p321_p0  ;;  %p8922_p6 = por %p328_p4, %p327_p3 }
   0xb   : > { %11675 = sst [smem:[#allocation7_spill]] %s8916_s17  ;;  %p7143_p7 = scmp.ge.s32.totalorder %s8801_s28, 1 }
   0xc   : > { %p391_p8 = scmp.lt.s32.totalorder %s8801_s28, 3 }
   0xe   : > { %p392_p9 = pnand %p7143_p7, %p391_p8 }
   0xf   : > { %v8222_v0 = vld [vmem:[%s11655_s1 + $0x4] ss:$8 sps:$4 sm:$0xff] (!%p392_p9)   ;;  %v8224_v1 = vld [vmem:[%s11655_s1] ss:$8 sps:$4 sm:$0xff] (!%p392_p9)   ;;  %v8225_v2 = vld [vmem:[%s11655_s1 + $0x14] ss:$8 sps:$4 sm:$0xff] (!%p392_p9)  }
  0x10   : > { %395 = sbr.rel (%p392_p9) target bundleno = 3154 (0xc52), region = 72  ;;  %1466 = vmatprep.subr.bf16.mxu0 (!%p392_p9), %v8222_v0  ;;  %v8227_v3 = vld [vmem:[%s11655_s1 + $0x10] ss:$8 sps:$4 sm:$0xff] (!%p392_p9)   ;;  %v8228_v4 = vld [vmem:[%s11655_s1 + $0x24] ss:$8 sps:$4 sm:$0xff] (!%p392_p9)   ;;  %s7145_s20 = sshll.u32 (!%p392_p9), %s8901_s29, 5 }
  0x11   : > { %1467 = vmatpush1.bf16.msra.mxu0 (!%p392_p9), %v8224_v1  ;;  %v8230_v5 = vld [vmem:[%s11655_s1 + $0x20] ss:$8 sps:$4 sm:$0xff] (!%p392_p9)   ;;  %p436_p10 = scmp.lt.s32.totalorder (!%p392_p9), %s7145_s20, 63  ;;  %v8231_v6 = vld [vmem:[%s11655_s1 + $0x34] ss:$8 sps:$4 sm:$0xff] (!%p392_p9)   ;;  %vm507_vm0 = vcmask (!%p392_p9), 1046528  }
  0x12   : > { %1468 = vmatprep.subr.bf16.mxu0 (!%p392_p9), %v8225_v2  ;;  %v8233_v7 = vld [vmem:[%s11655_s1 + $0x30] ss:$8 sps:$4 sm:$0xff] (!%p392_p9)   ;;  %v8234_v8 = vld [vmem:[%s11655_s1 + $0x44] ss:$8 sps:$4 sm:$0xff] (!%p392_p9)   ;;  %v8236_v9 = vld [vmem:[%s11655_s1 + $0x40] ss:$8 sps:$4 sm:$0xff] (!%p392_p9)  }
  0x13   : > { %v8237_v10 = vld [vmem:[%s11655_s1 + $0x54] ss:$8 sps:$4 sm:$0xff] (!%p392_p9)   ;;  %v8239_v11 = vld [vmem:[%s11655_s1 + $0x50] ss:$8 sps:$4 sm:$0xff] (!%p392_p9)   ;;  %v8240_v12 = vld [vmem:[%s11655_s1 + $0x64] ss:$8 sps:$4 sm:$0xff] (!%p392_p9)  }
  0x14   : > { %v8242_v18 = vld [vmem:[%s11655_s1 + $0x60] ss:$8 sps:$4 sm:$0xff] (!%p392_p9)   ;;  %v8243_v20 = vld [vmem:[%s11655_s1 + $0x74] ss:$8 sps:$4 sm:$0xff] (!%p392_p9)   ;;  %v8245_v24 = vld [vmem:[%s11655_s1 + $0x70] ss:$8 sps:$4 sm:$0xff] (!%p392_p9)  }
  0x15   : > { %1469 = vmatpush1.bf16.msra.mxu0 (!%p392_p9), %v8227_v3  ;;  %v8246_v25 = vld [vmem:[%s11655_s1 + $0x84] ss:$8 sps:$4 sm:$0xff] (!%p392_p9)   ;;  %v8248_v26 = vld [vmem:[%s11655_s1 + $0x80] ss:$8 sps:$4 sm:$0xff] (!%p392_p9)   ;;  %v8249_v27 = vld [vmem:[%s11655_s1 + $0x94] ss:$8 sps:$4 sm:$0xff] (!%p392_p9)  }
  0x16   : > { %1470 = vmatprep.subr.bf16.mxu0 (!%p392_p9), %v8228_v4  ;;  %v8251_v28 = vld [vmem:[%s11655_s1 + $0x90] ss:$8 sps:$4 sm:$0xff] (!%p392_p9)   ;;  %v8252_v29 = vld [vmem:[%s11655_s1 + $0xa4] ss:$8 sps:$4 sm:$0xff] (!%p392_p9)   ;;  %v8254_v30 = vld [vmem:[%s11655_s1 + $0xa0] ss:$8 sps:$4 sm:$0xff] (!%p392_p9)  }
  0x17   : > { %s11694_s20 = smov (!%p436_p10, %s7145_s20), 63  ;;  %v8255_v31 = vld [vmem:[%s11655_s1 + $0xb4] ss:$8 sps:$4 sm:$0xff]   ;;  %v8257_v32 = vld [vmem:[%s11655_s1 + $0xb0] ss:$8 sps:$4 sm:$0xff]   ;;  %vm8803_vm1 = vmmov 1  }
  0x18   : > { %s7146_s22 = sshll.u32 %s11694_s20, 3  ;;  %v8258_v33 = vld [vmem:[%s11655_s1 + $0xc4] ss:$8 sps:$4 sm:$0xff]   ;;  %v8260_v34 = vld [vmem:[%s11655_s1 + $0xc0] ss:$8 sps:$4 sm:$0xff]   ;;  %vm9050_vm2 = vmpackc.low %vm507_vm0, %vm8803_vm1  ;;  %vm701_vm3 = vcmask 1044480  }
  0x19   : > { %1471 = vmatpush1.bf16.msra.mxu0 %v8230_v5  ;;  %s8965_s15 = scalar_lea.vmem %s11654_s0, %s7146_s22  ;;  %v8261_v35 = vld [vmem:[%s11655_s1 + $0xd4] ss:$8 sps:$4 sm:$0xff]   ;;  %v8263_v36 = vld [vmem:[%s11655_s1 + $0xd0] ss:$8 sps:$4 sm:$0xff]   ;;  %v8264_v37 = vld [vmem:[%s11655_s1 + $0xe4] ss:$8 sps:$4 sm:$0xff]  }
  0x1a   : > { %1472 = vmatprep.subr.bf16.mxu0 %v8231_v6  ;;  %v8974_v13 = vld [vmem:[%s8965_s15] sm:$0xff]  ;;  %v8977_v14 = vld [vmem:[%s8965_s15 + $0x8] sm:$0xff]  ;;  %v8980_v15 = vld [vmem:[%s8965_s15 + $0x10] sm:$0xff]  ;;  %vm604_vm4 = vcmask 1045504   ;;  %vm798_vm7 = vcmask 1043456   ;;  %vm2125_vm9 = vcmask 261120  }
  0x1b   : > { %v508_v16 = vrot.slane %v8974_v13, 1  ;;  %v509_v17 = vrot.slane %v8977_v14, 1  ;;  %v511_v19 = vrot.slane %v8980_v15, 1  ;;  %v9036_v38 = vld [vmem:[%s8965_s15 + $0x18] sm:$0xff]  ;;  %v8266_v39 = vld [vmem:[%s11655_s1 + $0xe0] ss:$8 sps:$4 sm:$0xff]   ;;  %v895_v50 = vpack.c.bf16 %v8977_v14, %v8974_v13  ;;  %vm9353_vm5 = vmpackc.low %vm701_vm3, %vm8803_vm1 }
  0x1c   : > { %v8267_v40 = vld [vmem:[%s11655_s1 + $0xf4] ss:$8 sps:$4 sm:$0xff]   ;;  %v513_v41 = vrot.slane %v9036_v38, 1  ;;  %v8269_v42 = vld [vmem:[%s11655_s1 + $0xf0] ss:$8 sps:$4 sm:$0xff]   ;;  %v9055_v44 = vld [vmem:[%s8965_s15 + $0x20] sm:$0xff]  ;;  %v900_v62 = vpack.c.bf16 %v9036_v38, %v8980_v15 }
  0x1d   : > { %1473 = vmatpush1.bf16.msra.mxu0 %v8233_v7  ;;  %v510_v21 = vsel %vm507_vm0, %v508_v16, %v509_v17  ;;  %v512_v22 = vsel %vm507_vm0, %v509_v17, %v511_v19  ;;  %v9058_v45 = vld [vmem:[%s8965_s15 + $0x28] sm:$0xff]  ;;  %v9061_v46 = vld [vmem:[%s8965_s15 + $0x30] sm:$0xff]  ;;  %v515_v53 = vrot.slane %v9055_v44, 1  ;;  %v9084_v57 = vld [vmem:[%s8965_s15 + $0x38] sm:$0xff]  ;;  %vm2811_vm10 = vcmask 326656   ;;  %s7605_s17 = sshll.u32 %s8901_s29, 7 }
  0x1e   : > { %1474 = vmatprep.subr.bf16.mxu0 %v8234_v8  ;;  %v896_v23 = vpack.c.bf16 %v512_v22, %v510_v21  ;;  %v8272_v47 = vld [vmem:[%s11655_s1 + $0x104] ss:$8 sps:$4 sm:$0xff]   ;;  %v514_v48 = vsel %vm507_vm0, %v511_v19, %v513_v41  ;;  %v8270_v49 = vld [vmem:[%s11655_s1 + $0x100] ss:$8 sps:$4 sm:$0xff]   ;;  %v8275_v51 = vld [vmem:[%s11655_s1 + $0x114] ss:$8 sps:$4 sm:$0xff]   ;;  %s11612_s22 = scalar_lea.hbm %s11667_s13, %s7605_s17 }
  0x1f   : > { %v7228_v52 = vpack.c.bf16 %v513_v41, %v514_v48  ;;  %v516_v54 = vrot.slane %v9058_v45, 1  ;;  %v518_v55 = vrot.slane %v9061_v46, 1  ;;  %v8273_v56 = vld [vmem:[%s11655_s1 + $0x110] ss:$8 sps:$4 sm:$0xff]   ;;  %v8278_v58 = vld [vmem:[%s11655_s1 + $0x124] ss:$8 sps:$4 sm:$0xff]   ;;  %vm9376_vm6 = vmpackc.low %vm604_vm4, %vm8803_vm1 }
  0x20   : > { %1498 = vmatprep.mubr.bf16.mxu0 %v896_v23  ;;  %v8276_v61 = vld [vmem:[%s11655_s1 + $0x120] ss:$8 sps:$4 sm:$0xff]   ;;  %v8281_v63 = vld [vmem:[%s11655_s1 + $0x134] ss:$8 sps:$4 sm:$0xff]   ;;  %v520_v1 = vrot.slane %v9084_v57, 1  ;;  %vm9547_vm8 = vmpackc.low %vm798_vm7, %vm8803_vm1  ;;  %vm3157_vm11 = vcmask 1041409  }
  0x21   : > { %1475 = vmatpush1.bf16.msra.mxu0 %v8236_v9  ;;  %v517_v59 = vsel %vm507_vm0, %v515_v53, %v516_v54  ;;  %v519_v60 = vsel %vm507_vm0, %v516_v54, %v518_v55  ;;  %v8279_v2 = vld [vmem:[%s11655_s1 + $0x130] ss:$8 sps:$4 sm:$0xff]   ;;  %v8284_v3 = vld [vmem:[%s11655_s1 + $0x144] ss:$8 sps:$4 sm:$0xff]   ;;  %v8282_v8 = vld [vmem:[%s11655_s1 + $0x140] ss:$8 sps:$4 sm:$0xff]   ;;  %v905_v9 = vpack.c.bf16 %v9058_v45, %v9055_v44 }
  0x22   : > { %1476 = vmatprep.subr.bf16.mxu0 %v8237_v10  ;;  %v906_v0 = vpack.c.bf16 %v519_v60, %v517_v59  ;;  %v9107_v4 = vld [vmem:[%s8965_s15 + $0x40] sm:$0xff]  ;;  %v9110_v5 = vld [vmem:[%s8965_s15 + $0x48] sm:$0xff]  ;;  %v9113_v6 = vld [vmem:[%s8965_s15 + $0x50] sm:$0xff]  ;;  %v521_v7 = vsel %vm507_vm0, %v518_v55, %v520_v1  ;;  %vm3160_vm12 = vcmask 1042434   ;;  %vm3163_vm13 = vcmask 1043459  }
  0x23   : > { %v8287_v10 = vld [vmem:[%s11655_s1 + $0x154] ss:$8 sps:$4 sm:$0xff]   ;;  %v523_v16 = vrot.slane %v9110_v5, 1  ;;  %v525_v17 = vrot.slane %v9113_v6, 1  ;;  %v8285_v19 = vld [vmem:[%s11655_s1 + $0x150] ss:$8 sps:$4 sm:$0xff]  }
  0x24   : > { %v9141_v23 = vld [vmem:[%s8965_s15 + $0x60] sm:$0xff]  ;;  %v8299_v41 = vld [vmem:[%s11655_s1 + $0x194] ss:$8 sps:$4 sm:$0xff]   ;;  %v8297_v48 = vld [vmem:[%s11655_s1 + $0x190] ss:$8 sps:$4 sm:$0xff]   ;;  %vm3166_vm14 = vcmask 1044484  }
  0x25   : > { %1477 = vmatpush1.bf16.msra.mxu0 %v8239_v11  ;;  %v7231_v11 = vpack.c.bf16 %v520_v1, %v521_v7  ;;  %v526_v22 = vsel %vm507_vm0, %v523_v16, %v525_v17  ;;  %v9194_v53 = vld [vmem:[%s8965_s15 + $0x88] sm:$0xff]  ;;  %v9197_v54 = vld [vmem:[%s8965_s15 + $0x90] sm:$0xff]  ;;  %vm3169_vm15 = vcmask 1045509   ;;  %vm3172_vm1 = vcmask 1046534  }
  0x26   : > { %1478 = vmatprep.subr.bf16.mxu0 %v8240_v12  ;;  %v522_v12 = vrot.slane %v9107_v4, 1  ;;  %v8300_v55 = vld [vmem:[%s11655_s1 + $0x1a0] ss:$8 sps:$4 sm:$0xff]   ;;  %v8437_v43 = vld [vmem:[%s11658_s4 + $0x1f4] ss:$8 sps:$4 sm:$0xff]  }
  0x28   : > { %v524_v21 = vsel %vm507_vm0, %v522_v12, %v523_v16  ;;  %v8314_v12 = vld [vmem:[%s11655_s1 + $0x1e4] ss:$8 sps:$4 sm:$0xff]  }
  0x29   : > { %1479 = vmatpush1.bf16.msra.mxu0 %v8242_v18  ;;  %v9128_v18 = vld [vmem:[%s8965_s15 + $0x58] sm:$0xff] }
  0x2a   : > { %1480 = vmatprep.subr.bf16.mxu0 %v8243_v20  ;;  %v8290_v20 = vld [vmem:[%s11655_s1 + $0x164] ss:$8 sps:$4 sm:$0xff]  }
  0x2d   : > { %1481 = vmatpush1.bf16.msra.mxu0 %v8245_v24  ;;  %v9144_v24 = vld [vmem:[%s8965_s15 + $0x68] sm:$0xff] }
  0x2e   : > { %1482 = vmatprep.subr.bf16.mxu0 %v8246_v25  ;;  %v9147_v25 = vld [vmem:[%s8965_s15 + $0x70] sm:$0xff]  ;;  %v925_v7 = vpack.c.bf16 %v9144_v24, %v9141_v23 }
  0x31   : > { %1483 = vmatpush1.bf16.msra.mxu0 %v8248_v26  ;;  %v8288_v26 = vld [vmem:[%s11655_s1 + $0x160] ss:$8 sps:$4 sm:$0xff]  }
  0x32   : > { %1484 = vmatprep.subr.bf16.mxu0 %v8249_v27  ;;  %v910_v27 = vpack.c.bf16 %v9084_v57, %v9061_v46 }
  0x35   : > { %1485 = vmatpush1.bf16.msra.mxu0 %v8251_v28  ;;  %v527_v28 = vrot.slane %v9128_v18, 1 }
  0x36   : > { %1486 = vmatprep.subr.bf16.mxu0 %v8252_v29  ;;  %v8293_v29 = vld [vmem:[%s11655_s1 + $0x174] ss:$8 sps:$4 sm:$0xff]  }
  0x39   : > { %1487 = vmatpush1.bf16.msra.mxu0 %v8254_v30  ;;  %v916_v30 = vpack.c.bf16 %v526_v22, %v524_v21  ;;  %v9246_v21 = vld [vmem:[%s8965_s15 + $0xb0] sm:$0xff]  ;;  %v8312_v22 = vld [vmem:[%s11655_s1 + $0x1e0] ss:$8 sps:$4 sm:$0xff]  }
  0x3a   : > { %1488 = vmatprep.subr.bf16.mxu0 %v8255_v31  ;;  %v529_v31 = vrot.slane %v9141_v23, 1 }
  0x3d   : > { %1489 = vmatpush1.bf16.msra.mxu0 %v8257_v32  ;;  %v530_v32 = vrot.slane %v9144_v24, 1 }
  0x3e   : > { %1490 = vmatprep.subr.bf16.mxu0 %v8258_v33  ;;  %v532_v33 = vrot.slane %v9147_v25, 1 }
  0x41   : > { %1491 = vmatpush1.bf16.msra.mxu0 %v8260_v34  ;;  %v8291_v34 = vld [vmem:[%s11655_s1 + $0x170] ss:$8 sps:$4 sm:$0xff]  }
  0x42   : > { %1492 = vmatprep.subr.bf16.mxu0 %v8261_v35  ;;  %v8296_v35 = vld [vmem:[%s11655_s1 + $0x184] ss:$8 sps:$4 sm:$0xff]  }
  0x45   : > { %1493 = vmatpush1.bf16.msra.mxu0 %v8263_v36  ;;  %v528_v36 = vsel %vm507_vm0, %v525_v17, %v527_v28 }
  0x46   : > { %1494 = vmatprep.subr.bf16.mxu0 %v8264_v37  ;;  %v9169_v37 = vld [vmem:[%s8965_s15 + $0x78] sm:$0xff] }
  0x49   : > { %1495 = vmatpush1.bf16.msra.mxu0 %v8266_v39  ;;  %v8294_v39 = vld [vmem:[%s11655_s1 + $0x180] ss:$8 sps:$4 sm:$0xff]  }
  0x4a   : > { %1496 = vmatprep.subr.bf16.mxu0 %v8267_v40  ;;  %v915_v40 = vpack.c.bf16 %v9110_v5, %v9107_v4 }
  0x4d   : > { %1497 = vmatpush1.bf16.msra.mxu0 %v8269_v42  ;;  %v7234_v42 = vpack.c.bf16 %v527_v28, %v528_v36 }
  0x4e   : > { %1659 = vmatprep.subr.bf16.mxu0 %v8272_v47  ;;  %v534_v47 = vrot.slane %v9169_v37, 1 }
  0x50   : > { %1499 = vmatmul.mubr.bf16.vlgmr.msra.gmra.mrb[0].mxu0 %v895_v50  ;;  %v531_v50 = vsel %vm507_vm0, %v529_v31, %v530_v32  ;;  %v535_v1 = vsel %vm507_vm0, %v532_v33, %v534_v47  ;;  %v546_v31 = vrot.slane %v9246_v21, 1 }
  0x51   : > { %7229 = vmatprep.mubr.msk.bf16.mxu0 %vm9050_vm2, %v7228_v52  ;;  %1660 = vmatpush1.bf16.msra.mxu0 %v8270_v49  ;;  %v8302_v49 = vld [vmem:[%s11655_s1 + $0x1a4] ss:$8 sps:$4 sm:$0xff]  }
  0x52   : > { %1661 = vmatprep.subr.bf16.mxu0 %v8275_v51  ;;  %v533_v51 = vsel %vm507_vm0, %v530_v32, %v532_v33  ;;  %v9191_v52 = vld [vmem:[%s8965_s15 + $0x80] sm:$0xff]  ;;  %v8315_v32 = vld [vmem:[%s11655_s1 + $0x1f0] ss:$8 sps:$4 sm:$0xff]  }
  0x53   : > { %v926_v59 = vpack.c.bf16 %v533_v51, %v531_v50  ;;  %v536_v60 = vrot.slane %v9191_v52, 1  ;;  %v8320_v33 = vld [vmem:[%s11655_s1 + $0x204] ss:$8 sps:$4 sm:$0xff]  }
  0x54   : > { %v9280_v50 = vld [vmem:[%s8965_s15 + $0xc0] sm:$0xff]  ;;  %v9283_v51 = vld [vmem:[%s8965_s15 + $0xc8] sm:$0xff] }
  0x55   : > { %1662 = vmatpush1.bf16.msra.mxu0 %v8273_v56  ;;  %v920_v56 = vpack.c.bf16 %v9128_v18, %v9113_v6 }
  0x56   : > { %1663 = vmatprep.subr.bf16.mxu0 %v8278_v58  ;;  %v8305_v58 = vld [vmem:[%s11655_s1 + $0x1b4] ss:$8 sps:$4 sm:$0xff]  }
  0x58   : > { %1509 = vmatmul.mubr.bf16.gmra.mrb[4].mxu0 %v900_v62  ;;  %v539_v62 = vrot.slane %v9197_v54, 1 }
  0x59   : > { %1518 = vmatprep.mubr.bf16.mxu0 %v906_v0  ;;  %1664 = vmatpush1.bf16.msra.mxu0 %v8276_v61  ;;  %v537_v61 = vrot.slane %v9194_v53, 1  ;;  %v8308_v0 = vld [vmem:[%s11655_s1 + $0x1c4] ss:$8 sps:$4 sm:$0xff]  }
  0x5a   : > { %1665 = vmatprep.subr.bf16.mxu0 %v8281_v63  ;;  %v8303_v63 = vld [vmem:[%s11655_s1 + $0x1b0] ss:$8 sps:$4 sm:$0xff]  }
  0x5b   : > { %v538_v16 = vsel %vm507_vm0, %v536_v60, %v537_v61  ;;  %v540_v17 = vsel %vm507_vm0, %v537_v61, %v539_v62  ;;  %v551_v60 = vrot.slane %v9283_v51, 1 }
  0x5c   : > { %v936_v28 = vpack.c.bf16 %v540_v17, %v538_v16 }
  0x5d   : > { %1666 = vmatpush1.bf16.msra.mxu0 %v8279_v2  ;;  %v9218_v2 = vld [vmem:[%s8965_s15 + $0x98] sm:$0xff] }
  0x5e   : > { %1667 = vmatprep.subr.bf16.mxu0 %v8284_v3  ;;  %v8306_v3 = vld [vmem:[%s11655_s1 + $0x1c0] ss:$8 sps:$4 sm:$0xff]  }
  0x60   : > { %1519 = vmatmul.mubr.bf16.gmra.mrb[8].mxu0 %v905_v9  ;;  %v7237_v9 = vpack.c.bf16 %v534_v47, %v535_v1 }
  0x61   : > { %7232 = vmatprep.mubr.msk.bf16.mxu0 %vm9050_vm2, %v7231_v11  ;;  %1668 = vmatpush1.bf16.msra.mxu0 %v8282_v8  ;;  %v8311_v8 = vld [vmem:[%s11655_s1 + $0x1d4] ss:$8 sps:$4 sm:$0xff]   ;;  %v8309_v11 = vld [vmem:[%s11655_s1 + $0x1d0] ss:$8 sps:$4 sm:$0xff]  }
  0x62   : > { %1669 = vmatprep.subr.bf16.mxu0 %v8287_v10  ;;  %v541_v10 = vrot.slane %v9218_v2, 1 }
  0x65   : > { %1670 = vmatpush1.bf16.msra.mxu0 %v8285_v19  ;;  %v9240_v19 = vld [vmem:[%s8965_s15 + $0xa0] sm:$0xff] }
  0x66   : > { %1671 = vmatprep.subr.bf16.mxu0 %v8290_v20  ;;  %v9243_v20 = vld [vmem:[%s8965_s15 + $0xa8] sm:$0xff] }
  0x68   : > { %1529 = vmatmul.mubr.bf16.gmra.mrb[12].mxu0 %v910_v27  ;;  %v8317_v27 = vld [vmem:[%s11655_s1 + $0x1f4] ss:$8 sps:$4 sm:$0xff]  }
  0x69   : > { %1538 = vmatprep.mubr.bf16.mxu0 %v916_v30  ;;  %1672 = vmatpush1.bf16.msra.mxu0 %v8288_v26  ;;  %v930_v26 = vpack.c.bf16 %v9169_v37, %v9147_v25  ;;  %v544_v30 = vrot.slane %v9243_v20, 1 }
  0x6a   : > { %1673 = vmatprep.subr.bf16.mxu0 %v8293_v29  ;;  %v543_v29 = vrot.slane %v9240_v19, 1 }
  0x6d   : > { %1674 = vmatpush1.bf16.msra.mxu0 %v8291_v34  ;;  %v542_v34 = vsel %vm507_vm0, %v539_v62, %v541_v10 }
  0x6e   : > { %1675 = vmatprep.subr.bf16.mxu0 %v8296_v35  ;;  %v935_v35 = vpack.c.bf16 %v9194_v53, %v9191_v52  ;;  %v7240_v36 = vpack.c.bf16 %v541_v10, %v542_v34  ;;  %v9308_v10 = vld [vmem:[%s8965_s15 + $0xe8] sm:$0xff] }
  0x70   : > { %1539 = vmatmul.mubr.bf16.gmra.mrb[16].mxu0 %v915_v40  ;;  %v547_v40 = vsel %vm507_vm0, %v544_v30, %v546_v31 }
  0x71   : > { %7235 = vmatprep.mubr.msk.bf16.mxu0 %vm9050_vm2, %v7234_v42  ;;  %1676 = vmatpush1.bf16.msra.mxu0 %v8294_v39  ;;  %v545_v39 = vsel %vm507_vm0, %v543_v29, %v544_v30  ;;  %v940_v42 = vpack.c.bf16 %v9218_v2, %v9197_v54  ;;  %v9323_v29 = vld [vmem:[%s8965_s15 + $0xf8] sm:$0xff] }
  0x72   : > { %1677 = vmatprep.subr.bf16.mxu0 %v8299_v41  ;;  %v9273_v41 = vld [vmem:[%s8965_s15 + $0xb8] sm:$0xff]  ;;  %v946_v47 = vpack.c.bf16 %v547_v40, %v545_v39  ;;  %v703_v39 = vrot.slane %v8977_v14, 3  ;;  %v705_v40 = vrot.slane %v8980_v15, 3 }
  0x73   : > { %v950_v1 = vpack.c.bf16 %v9273_v41, %v9246_v21 }
  0x75   : > { %1678 = vmatpush1.bf16.msra.mxu0 %v8297_v48  ;;  %v548_v48 = vrot.slane %v9273_v41, 1 }
  0x76   : > { %1679 = vmatprep.subr.bf16.mxu0 %v8302_v49 }
  0x77   : > { %v549_v49 = vsel %vm507_vm0, %v546_v31, %v548_v48 }
  0x78   : > { %1549 = vmatmul.mubr.bf16.gmra.mrb[20].mxu0 %v920_v56  ;;  %v945_v56 = vpack.c.bf16 %v9243_v20, %v9240_v19 }
  0x79   : > { %1558 = vmatprep.mubr.bf16.mxu0 %v926_v59  ;;  %1680 = vmatpush1.bf16.msra.mxu0 %v8300_v55  ;;  %v9286_v55 = vld [vmem:[%s8965_s15 + $0xd0] sm:$0xff]  ;;  %v550_v59 = vrot.slane %v9280_v50, 1 }
  0x7a   : > { %1681 = vmatprep.subr.bf16.mxu0 %v8305_v58  ;;  %v7243_v58 = vpack.c.bf16 %v548_v48, %v549_v49  ;;  %v553_v61 = vrot.slane %v9286_v55, 1 }
  0x7b   : > { %v552_v62 = vsel %vm507_vm0, %v550_v59, %v551_v60  ;;  %v608_v59 = vrot.slane %v8980_v15, 2  ;;  %v709_v15 = vrot.slane %v9055_v44, 3 }
  0x7d   : > { %1682 = vmatpush1.bf16.msra.mxu0 %v8303_v63  ;;  %v554_v63 = vsel %vm507_vm0, %v551_v60, %v553_v61  ;;  %v707_v60 = vrot.slane %v9036_v38, 3 }
  0x7e   : > { %1683 = vmatprep.subr.bf16.mxu0 %v8308_v0  ;;  %v9298_v0 = vld [vmem:[%s8965_s15 + $0xd8] sm:$0xff] }
  0x7f   : > { %v960_v30 = vpack.c.bf16 %v9298_v0, %v9286_v55 }
  0x80   : > { %1559 = vmatmul.mubr.bf16.gmra.mrb[24].mxu0 %v925_v7  ;;  %v555_v7 = vrot.slane %v9298_v0, 1 }
  0x81   : > { %7238 = vmatprep.mubr.msk.bf16.mxu0 %vm9050_vm2, %v7237_v9  ;;  %1684 = vmatpush1.bf16.msra.mxu0 %v8306_v3  ;;  %v956_v3 = vpack.c.bf16 %v554_v63, %v552_v62  ;;  %v9305_v9 = vld [vmem:[%s8965_s15 + $0xe0] sm:$0xff]  ;;  %v708_v63 = vsel %vm701_vm3, %v705_v40, %v707_v60 }
  0x82   : > { %1685 = vmatprep.subr.bf16.mxu0 %v8311_v8  ;;  %v556_v8 = vsel %vm507_vm0, %v553_v61, %v555_v7  ;;  %v557_v17 = vrot.slane %v9305_v9, 1  ;;  %v965_v34 = vpack.c.bf16 %v9308_v10, %v9305_v9 }
  0x83   : > { %v7246_v16 = vpack.c.bf16 %v555_v7, %v556_v8  ;;  %v610_v7 = vrot.slane %v9036_v38, 2  ;;  %v710_v8 = vrot.slane %v9058_v45, 3  ;;  %v8323_v38 = vld [vmem:[%s11655_s1 + $0x214] ss:$8 sps:$4 sm:$0xff]  }
  0x85   : > { %1686 = vmatpush1.bf16.msra.mxu0 %v8309_v11  ;;  %v9311_v11 = vld [vmem:[%s8965_s15 + $0xf0] sm:$0xff] }
  0x86   : > { %1687 = vmatprep.subr.bf16.mxu0 %v8314_v12  ;;  %v955_v12 = vpack.c.bf16 %v9283_v51, %v9280_v50  ;;  %v970_v48 = vpack.c.bf16 %v9323_v29, %v9311_v11 }
  0x88   : > { %1569 = vmatmul.mubr.bf16.gmra.mrb[28].mxu0 %v930_v26  ;;  %v560_v26 = vrot.slane %v9311_v11, 1 }
  0x89   : > { %1578 = vmatprep.mubr.bf16.mxu0 %v936_v28  ;;  %1688 = vmatpush1.bf16.msra.mxu0 %v8312_v22  ;;  %v558_v22 = vrot.slane %v9308_v10, 1 }
  0x8a   : > { %1689 = vmatprep.subr.bf16.mxu0 %v8317_v27 }
  0x8b   : > { %v559_v27 = vsel %vm507_vm0, %v557_v17, %v558_v22  ;;  %v561_v28 = vsel %vm507_vm0, %v558_v22, %v560_v26  ;;  %v8321_v17 = vld [vmem:[%s11655_s1 + $0x210] ss:$8 sps:$4 sm:$0xff]   ;;  %v711_v22 = vsel %vm701_vm3, %v709_v15, %v710_v8  ;;  %v619_v15 = vrot.slane %v9107_v4, 2 }
  0x8c   : > { %v966_v31 = vpack.c.bf16 %v561_v28, %v559_v27  ;;  %v8326_v27 = vld [vmem:[%s11655_s1 + $0x224] ss:$8 sps:$4 sm:$0xff]  }
  0x8d   : > { %1690 = vmatpush1.bf16.msra.mxu0 %v8315_v32  ;;  %v562_v32 = vrot.slane %v9323_v29, 1 }
  0x8e   : > { %1852 = vmatprep.subr.bf16.mxu0 %v8320_v33 }
  0x8f   : > { %v563_v33 = vsel %vm507_vm0, %v560_v26, %v562_v32 }
  0x90   : > { %1579 = vmatmul.mubr.bf16.gmra.mrb[32].mxu0 %v935_v35  ;;  %v7249_v35 = vpack.c.bf16 %v562_v32, %v563_v33  ;;  %v612_v32 = vrot.slane %v9055_v44, 2  ;;  %v613_v33 = vrot.slane %v9058_v45, 2 }
  0x91   : > { %7241 = vmatprep.mubr.msk.bf16.mxu0 %vm9050_vm2, %v7240_v36  ;;  %v702_v36 = vrot.slane %v8974_v13, 3 }
  0x92   : > { %v614_v44 = vsel %vm604_vm4, %v612_v32, %v613_v33  ;;  %v724_v32 = vrot.slane %v9144_v24, 3 }
  0x98   : > { %1589 = vmatmul.mubr.bf16.gmra.mrb[36].mxu0 %v940_v42  ;;  %v704_v42 = vsel %vm701_vm3, %v702_v36, %v703_v39  ;;  %v714_v36 = vrot.slane %v9084_v57, 3 }
  0x99   : > { %1598 = vmatprep.mubr.bf16.mxu0 %v946_v47  ;;  %v706_v47 = vsel %vm701_vm3, %v703_v39, %v705_v40  ;;  %v8329_v39 = vld [vmem:[%s11655_s1 + $0x234] ss:$8 sps:$4 sm:$0xff]  }
  0x9a   : > { %v898_v49 = vpack.c.bf16 %v706_v47, %v704_v42  ;;  %v8332_v42 = vld [vmem:[%s11655_s1 + $0x244] ss:$8 sps:$4 sm:$0xff]  }
  0xa0   : > { %1599 = vmatmul.mubr.bf16.gmra.mrb[40].mxu0 %v945_v56  ;;  %v605_v56 = vrot.slane %v8974_v13, 2  ;;  %v8318_v13 = vld [vmem:[%s11655_s1 + $0x200] ss:$8 sps:$4 sm:$0xff]  }
  0xa1   : > { %7244 = vmatprep.mubr.msk.bf16.mxu0 %vm9050_vm2, %v7243_v58  ;;  %v606_v58 = vrot.slane %v8977_v14, 2  ;;  %v7355_v14 = vld [vmem:[%s11666_s12 + $0x3] ss:$8 sm:$0x3] }
  0xa3   : > { %v607_v61 = vsel %vm604_vm4, %v605_v56, %v606_v58  ;;  %v609_v62 = vsel %vm604_vm4, %v606_v58, %v608_v59  ;;  %v8330_v56 = vld [vmem:[%s11655_s1 + $0x240] ss:$8 sps:$4 sm:$0xff]   ;;  %v716_v58 = vrot.slane %v9107_v4, 3 }
  0xa8   : > { %1609 = vmatmul.mubr.bf16.gmra.mrb[44].mxu0 %v950_v1  ;;  %v897_v1 = vpack.c.bf16 %v609_v62, %v607_v61  ;;  %v8335_v61 = vld [vmem:[%s11655_s1 + $0x254] ss:$8 sps:$4 sm:$0xff]   ;;  %v8333_v62 = vld [vmem:[%s11655_s1 + $0x250] ss:$8 sps:$4 sm:$0xff]  }
  0xa9   : > { %1618 = vmatprep.mubr.bf16.mxu0 %v956_v3  ;;  %v7252_v3 = vpack.c.bf16 %v707_v60, %v708_v63  ;;  %v719_v60 = vrot.slane %v9113_v6, 3 }
  0xb0   : > { %1619 = vmatmul.mubr.bf16.gmra.mrb[48].mxu0 %v955_v12  ;;  %v712_v12 = vrot.slane %v9061_v46, 3 }
  0xb1   : > { %7247 = vmatprep.mubr.msk.bf16.mxu0 %vm9050_vm2, %v7246_v16  ;;  %v611_v16 = vsel %vm604_vm4, %v608_v59, %v610_v7  ;;  %v717_v59 = vrot.slane %v9110_v5, 3 }
  0xb2   : > { %v713_v26 = vsel %vm701_vm3, %v710_v8, %v712_v12  ;;  %v7255_v28 = vpack.c.bf16 %v610_v7, %v611_v16  ;;  %v715_v40 = vsel %vm701_vm3, %v712_v12, %v714_v36  ;;  %v620_v8 = vrot.slane %v9110_v5, 2 }
  0xb3   : > { %v718_v63 = vsel %vm701_vm3, %v716_v58, %v717_v59  ;;  %v622_v12 = vrot.slane %v9113_v6, 2  ;;  %v721_v16 = vrot.slane %v9128_v18, 3  ;;  %v8339_v6 = vld [vmem:[%s11655_s1 + $0x270] ss:$8 sps:$4 sm:$0xff]   ;;  %v733_v58 = vrot.slane %v9197_v54, 3 }
  0xb4   : > { %v621_v4 = vsel %vm604_vm4, %v619_v15, %v620_v8 }
  0xb5   : > { %v623_v5 = vsel %vm604_vm4, %v620_v8, %v622_v12 }
  0xb8   : > { %1629 = vmatmul.mubr.bf16.gmra.mrb[52].mxu0 %v960_v30 }
  0xb9   : > { %1638 = vmatprep.mubr.bf16.mxu0 %v966_v31  ;;  %v908_v31 = vpack.c.bf16 %v713_v26, %v711_v22  ;;  %v722_v22 = vsel %vm701_vm3, %v719_v60, %v721_v16  ;;  %v917_v26 = vpack.c.bf16 %v623_v5, %v621_v4  ;;  %v738_v4 = vrot.slane %v9243_v20, 3 }
  0xba   : > { %v740_v5 = vrot.slane %v9246_v21, 3 }
  0xc0   : > { %1639 = vmatmul.mubr.bf16.gmra.mrb[56].mxu0 %v965_v34  ;;  %v615_v34 = vrot.slane %v9061_v46, 2  ;;  %v8327_v46 = vld [vmem:[%s11655_s1 + $0x230] ss:$8 sps:$4 sm:$0xff]  }
  0xc1   : > { %7250 = vmatprep.mubr.msk.bf16.mxu0 %vm9050_vm2, %v7249_v35  ;;  %v8324_v35 = vld [vmem:[%s11655_s1 + $0x220] ss:$8 sps:$4 sm:$0xff]  }
  0xc2   : > { %v616_v45 = vsel %vm604_vm4, %v613_v33, %v615_v34  ;;  %v726_v33 = vrot.slane %v9147_v25, 3 }
  0xc3   : > { %v907_v47 = vpack.c.bf16 %v616_v45, %v614_v44  ;;  %v627_v45 = vrot.slane %v9144_v24, 2  ;;  %v730_v24 = vrot.slane %v9191_v52, 3 }
  0xc8   : > { %1649 = vmatmul.mubr.bf16.gmra.mrb[60].mxu0 %v970_v48  ;;  %v7258_v48 = vpack.c.bf16 %v714_v36, %v715_v40  ;;  %v727_v36 = vsel %vm701_vm3, %v724_v32, %v726_v33  ;;  %v728_v40 = vrot.slane %v9169_v37, 3 }
  0xc9   : > { %1691 = vmatprep.mubr.bf16.mxu0 %v898_v49  ;;  %v617_v49 = vrot.slane %v9084_v57, 2 }
  0xcb   : > { %v618_v57 = vsel %vm604_vm4, %v615_v34, %v617_v49 }
  0xcc   : > { %v7261_v7 = vpack.c.bf16 %v617_v49, %v618_v57 }
  0xd0   : > { %1692 = vmatmul.mubr.bf16.vlgmr.msra.gmra.mrb[0].mxu0 %v897_v1  ;;  %v720_v1 = vsel %vm701_vm3, %v717_v59, %v719_v60 }
  0xd1   : > { %7253 = vmatprep.mubr.msk.bf16.mxu0 %vm9353_vm5, %v7252_v3  ;;  %1853 = vmatpush1.bf16.msra.mxu0 %v8318_v13  ;;  %v8338_v3 = vld [vmem:[%s11655_s1 + $0x264] ss:$8 sps:$4 sm:$0xff]   ;;  %v918_v13 = vpack.c.bf16 %v720_v1, %v718_v63  ;;  %v633_v63 = vrot.slane %v9191_v52, 2  ;;  %v634_v1 = vrot.slane %v9194_v53, 2 }
  0xd2   : > { %1854 = vmatprep.subr.bf16.mxu0 %v8323_v38  ;;  %v8336_v38 = vld [vmem:[%s11655_s1 + $0x260] ss:$8 sps:$4 sm:$0xff]  }
  0xd5   : > { %1855 = vmatpush1.bf16.msra.mxu0 %v8321_v17  ;;  %v8341_v17 = vld [vmem:[%s11655_s1 + $0x274] ss:$8 sps:$4 sm:$0xff]  }
  0xd6   : > { %1856 = vmatprep.subr.bf16.mxu0 %v8326_v27  ;;  %v7264_v27 = vpack.c.bf16 %v721_v16, %v722_v22  ;;  %v638_v16 = vrot.slane %v9218_v2, 2 }
  0xd8   : > { %7256 = vmatmul.mubr.msk.bf16.gmra.mrb[4].mxu0 %vm9376_vm6, %v7255_v28  ;;  %v624_v28 = vrot.slane %v9128_v18, 2  ;;  %v626_v18 = vrot.slane %v9141_v23, 2 }
  0xd9   : > { %1711 = vmatprep.mubr.bf16.mxu0 %v908_v31  ;;  %1857 = vmatpush1.bf16.msra.mxu0 %v8324_v35  ;;  %v723_v31 = vrot.slane %v9141_v23, 3  ;;  %v631_v23 = vrot.slane %v9169_v37, 2 }
  0xda   : > { %1858 = vmatprep.subr.bf16.mxu0 %v8329_v39  ;;  %v625_v34 = vsel %vm604_vm4, %v622_v12, %v624_v28 }
  0xdb   : > { %v725_v35 = vsel %vm701_vm3, %v723_v31, %v724_v32  ;;  %v7267_v39 = vpack.c.bf16 %v624_v28, %v625_v34  ;;  %v640_v31 = vrot.slane %v9240_v19, 2  ;;  %v641_v32 = vrot.slane %v9243_v20, 2 }
  0xdc   : > { %v928_v44 = vpack.c.bf16 %v727_v36, %v725_v35  ;;  %v742_v34 = vrot.slane %v9273_v41, 3 }
  0xdd   : > { %1859 = vmatpush1.bf16.msra.mxu0 %v8327_v46  ;;  %v629_v46 = vrot.slane %v9147_v25, 2  ;;  %v731_v25 = vrot.slane %v9194_v53, 3  ;;  %v642_v35 = vsel %vm604_vm4, %v640_v31, %v641_v32 }
  0xde   : > { %1860 = vmatprep.subr.bf16.mxu0 %v8332_v42  ;;  %v628_v42 = vsel %vm604_vm4, %v626_v18, %v627_v45 }
  0xdf   : > { %v632_v59 = vsel %vm604_vm4, %v629_v46, %v631_v23  ;;  %v732_v60 = vsel %vm701_vm3, %v730_v24, %v731_v25  ;;  %v647_v24 = vrot.slane %v9280_v50, 2 }
  0xe0   : > { %1712 = vmatmul.mubr.bf16.gmra.mrb[8].mxu0 %v907_v47  ;;  %v630_v47 = vsel %vm604_vm4, %v627_v45, %v629_v46  ;;  %v7273_v57 = vpack.c.bf16 %v631_v23, %v632_v59  ;;  %v645_v45 = vrot.slane %v9273_v41, 2  ;;  %v744_v46 = vrot.slane %v9280_v50, 3 }
  0xe1   : > { %7259 = vmatprep.mubr.msk.bf16.mxu0 %vm9353_vm5, %v7258_v48  ;;  %1861 = vmatpush1.bf16.msra.mxu0 %v8330_v56  ;;  %v729_v48 = vsel %vm701_vm3, %v726_v33, %v728_v40  ;;  %v927_v49 = vpack.c.bf16 %v630_v47, %v628_v42  ;;  %v643_v33 = vrot.slane %v9246_v21, 2  ;;  %v747_v42 = vrot.slane %v9286_v55, 3 }
  0xe2   : > { %1862 = vmatprep.subr.bf16.mxu0 %v8335_v61  ;;  %v7270_v56 = vpack.c.bf16 %v728_v40, %v729_v48  ;;  %v734_v61 = vsel %vm701_vm3, %v731_v25, %v733_v58  ;;  %v745_v40 = vrot.slane %v9283_v51, 3  ;;  %v648_v25 = vrot.slane %v9283_v51, 2 }
  0xe3   : > { %v644_v36 = vsel %vm604_vm4, %v641_v32, %v643_v33  ;;  %v646_v47 = vsel %vm604_vm4, %v643_v33, %v645_v45  ;;  %v749_v59 = vrot.slane %v9298_v0, 3  ;;  %v659_v32 = vrot.slane %v9323_v29, 2 }
  0xe4   : > { %v746_v48 = vsel %vm701_vm3, %v744_v46, %v745_v40  ;;  %v8804_v46 = vmov 0  }
  0xe5   : > { %1863 = vmatpush1.bf16.msra.mxu0 %v8333_v62  ;;  %v938_v62 = vpack.c.bf16 %v734_v61, %v732_v60  ;;  %v649_v60 = vsel %vm604_vm4, %v647_v24, %v648_v25 }
  0xe6   : > { %1864 = vmatprep.subr.bf16.mxu0 %v8338_v3  ;;  %v636_v3 = vrot.slane %v9197_v54, 2 }
  0xe8   : > { %7262 = vmatmul.mubr.msk.bf16.gmra.mrb[12].mxu0 %vm9376_vm6, %v7261_v7  ;;  %v735_v7 = vrot.slane %v9218_v2, 3  ;;  %v637_v15 = vsel %vm604_vm4, %v634_v1, %v636_v3 }
  0xe9   : > { %1731 = vmatprep.mubr.bf16.mxu0 %v918_v13  ;;  %1865 = vmatpush1.bf16.msra.mxu0 %v8336_v38  ;;  %v635_v13 = vsel %vm604_vm4, %v633_v63, %v634_v1  ;;  %v652_v1 = vrot.slane %v9298_v0, 2 }
  0xea   : > { %1866 = vmatprep.subr.bf16.mxu0 %v8341_v17  ;;  %v736_v8 = vsel %vm701_vm3, %v733_v58, %v735_v7  ;;  %v937_v12 = vpack.c.bf16 %v637_v15, %v635_v13  ;;  %v737_v17 = vrot.slane %v9240_v19, 3  ;;  %v650_v58 = vrot.slane %v9286_v55, 2 }
  0xeb   : > { %v7276_v38 = vpack.c.bf16 %v735_v7, %v736_v8  ;;  %v752_v7 = vrot.slane %v9308_v10, 3  ;;  %v754_v13 = vrot.slane %v9311_v11, 3 }
  0xec   : > { %v739_v22 = vsel %vm701_vm3, %v737_v17, %v738_v4  ;;  %v651_v61 = vsel %vm604_vm4, %v648_v25, %v650_v58  ;;  %v653_v15 = vsel %vm604_vm4, %v650_v58, %v652_v1  ;;  %v654_v17 = vrot.slane %v9305_v9, 2  ;;  %v8728_v25 = vld [vmem:[%s8965_s15 + $0x20] sm:$0xff] }
  0xed   : > { %1867 = vmatpush1.bf16.msra.mxu0 %v8339_v6  ;;  %v639_v6 = vsel %vm604_vm4, %v636_v3, %v638_v16  ;;  %v751_v3 = vrot.slane %v9305_v9, 3  ;;  %v806_v58 = vrot.slane %v8728_v25, 4 }
  0xef   : > { %v753_v8 = vsel %vm701_vm3, %v751_v3, %v752_v7  ;;  %v8731_v3 = vld [vmem:[%s8965_s15 + $0x38] sm:$0xff] }
  0xf0   : > { %1732 = vmatmul.mubr.bf16.gmra.mrb[16].mxu0 %v917_v26  ;;  %v741_v26 = vsel %vm701_vm3, %v738_v4, %v740_v5  ;;  %v655_v4 = vrot.slane %v9308_v10, 2 }
  0xf1   : > { %7265 = vmatprep.mubr.msk.bf16.mxu0 %vm9353_vm5, %v7264_v27  ;;  %v7279_v27 = vpack.c.bf16 %v638_v16, %v639_v6  ;;  %v948_v28 = vpack.c.bf16 %v741_v26, %v739_v22  ;;  %v756_v6 = vrot.slane %v9323_v29, 3 }
  0xf2   : > { %v656_v22 = vsel %vm604_vm4, %v654_v17, %v655_v4  ;;  %v8734_v17 = vld [vmem:[%s8965_s15 + $0x50] sm:$0xff] }
  0xf8   : > { %7268 = vmatmul.mubr.msk.bf16.gmra.mrb[20].mxu0 %vm9376_vm6, %v7267_v39  ;;  %v743_v39 = vsel %vm701_vm3, %v740_v5, %v742_v34  ;;  %v657_v5 = vrot.slane %v9311_v11, 2 }
  0xf9   : > { %1751 = vmatprep.mubr.bf16.mxu0 %v928_v44  ;;  %v947_v44 = vpack.c.bf16 %v644_v36, %v642_v35  ;;  %v7282_v18 = vpack.c.bf16 %v742_v34, %v743_v39  ;;  %v8724_v35 = vld [vmem:[%s8965_s15] sm:$0xff]  ;;  %v8725_v39 = vld [vmem:[%s8965_s15 + $0x8] sm:$0xff] }
  0xfa   : > { %v658_v26 = vsel %vm604_vm4, %v655_v4, %v657_v5  ;;  %v660_v33 = vsel %vm604_vm4, %v657_v5, %v659_v32  ;;  %v799_v36 = vrot.slane %v8724_v35, 4  ;;  %v816_v4 = vrot.slane %v8734_v17, 4 }
  0xfb   : > { %v7297_v34 = vpack.c.bf16 %v659_v32, %v660_v33  ;;  %v8736_v32 = vld [vmem:[%s8965_s15 + $0x60] sm:$0xff]  ;;  %v8805_v17 = vmov 0.0  }
  0xfc   : > { %v820_v33 = vrot.slane %v8736_v32, 4  ;;  %2196 = vmatprep.mubr.f32.mxu1 %v8805_v17 }
 0x100   : > { %1752 = vmatmul.mubr.bf16.gmra.mrb[24].mxu0 %v927_v49  ;;  %v748_v49 = vsel %vm701_vm3, %v745_v40, %v747_v42 }
 0x101   : > { %7271 = vmatprep.mubr.msk.bf16.mxu0 %vm9353_vm5, %v7270_v56  ;;  %v7285_v56 = vpack.c.bf16 %v645_v45, %v646_v47  ;;  %v958_v23 = vpack.c.bf16 %v748_v49, %v746_v48  ;;  %v8727_v48 = vld [vmem:[%s8965_s15 + $0x18] sm:$0xff] }
 0x102   : > { %v804_v49 = vrot.slane %v8727_v48, 4  ;;  %v827_v48 = vrot.slane %v9191_v52, 4 }
 0x108   : > { %7274 = vmatmul.mubr.msk.bf16.gmra.mrb[28].mxu0 %vm9376_vm6, %v7273_v57  ;;  %v750_v57 = vsel %vm701_vm3, %v747_v42, %v749_v59 }
 0x109   : > { %1771 = vmatprep.mubr.bf16.mxu0 %v938_v62  ;;  %v957_v62 = vpack.c.bf16 %v651_v61, %v649_v60  ;;  %v7288_v63 = vpack.c.bf16 %v749_v59, %v750_v57  ;;  %v8729_v59 = vld [vmem:[%s8965_s15 + $0x28] sm:$0xff]  ;;  %v8730_v61 = vld [vmem:[%s8965_s15 + $0x30] sm:$0xff] }
 0x10a   : > { %v807_v60 = vrot.slane %v8729_v59, 4  ;;  %v809_v57 = vrot.slane %v8730_v61, 4  ;;  %v835_v59 = vrot.slane %v9243_v20, 4 }
 0x110   : > { %1772 = vmatmul.mubr.bf16.gmra.mrb[32].mxu0 %v937_v12  ;;  %v755_v12 = vsel %vm701_vm3, %v752_v7, %v754_v13  ;;  %v811_v7 = vrot.slane %v8731_v3, 4 }
 0x111   : > { %7277 = vmatprep.mubr.msk.bf16.mxu0 %vm9353_vm5, %v7276_v38  ;;  %v7291_v38 = vpack.c.bf16 %v652_v1, %v653_v15  ;;  %v968_v16 = vpack.c.bf16 %v755_v12, %v753_v8  ;;  %v8732_v8 = vld [vmem:[%s8965_s15 + $0x40] sm:$0xff] }
 0x112   : > { %v813_v12 = vrot.slane %v8732_v8, 4  ;;  %v851_v8 = vrot.slane %v9311_v11, 4  ;;  %v1056_v11 = vlaneseq }
 0x118   : > { %7280 = vmatmul.mubr.msk.bf16.gmra.mrb[36].mxu0 %vm9376_vm6, %v7279_v27  ;;  %v757_v27 = vsel %vm701_vm3, %v754_v13, %v756_v6  ;;  %v812_v13 = vsel %vm798_vm7, %v809_v57, %v811_v7 }
 0x119   : > { %1791 = vmatprep.mubr.bf16.mxu0 %v948_v28  ;;  %v967_v28 = vpack.c.bf16 %v658_v26, %v656_v22  ;;  %v7294_v31 = vpack.c.bf16 %v756_v6, %v757_v27  ;;  %v7303_v15 = vpack.c.bf16 %v811_v7, %v812_v13  ;;  %v8735_v26 = vld [vmem:[%s8965_s15 + $0x58] sm:$0xff]  ;;  %v846_v13 = vrot.slane %v9298_v0, 4 }
 0x11a   : > { %v818_v27 = vrot.slane %v8735_v26, 4 }
 0x120   : > { %1792 = vmatmul.mubr.bf16.gmra.mrb[40].mxu0 %v947_v44  ;;  %v800_v44 = vrot.slane %v8725_v39, 4 }
 0x121   : > { %7283 = vmatprep.mubr.msk.bf16.mxu0 %vm9353_vm5, %v7282_v18  ;;  %v8726_v18 = vld [vmem:[%s8965_s15 + $0x10] sm:$0xff] }
 0x122   : > { %v802_v45 = vrot.slane %v8726_v18, 4  ;;  %v801_v40 = vsel %vm798_vm7, %v799_v36, %v800_v44  ;;  %v8738_v36 = vld [vmem:[%s8965_s15 + $0x70] sm:$0xff] }
 0x123   : > { %v823_v39 = vrot.slane %v8738_v36, 4 }
 0x124   : > { %v803_v42 = vsel %vm798_vm7, %v800_v44, %v802_v45 }
 0x125   : > { %v899_v47 = vpack.c.bf16 %v803_v42, %v801_v40  ;;  %v825_v40 = vrot.slane %v9169_v37, 4 }
 0x127   : > { %v826_v42 = vsel %vm798_vm7, %v823_v39, %v825_v40 }
 0x128   : > { %7286 = vmatmul.mubr.msk.bf16.gmra.mrb[44].mxu0 %vm9376_vm6, %v7285_v56  ;;  %v805_v56 = vsel %vm798_vm7, %v802_v45, %v804_v49 }
 0x129   : > { %1811 = vmatprep.mubr.bf16.mxu0 %v958_v23  ;;  %v7300_v23 = vpack.c.bf16 %v804_v49, %v805_v56  ;;  %v828_v49 = vrot.slane %v9194_v53, 4  ;;  %v830_v56 = vrot.slane %v9197_v54, 4  ;;  %v834_v54 = vrot.slane %v9240_v19, 4 }
 0x12b   : > { %v831_v37 = vsel %vm798_vm7, %v828_v49, %v830_v56  ;;  %v836_v61 = vsel %vm798_vm7, %v834_v54, %v835_v59 }
 0x130   : > { %1812 = vmatmul.mubr.bf16.gmra.mrb[48].mxu0 %v957_v62  ;;  %v808_v62 = vsel %vm798_vm7, %v806_v58, %v807_v60  ;;  %v832_v58 = vrot.slane %v9218_v2, 4 }
 0x131   : > { %7289 = vmatprep.mubr.msk.bf16.mxu0 %vm9353_vm5, %v7288_v63  ;;  %v810_v63 = vsel %vm798_vm7, %v807_v60, %v809_v57  ;;  %v837_v60 = vrot.slane %v9246_v21, 4  ;;  %v841_v21 = vrot.slane %v9280_v50, 4 }
 0x132   : > { %v909_v1 = vpack.c.bf16 %v810_v63, %v808_v62  ;;  %v833_v52 = vsel %vm798_vm7, %v830_v56, %v832_v58  ;;  %v839_v62 = vrot.slane %v9273_v41, 4  ;;  %v842_v63 = vrot.slane %v9283_v51, 4 }
 0x133   : > { %v7312_v53 = vpack.c.bf16 %v832_v58, %v833_v52  ;;  %v838_v2 = vsel %vm798_vm7, %v835_v59, %v837_v60 }
 0x134   : > { %v949_v57 = vpack.c.bf16 %v838_v2, %v836_v61  ;;  %v840_v19 = vsel %vm798_vm7, %v837_v60, %v839_v62  ;;  %v843_v3 = vsel %vm798_vm7, %v841_v21, %v842_v63 }
 0x135   : > { %v7315_v20 = vpack.c.bf16 %v839_v62, %v840_v19 }
 0x138   : > { %7292 = vmatmul.mubr.msk.bf16.gmra.mrb[52].mxu0 %vm9376_vm6, %v7291_v38  ;;  %v8733_v38 = vld [vmem:[%s8965_s15 + $0x48] sm:$0xff] }
 0x139   : > { %1831 = vmatprep.mubr.bf16.mxu0 %v968_v16  ;;  %v814_v16 = vrot.slane %v8733_v38, 4 }
 0x13b   : > { %v815_v5 = vsel %vm798_vm7, %v813_v12, %v814_v16  ;;  %v817_v6 = vsel %vm798_vm7, %v814_v16, %v816_v4  ;;  %v853_v16 = vrot.slane %v9323_v29, 4  ;;  %v474_v29 = vld [vmem:[%s11666_s12] ss:$8 sm:$0x3] }
 0x13c   : > { %v919_v22 = vpack.c.bf16 %v817_v6, %v815_v5 }
 0x140   : > { %1832 = vmatmul.mubr.bf16.gmra.mrb[56].mxu0 %v967_v28  ;;  %v819_v28 = vsel %vm798_vm7, %v816_v4, %v818_v27  ;;  %v9631_v4 = vshrl.u32 %v1056_v11, 7  ;;  %v2110_v11 = vld [vmem:[%s11657_s3 + $0x8] sm:$0xff] }
 0x141   : > { %7295 = vmatprep.mubr.msk.bf16.mxu0 %vm9353_vm5, %v7294_v31  ;;  %v7306_v31 = vpack.c.bf16 %v818_v27, %v819_v28 }
 0x142   : > { %v9634_v5 = vsub.s32 0, %v9631_v4  ;;  %v9640_v6 = vsub.s32 1, %v9631_v4 }
 0x144   : > { %v9646_v26 = vrot.slane %v474_v29, %v9640_v6  ;;  %v10729_v30 = vrot.slane %v7355_v14, %v9634_v5 }
 0x148   : > { %7298 = vmatmul.mubr.msk.bf16.gmra.mrb[60].mxu0 %vm9376_vm6, %v7297_v34  ;;  %v8737_v34 = vld [vmem:[%s8965_s15 + $0x68] sm:$0xff]  ;;  %s432_s15 = sand.u32 1, %s8793_s26  }
 0x149   : > { %1884 = vmatprep.mubr.bf16.mxu0 %v8804_v46  ;;  %v821_v35 = vrot.slane %v8737_v34, 4  ;;  %s7144_s24 = sshll.u32 %s432_s15, 3  ;;  %s7068_s23 = scalar_lea.sflag [#allocation3], %s432_s15 }
 0x14a   : > { %s434_s20 = scalar_lea.vmem [#allocation2], %s7144_s24  ;;  %s8809_s24 = smov [#allocation2]  }
 0x14b   : > { %v822_v44 = vsel %vm798_vm7, %v820_v33, %v821_v35  ;;  %v824_v18 = vsel %vm798_vm7, %v821_v35, %v823_v39  ;;  %s7081_s16 = sshll.u32 %s434_s20, 4  ;;  %s8743_s30 = sshll.u32 %s8809_s24, 4  ;;  %s11614_s16 = int_to_ptr.vmem [resolvable:$true] %s7081_s16  ;;  %s8744_s30 = int_to_ptr.vmem [resolvable:$false] %s8743_s30 }
 0x14c   : > { %v929_v45 = vpack.c.bf16 %v824_v18, %v822_v44  ;;  %s8739_s29 = scalar_lea.vmem %s11614_s16, 128  ;;  %s8745_s27 = scalar_lea.vmem %s8744_s30, 256 }
 0x14d   : > { %p8740_p11 = scmp.ne.s32.totalorder %s11614_s16, %s8739_s29  ;;  %p8746_p0 = scmp.lt.s32.totalorder %s11614_s16, %s8744_s30 }
 0x14e   : > { %p8747_p1 = scmp.lt.s32.totalorder %s8745_s27, %s8739_s29 }
 0x14f   : > { %p8741_p12 = pnand %p8740_p11, %p8918_p5 }
 0x150   : > { %1885 = vmatmul.mubr.bf16.vlgmr.msra.gmra.mrb[0].mxu0 %v899_v47  ;;  %v7309_v47 = vpack.c.bf16 %v825_v40, %v826_v42  ;;  %p8748_p2 = por %p8747_p1, %p8746_p0 }
 0x151   : > { %1894 = vmatprep.mubr.bf16.mxu0 %v8804_v46  ;;  %p8742_p13 = pneg %p8741_p12 }
 0x153   : > { %p8749_p3 = pnand %p8748_p2, %p8742_p13 }
 0x158   : > { %7301 = vmatmul.mubr.msk.bf16.gmra.mrb[4].mxu0 %vm9547_vm8, %v7300_v23  ;;  %v829_v23 = vsel %vm798_vm7, %v827_v48, %v828_v49 }
 0x159   : > { %1904 = vmatprep.mubr.bf16.mxu0 %v8804_v46  ;;  %v939_v25 = vpack.c.bf16 %v831_v37, %v829_v23 }
 0x160   : > { %1905 = vmatmul.mubr.bf16.gmra.mrb[8].mxu0 %v909_v1  ;;  %v844_v1 = vrot.slane %v9286_v55, 4  ;;  %v848_v55 = vrot.slane %v9305_v9, 4  ;;  %v854_v9 = vsel %vm798_vm7, %v851_v8, %v853_v16 }
 0x161   : > { %1914 = vmatprep.mubr.bf16.mxu0 %v8804_v46 }
 0x162   : > { %v845_v41 = vsel %vm798_vm7, %v842_v63, %v844_v1  ;;  %v847_v50 = vsel %vm798_vm7, %v844_v1, %v846_v13 }
 0x163   : > { %v959_v7 = vpack.c.bf16 %v845_v41, %v843_v3  ;;  %v7318_v51 = vpack.c.bf16 %v846_v13, %v847_v50 }
 0x168   : > { %7304 = vmatmul.mubr.msk.bf16.gmra.mrb[12].mxu0 %vm9547_vm8, %v7303_v15  ;;  %v849_v15 = vrot.slane %v9308_v10, 4  ;;  %v7321_v10 = vpack.c.bf16 %v853_v16, %v854_v9 }
 0x169   : > { %1924 = vmatprep.mubr.bf16.mxu0 %v8804_v46 }
 0x16a   : > { %v850_v12 = vsel %vm798_vm7, %v848_v55, %v849_v15  ;;  %v852_v0 = vsel %vm798_vm7, %v849_v15, %v851_v8  ;;  %v2109_v8 = vld [vmem:[%s11657_s3] sm:$0xff] }
 0x16b   : > { %v969_v38 = vpack.c.bf16 %v852_v0, %v850_v12 }
 0x170   : > { %1925 = vmatmul.mubr.bf16.gmra.mrb[16].mxu0 %v919_v22  ;;  %v9643_v22 = vrot.slane %v474_v29, %v9634_v5 }
 0x171   : > { %1934 = vmatprep.mubr.bf16.mxu0 %v8804_v46 }
 0x178   : > { %7307 = vmatmul.mubr.msk.bf16.gmra.mrb[20].mxu0 %vm9547_vm8, %v7306_v31 }
 0x179   : > { %1944 = vmatprep.mubr.bf16.mxu0 %v8804_v46 }
 0x180   : > { %1945 = vmatmul.mubr.bf16.gmra.mrb[24].mxu0 %v929_v45 }
 0x181   : > { %1954 = vmatprep.mubr.bf16.mxu0 %v8804_v46 }
 0x188   : > { %7310 = vmatmul.mubr.msk.bf16.gmra.mrb[28].mxu0 %vm9547_vm8, %v7309_v47 }
 0x189   : > { %1964 = vmatprep.mubr.bf16.mxu0 %v8804_v46 }
 0x190   : > { %1965 = vmatmul.mubr.bf16.gmra.mrb[32].mxu0 %v939_v25 }
 0x191   : > { %1974 = vmatprep.mubr.bf16.mxu0 %v8804_v46 }
 0x198   : > { %7313 = vmatmul.mubr.msk.bf16.gmra.mrb[36].mxu0 %vm9547_vm8, %v7312_v53 }
 0x199   : > { %1984 = vmatprep.mubr.bf16.mxu0 %v8804_v46 }
 0x1a0   : > { %1985 = vmatmul.mubr.bf16.gmra.mrb[40].mxu0 %v949_v57 }
 0x1a1   : > { %1994 = vmatprep.mubr.bf16.mxu0 %v8804_v46 }
 0x1a8   : > { %7316 = vmatmul.mubr.msk.bf16.gmra.mrb[44].mxu0 %vm9547_vm8, %v7315_v20 }
 0x1a9   : > { %2004 = vmatprep.mubr.bf16.mxu0 %v8804_v46 }
 0x1b0   : > { %2005 = vmatmul.mubr.bf16.gmra.mrb[48].mxu0 %v959_v7 }
 0x1b1   : > { %2014 = vmatprep.mubr.bf16.mxu0 %v8804_v46 }
 0x1b8   : > { %7319 = vmatmul.mubr.msk.bf16.gmra.mrb[52].mxu0 %vm9547_vm8, %v7318_v51 }
 0x1b9   : > { %2024 = vmatprep.mubr.bf16.mxu0 %v8804_v46 }
 0x1c0   : > { %2025 = vmatmul.mubr.bf16.gmra.mrb[56].mxu0 %v969_v38 }
 0x1c1   : > { %2034 = vmatprep.mubr.bf16.mxu0 %v8804_v46 }
 0x1c8   : > { %7322 = vmatmul.mubr.msk.bf16.gmra.mrb[60].mxu0 %vm9547_vm8, %v7321_v10 }
 0x223   : > { %v1886_v27 = vpop.f32.mrb[0].mxu0 }
 0x224   : > { %v7889_v28 = vadd.f32 %v1886_v27, %v9643_v22  ;;  %v1888_v31 = vpop.f32.mrb[1].mxu0 }
 0x225   : > { %v7890_v32 = vadd.f32 %v1888_v31, %v9646_v26  ;;  %v1890_v33 = vpop.f32.mrb[2].mxu0 }
 0x226   : > { %8516 = vtanh.f32 %v7889_v28  ;;  %v7891_v34 = vadd.f32 %v1890_v33, %v9643_v22  ;;  %v1892_v35 = vpop.f32.mrb[3].mxu0 }
 0x227   : > { %8518 = vtanh.f32 %v7890_v32  ;;  %v7892_v36 = vadd.f32 %v1892_v35, %v9646_v26 }
 0x228   : > { %8520 = vtanh.f32 %v7891_v34 }
 0x229   : > { %8522 = vtanh.f32 %v7892_v36 }
 0x22b   : > { %v1896_v39 = vpop.f32.mrb[4].mxu0 }
 0x22c   : > { %v7893_v44 = vadd.f32 %v1896_v39, %v9643_v22  ;;  %v1898_v18 = vpop.f32.mrb[5].mxu0 }
 0x22d   : > { %v7894_v45 = vadd.f32 %v1898_v18, %v9646_v26  ;;  %v1900_v40 = vpop.f32.mrb[6].mxu0 }
 0x22e   : > { %8524 = vtanh.f32 %v7893_v44  ;;  %v7895_v42 = vadd.f32 %v1900_v40, %v9643_v22  ;;  %v1902_v47 = vpop.f32.mrb[7].mxu0 }
 0x22f   : > { %8526 = vtanh.f32 %v7894_v45  ;;  %v7896_v48 = vadd.f32 %v1902_v47, %v9646_v26 }
 0x230   : > { %v8517_v49 = vpop.eup %8516  ;;  %8528 = vtanh.f32 %v7895_v42 }
 0x231   : > { %v8519_v56 = vpop.eup %8518  ;;  %8530 = vtanh.f32 %v7896_v48 }
 0x232   : > { %v8521_v23 = vpop.eup %8520 }
 0x233   : > { %v8523_v37 = vpop.eup %8522  ;;  %v1906_v25 = vpop.f32.mrb[8].mxu0  ;;  %v7735_v58 = vpack.c.bf16 %v8521_v23, %v8517_v49 }
 0x234   : > { %v7897_v52 = vadd.f32 %v1906_v25, %v9643_v22  ;;  %v1908_v53 = vpop.f32.mrb[9].mxu0  ;;  %v7733_v54 = vpack.c.bf16 %v8523_v37, %v8519_v56 }
 0x235   : > { %v7898_v59 = vadd.f32 %v1908_v53, %v9646_v26  ;;  %v1910_v60 = vpop.f32.mrb[10].mxu0 }
 0x236   : > { %8532 = vtanh.f32 %v7897_v52  ;;  %v7899_v61 = vadd.f32 %v1910_v60, %v9643_v22  ;;  %v1912_v2 = vpop.f32.mrb[11].mxu0  ;;  %7734 = vmatprep.subr.bf16.mxu1 %v7733_v54 }
 0x237   : > { %8534 = vtanh.f32 %v7898_v59  ;;  %v7900_v57 = vadd.f32 %v1912_v2, %v9646_v26  ;;  %7736 = vmatpush1.bf16.msra.mxu1 %v7735_v58  ;;  %v2111_v58 = vld [vmem:[%s11657_s3 + $0x10] sm:$0xff]  ;;  %v2112_v2 = vld [vmem:[%s11657_s3 + $0x18] sm:$0xff] }
 0x238   : > { %v8525_v62 = vpop.eup %8524  ;;  %8536 = vtanh.f32 %v7899_v61 }
 0x239   : > { %v8527_v19 = vpop.eup %8526  ;;  %8538 = vtanh.f32 %v7900_v57 }
 0x23a   : > { %v8529_v20 = vpop.eup %8528 }
 0x23b   : > { %v8531_v21 = vpop.eup %8530  ;;  %v1916_v63 = vpop.f32.mrb[12].mxu0  ;;  %v7739_v1 = vpack.c.bf16 %v8529_v20, %v8525_v62 }
 0x23c   : > { %v7901_v3 = vadd.f32 %v1916_v63, %v9643_v22  ;;  %v1918_v41 = vpop.f32.mrb[13].mxu0  ;;  %v7737_v7 = vpack.c.bf16 %v8531_v21, %v8527_v19 }
 0x23d   : > { %v7902_v13 = vadd.f32 %v1918_v41, %v9646_v26  ;;  %v1920_v50 = vpop.f32.mrb[14].mxu0 }
 0x23e   : > { %8540 = vtanh.f32 %v7901_v3  ;;  %v7903_v51 = vadd.f32 %v1920_v50, %v9643_v22  ;;  %v1922_v55 = vpop.f32.mrb[15].mxu0  ;;  %7738 = vmatprep.subr.bf16.mxu1 %v7737_v7 }
 0x23f   : > { %8542 = vtanh.f32 %v7902_v13  ;;  %v7904_v15 = vadd.f32 %v1922_v55, %v9646_v26  ;;  %7740 = vmatpush1.bf16.msra.mxu1 %v7739_v1 }
 0x240   : > { %v8533_v12 = vpop.eup %8532  ;;  %8544 = vtanh.f32 %v7903_v51 }
 0x241   : > { %v8535_v0 = vpop.eup %8534  ;;  %8546 = vtanh.f32 %v7904_v15 }
 0x242   : > { %v8537_v38 = vpop.eup %8536  ;;  %7323 = vmatmul.mubr.msk.f32.vlgmr.msra.gmra.mrb[0].mxu1 %vm2125_vm9, %v2109_v8 }
 0x243   : > { %v8539_v16 = vpop.eup %8538  ;;  %v1926_v9 = vpop.f32.mrb[16].mxu0  ;;  %v7743_v10 = vpack.c.bf16 %v8537_v38, %v8533_v12  ;;  %2202 = vmatprep.mubr.f32.mxu1 %v8805_v17 }
 0x244   : > { %v7905_v29 = vadd.f32 %v1926_v9, %v9643_v22  ;;  %v1928_v27 = vpop.f32.mrb[17].mxu0  ;;  %v7741_v28 = vpack.c.bf16 %v8539_v16, %v8535_v0 }
 0x245   : > { %v7906_v31 = vadd.f32 %v1928_v27, %v9646_v26  ;;  %v1930_v32 = vpop.f32.mrb[18].mxu0 }
 0x246   : > { %8548 = vtanh.f32 %v7905_v29  ;;  %v7907_v33 = vadd.f32 %v1930_v32, %v9643_v22  ;;  %v1932_v34 = vpop.f32.mrb[19].mxu0  ;;  %7742 = vmatprep.subr.bf16.mxu1 %v7741_v28  ;;  %7324 = vmatmul.mubr.msk.f32.gmra.mrb[2].mxu1 %vm2125_vm9, %v2110_v11  ;;  %v2113_v11 = vld [vmem:[%s11657_s3 + $0x20] sm:$0xff] }
 0x247   : > { %8550 = vtanh.f32 %v7906_v31  ;;  %v7908_v35 = vadd.f32 %v1932_v34, %v9646_v26  ;;  %7744 = vmatpush1.bf16.msra.mxu1 %v7743_v10  ;;  %2279 = vmatprep.mubr.f32.mxu1 %v8805_v17  ;;  %v2114_v34 = vld [vmem:[%s11657_s3 + $0x28] sm:$0xff] }
 0x248   : > { %v8541_v36 = vpop.eup %8540  ;;  %8552 = vtanh.f32 %v7907_v33 }
 0x249   : > { %v8543_v39 = vpop.eup %8542  ;;  %8554 = vtanh.f32 %v7908_v35 }
 0x24a   : > { %v8545_v44 = vpop.eup %8544 }
 0x24b   : > { %v8547_v18 = vpop.eup %8546  ;;  %v1936_v45 = vpop.f32.mrb[20].mxu0  ;;  %v7747_v40 = vpack.c.bf16 %v8545_v44, %v8541_v36 }
 0x24c   : > { %v7909_v42 = vadd.f32 %v1936_v45, %v9643_v22  ;;  %v1938_v47 = vpop.f32.mrb[21].mxu0  ;;  %v7745_v48 = vpack.c.bf16 %v8547_v18, %v8543_v39 }
 0x24d   : > { %v7910_v49 = vadd.f32 %v1938_v47, %v9646_v26  ;;  %v1940_v56 = vpop.f32.mrb[22].mxu0 }
 0x24e   : > { %8556 = vtanh.f32 %v7909_v42  ;;  %v7911_v23 = vadd.f32 %v1940_v56, %v9643_v22  ;;  %v1942_v37 = vpop.f32.mrb[23].mxu0  ;;  %7746 = vmatprep.subr.bf16.mxu1 %v7745_v48 }
 0x24f   : > { %8558 = vtanh.f32 %v7910_v49  ;;  %v7912_v25 = vadd.f32 %v1942_v37, %v9646_v26  ;;  %7748 = vmatpush1.bf16.msra.mxu1 %v7747_v40 }
 0x250   : > { %v8549_v52 = vpop.eup %8548  ;;  %8560 = vtanh.f32 %v7911_v23 }
 0x251   : > { %v8551_v53 = vpop.eup %8550  ;;  %8562 = vtanh.f32 %v7912_v25 }
 0x252   : > { %v8553_v54 = vpop.eup %8552  ;;  %7325 = vmatmul.mubr.msk.f32.vlgmr.msra.gmra.mrb[4].mxu1 %vm2125_vm9, %v2111_v58 }
 0x253   : > { %v8555_v59 = vpop.eup %8554  ;;  %v1946_v60 = vpop.f32.mrb[24].mxu0  ;;  %v7751_v61 = vpack.c.bf16 %v8553_v54, %v8549_v52  ;;  %2285 = vmatprep.mubr.f32.mxu1 %v8805_v17 }
 0x254   : > { %v7913_v57 = vadd.f32 %v1946_v60, %v9643_v22  ;;  %v1948_v62 = vpop.f32.mrb[25].mxu0  ;;  %v7749_v19 = vpack.c.bf16 %v8555_v59, %v8551_v53 }
 0x255   : > { %v7914_v20 = vadd.f32 %v1948_v62, %v9646_v26  ;;  %v1950_v21 = vpop.f32.mrb[26].mxu0 }
 0x256   : > { %8564 = vtanh.f32 %v7913_v57  ;;  %v7915_v63 = vadd.f32 %v1950_v21, %v9643_v22  ;;  %v1952_v1 = vpop.f32.mrb[27].mxu0  ;;  %7750 = vmatprep.subr.bf16.mxu1 %v7749_v19  ;;  %7326 = vmatmul.mubr.msk.f32.gmra.mrb[6].mxu1 %vm2125_vm9, %v2112_v2  ;;  %v2115_v2 = vld [vmem:[%s11657_s3 + $0x30] sm:$0xff] }
 0x257   : > { %8566 = vtanh.f32 %v7914_v20  ;;  %v7916_v3 = vadd.f32 %v1952_v1, %v9646_v26  ;;  %7752 = vmatpush1.bf16.msra.mxu1 %v7751_v61  ;;  %2362 = vmatprep.mubr.f32.mxu1 %v8805_v17 }
 0x258   : > { %v8557_v41 = vpop.eup %8556  ;;  %8568 = vtanh.f32 %v7915_v63  ;;  %v2116_v63 = vld [vmem:[%s11657_s3 + $0x38] sm:$0xff] }
 0x259   : > { %v8559_v7 = vpop.eup %8558  ;;  %8570 = vtanh.f32 %v7916_v3 }
 0x25a   : > { %v8561_v13 = vpop.eup %8560 }
 0x25b   : > { %v8563_v50 = vpop.eup %8562  ;;  %v1956_v51 = vpop.f32.mrb[28].mxu0  ;;  %v7755_v55 = vpack.c.bf16 %v8561_v13, %v8557_v41 }
 0x25c   : > { %v7917_v15 = vadd.f32 %v1956_v51, %v9643_v22  ;;  %v1958_v8 = vpop.f32.mrb[29].mxu0  ;;  %v7753_v12 = vpack.c.bf16 %v8563_v50, %v8559_v7 }
 0x25d   : > { %v7918_v0 = vadd.f32 %v1958_v8, %v9646_v26  ;;  %v1960_v38 = vpop.f32.mrb[30].mxu0 }
 0x25e   : > { %8572 = vtanh.f32 %v7917_v15  ;;  %v7919_v16 = vadd.f32 %v1960_v38, %v9643_v22  ;;  %v1962_v9 = vpop.f32.mrb[31].mxu0  ;;  %7754 = vmatprep.subr.bf16.mxu1 %v7753_v12 }
 0x25f   : > { %8574 = vtanh.f32 %v7918_v0  ;;  %v7920_v10 = vadd.f32 %v1962_v9, %v9646_v26  ;;  %7756 = vmatpush1.bf16.msra.mxu1 %v7755_v55 }
 0x260   : > { %v8565_v29 = vpop.eup %8564  ;;  %8576 = vtanh.f32 %v7919_v16 }
 0x261   : > { %v8567_v27 = vpop.eup %8566  ;;  %8578 = vtanh.f32 %v7920_v10 }
 0x262   : > { %v8569_v28 = vpop.eup %8568  ;;  %7327 = vmatmul.mubr.msk.f32.vlgmr.msra.gmra.mrb[8].mxu1 %vm2125_vm9, %v2113_v11 }
 0x263   : > { %v8571_v31 = vpop.eup %8570  ;;  %v1966_v32 = vpop.f32.mrb[32].mxu0  ;;  %v7759_v33 = vpack.c.bf16 %v8569_v28, %v8565_v29  ;;  %2368 = vmatprep.mubr.f32.mxu1 %v8805_v17 }
 0x264   : > { %v7921_v35 = vadd.f32 %v1966_v32, %v9643_v22  ;;  %v1968_v36 = vpop.f32.mrb[33].mxu0  ;;  %v7757_v39 = vpack.c.bf16 %v8571_v31, %v8567_v27 }
 0x265   : > { %v7922_v44 = vadd.f32 %v1968_v36, %v9646_v26  ;;  %v1970_v18 = vpop.f32.mrb[34].mxu0 }
 0x266   : > { %8580 = vtanh.f32 %v7921_v35  ;;  %v7923_v45 = vadd.f32 %v1970_v18, %v9643_v22  ;;  %v1972_v40 = vpop.f32.mrb[35].mxu0  ;;  %7758 = vmatprep.subr.bf16.mxu1 %v7757_v39  ;;  %7328 = vmatmul.mubr.msk.f32.gmra.mrb[10].mxu1 %vm2125_vm9, %v2114_v34  ;;  %v2117_v34 = vld [vmem:[%s11657_s3 + $0x40] sm:$0xff] }
 0x267   : > { %8582 = vtanh.f32 %v7922_v44  ;;  %v7924_v42 = vadd.f32 %v1972_v40, %v9646_v26  ;;  %7760 = vmatpush1.bf16.msra.mxu1 %v7759_v33  ;;  %2445 = vmatprep.mubr.f32.mxu1 %v8805_v17 }
 0x268   : > { %v8573_v47 = vpop.eup %8572  ;;  %8584 = vtanh.f32 %v7923_v45  ;;  %v2118_v45 = vld [vmem:[%s11657_s3 + $0x48] sm:$0xff] }
 0x269   : > { %v8575_v48 = vpop.eup %8574  ;;  %8586 = vtanh.f32 %v7924_v42 }
 0x26a   : > { %v8577_v49 = vpop.eup %8576 }
 0x26b   : > { %v8579_v56 = vpop.eup %8578  ;;  %v1976_v23 = vpop.f32.mrb[36].mxu0  ;;  %v7763_v37 = vpack.c.bf16 %v8577_v49, %v8573_v47 }
 0x26c   : > { %v7925_v25 = vadd.f32 %v1976_v23, %v9643_v22  ;;  %v1978_v58 = vpop.f32.mrb[37].mxu0  ;;  %v7761_v52 = vpack.c.bf16 %v8579_v56, %v8575_v48 }
 0x26d   : > { %v7926_v53 = vadd.f32 %v1978_v58, %v9646_v26  ;;  %v1980_v54 = vpop.f32.mrb[38].mxu0 }
 0x26e   : > { %8588 = vtanh.f32 %v7925_v25  ;;  %v7927_v59 = vadd.f32 %v1980_v54, %v9643_v22  ;;  %v1982_v60 = vpop.f32.mrb[39].mxu0  ;;  %7762 = vmatprep.subr.bf16.mxu1 %v7761_v52 }
 0x26f   : > { %8590 = vtanh.f32 %v7926_v53  ;;  %v7928_v61 = vadd.f32 %v1982_v60, %v9646_v26  ;;  %7764 = vmatpush1.bf16.msra.mxu1 %v7763_v37 }
 0x270   : > { %v8581_v57 = vpop.eup %8580  ;;  %8592 = vtanh.f32 %v7927_v59 }
 0x271   : > { %v8583_v62 = vpop.eup %8582  ;;  %8594 = vtanh.f32 %v7928_v61 }
 0x272   : > { %v8585_v19 = vpop.eup %8584  ;;  %7329 = vmatmul.mubr.msk.f32.vlgmr.msra.gmra.mrb[12].mxu1 %vm2125_vm9, %v2115_v2 }
 0x273   : > { %v8587_v20 = vpop.eup %8586  ;;  %v1986_v21 = vpop.f32.mrb[40].mxu0  ;;  %2451 = vmatprep.mubr.f32.mxu1 %v8805_v17  ;;  %v7767_v1 = vpack.c.bf16 %v8585_v19, %v8581_v57 }
 0x274   : > { %v7929_v3 = vadd.f32 %v1986_v21, %v9643_v22  ;;  %v1988_v41 = vpop.f32.mrb[41].mxu0  ;;  %v7765_v7 = vpack.c.bf16 %v8587_v20, %v8583_v62 }
 0x275   : > { %v7930_v13 = vadd.f32 %v1988_v41, %v9646_v26  ;;  %v1990_v50 = vpop.f32.mrb[42].mxu0 }
 0x276   : > { %8596 = vtanh.f32 %v7929_v3  ;;  %v7931_v51 = vadd.f32 %v1990_v50, %v9643_v22  ;;  %v1992_v55 = vpop.f32.mrb[43].mxu0  ;;  %7330 = vmatmul.mubr.msk.f32.gmra.mrb[14].mxu1 %vm2125_vm9, %v2116_v63  ;;  %7766 = vmatprep.subr.bf16.mxu1 %v7765_v7 }
 0x277   : > { %8598 = vtanh.f32 %v7930_v13  ;;  %v7932_v15 = vadd.f32 %v1992_v55, %v9646_v26  ;;  %7768 = vmatpush1.bf16.msra.mxu1 %v7767_v1  ;;  %2528 = vmatprep.mubr.f32.mxu1 %v8805_v17  ;;  %v2119_v1 = vld [vmem:[%s11657_s3 + $0x50] sm:$0xff] }
 0x278   : > { %v8589_v8 = vpop.eup %8588  ;;  %8600 = vtanh.f32 %v7931_v51  ;;  %v2120_v51 = vld [vmem:[%s11657_s3 + $0x58] sm:$0xff] }
 0x279   : > { %v8591_v12 = vpop.eup %8590  ;;  %8602 = vtanh.f32 %v7932_v15 }
 0x27a   : > { %v8593_v0 = vpop.eup %8592 }
 0x27b   : > { %v8595_v38 = vpop.eup %8594  ;;  %v1996_v16 = vpop.f32.mrb[44].mxu0  ;;  %v7771_v9 = vpack.c.bf16 %v8593_v0, %v8589_v8 }
 0x27c   : > { %v7933_v10 = vadd.f32 %v1996_v16, %v9643_v22  ;;  %v1998_v11 = vpop.f32.mrb[45].mxu0  ;;  %v7769_v29 = vpack.c.bf16 %v8595_v38, %v8591_v12 }
 0x27d   : > { %v7934_v27 = vadd.f32 %v1998_v11, %v9646_v26  ;;  %v2000_v28 = vpop.f32.mrb[46].mxu0 }
 0x27e   : > { %8604 = vtanh.f32 %v7933_v10  ;;  %v7935_v31 = vadd.f32 %v2000_v28, %v9643_v22  ;;  %v2002_v32 = vpop.f32.mrb[47].mxu0  ;;  %7770 = vmatprep.subr.bf16.mxu1 %v7769_v29 }
 0x27f   : > { %8606 = vtanh.f32 %v7934_v27  ;;  %v7936_v33 = vadd.f32 %v2002_v32, %v9646_v26  ;;  %7772 = vmatpush1.bf16.msra.mxu1 %v7771_v9 }
 0x280   : > { %v8597_v35 = vpop.eup %8596  ;;  %8608 = vtanh.f32 %v7935_v31 }
 0x281   : > { %v8599_v36 = vpop.eup %8598  ;;  %8610 = vtanh.f32 %v7936_v33 }
 0x282   : > { %v8601_v39 = vpop.eup %8600  ;;  %7331 = vmatmul.mubr.msk.f32.vlgmr.msra.gmra.mrb[16].mxu1 %vm2125_vm9, %v2117_v34 }
 0x283   : > { %v8603_v44 = vpop.eup %8602  ;;  %v2006_v18 = vpop.f32.mrb[48].mxu0  ;;  %2534 = vmatprep.mubr.f32.mxu1 %v8805_v17  ;;  %v7775_v40 = vpack.c.bf16 %v8601_v39, %v8597_v35 }
 0x284   : > { %v7937_v42 = vadd.f32 %v2006_v18, %v9643_v22  ;;  %v2008_v47 = vpop.f32.mrb[49].mxu0  ;;  %v7773_v48 = vpack.c.bf16 %v8603_v44, %v8599_v36 }
 0x285   : > { %v7938_v49 = vadd.f32 %v2008_v47, %v9646_v26  ;;  %v2010_v56 = vpop.f32.mrb[50].mxu0 }
 0x286   : > { %8612 = vtanh.f32 %v7937_v42  ;;  %v7939_v23 = vadd.f32 %v2010_v56, %v9643_v22  ;;  %v2012_v37 = vpop.f32.mrb[51].mxu0  ;;  %7332 = vmatmul.mubr.msk.f32.gmra.mrb[18].mxu1 %vm2125_vm9, %v2118_v45  ;;  %7774 = vmatprep.subr.bf16.mxu1 %v7773_v48 }
 0x287   : > { %8614 = vtanh.f32 %v7938_v49  ;;  %v7940_v25 = vadd.f32 %v2012_v37, %v9646_v26  ;;  %7776 = vmatpush1.bf16.msra.mxu1 %v7775_v40  ;;  %2611 = vmatprep.mubr.f32.mxu1 %v8805_v17  ;;  %v2121_v40 = vld [vmem:[%s11657_s3 + $0x60] sm:$0xff] }
 0x288   : > { %v8605_v58 = vpop.eup %8604  ;;  %8616 = vtanh.f32 %v7939_v23 }
 0x289   : > { %v8607_v52 = vpop.eup %8606  ;;  %8618 = vtanh.f32 %v7940_v25 }
 0x28a   : > { %v8609_v53 = vpop.eup %8608 }
 0x28b   : > { %v8611_v54 = vpop.eup %8610  ;;  %v2016_v59 = vpop.f32.mrb[52].mxu0  ;;  %v7779_v60 = vpack.c.bf16 %v8609_v53, %v8605_v58 }
 0x28c   : > { %v7941_v61 = vadd.f32 %v2016_v59, %v9643_v22  ;;  %v2018_v2 = vpop.f32.mrb[53].mxu0  ;;  %v7777_v57 = vpack.c.bf16 %v8611_v54, %v8607_v52  ;;  %v2790_v54 = vld [vmem:[%s11656_s2] sm:$0xff]  ;;  %v2791_v59 = vld [vmem:[%s11656_s2 + $0x8] sm:$0xff] }
 0x28d   : > { %v7942_v62 = vadd.f32 %v2018_v2, %v9646_v26  ;;  %v2020_v19 = vpop.f32.mrb[54].mxu0  ;;  %v11671_v2 = vmov 0.0|0.0  }
 0x28e   : > { %8620 = vtanh.f32 %v7941_v61  ;;  %v7943_v20 = vadd.f32 %v2020_v19, %v9643_v22  ;;  %v2022_v21 = vpop.f32.mrb[55].mxu0  ;;  %7778 = vmatprep.subr.bf16.mxu1 %v7777_v57  ;;  %v7798_v61 = vpack.c.bf16 %v2791_v59, %v2790_v54  ;;  %v2792_v57 = vld [vmem:[%s11656_s2 + $0x10] sm:$0xff]  ;;  %v2124_v19 = vld [vmem:[%s11657_s3 + $0x78] sm:$0xff] }
 0x28f   : > { %8622 = vtanh.f32 %v7942_v62  ;;  %v7944_v63 = vadd.f32 %v2022_v21, %v9646_v26  ;;  %7780 = vmatpush1.bf16.msra.mxu1 %v7779_v60  ;;  %v2123_v60 = vld [vmem:[%s11657_s3 + $0x70] sm:$0xff]  ;;  %v2793_v62 = vld [vmem:[%s11656_s2 + $0x18] sm:$0xff]  ;;  %v2794_v21 = vld [vmem:[%s11656_s2 + $0x20] sm:$0xff] }
 0x290   : > { %v8613_v3 = vpop.eup %8612  ;;  %8624 = vtanh.f32 %v7943_v20  ;;  %v7801_v20 = vpack.c.bf16 %v2793_v62, %v2792_v57 }
 0x291   : > { %v8615_v41 = vpop.eup %8614  ;;  %8626 = vtanh.f32 %v7944_v63  ;;  %v2795_v63 = vld [vmem:[%s11656_s2 + $0x28] sm:$0xff] }
 0x292   : > { %v8617_v7 = vpop.eup %8616  ;;  %7333 = vmatmul.mubr.msk.f32.vlgmr.msra.gmra.mrb[20].mxu1 %vm2125_vm9, %v2119_v1  ;;  %v7804_v1 = vpack.c.bf16 %v2795_v63, %v2794_v21 }
 0x293   : > { %v8619_v13 = vpop.eup %8618  ;;  %v2026_v50 = vpop.f32.mrb[56].mxu0  ;;  %2617 = vmatprep.mubr.f32.mxu1 %v8805_v17  ;;  %v7783_v55 = vpack.c.bf16 %v8617_v7, %v8613_v3  ;;  %v2796_v3 = vld [vmem:[%s11656_s2 + $0x30] sm:$0xff] }
 0x294   : > { %v7945_v15 = vadd.f32 %v2026_v50, %v9643_v22  ;;  %v2028_v8 = vpop.f32.mrb[57].mxu0  ;;  %v7781_v12 = vpack.c.bf16 %v8619_v13, %v8615_v41  ;;  %v2797_v41 = vld [vmem:[%s11656_s2 + $0x38] sm:$0xff]  ;;  %v2798_v13 = vld [vmem:[%s11656_s2 + $0x40] sm:$0xff]  ;;  %v2799_v50 = vld [vmem:[%s11656_s2 + $0x48] sm:$0xff] }
 0x295   : > { %v7946_v0 = vadd.f32 %v2028_v8, %v9646_v26  ;;  %v2030_v38 = vpop.f32.mrb[58].mxu0  ;;  %v7807_v7 = vpack.c.bf16 %v2797_v41, %v2796_v3 }
 0x296   : > { %8628 = vtanh.f32 %v7945_v15  ;;  %v7947_v16 = vadd.f32 %v2030_v38, %v9643_v22  ;;  %v2032_v9 = vpop.f32.mrb[59].mxu0  ;;  %7334 = vmatmul.mubr.msk.f32.gmra.mrb[22].mxu1 %vm2125_vm9, %v2120_v51  ;;  %7782 = vmatprep.subr.bf16.mxu1 %v7781_v12  ;;  %v7810_v51 = vpack.c.bf16 %v2799_v50, %v2798_v13  ;;  %v2801_v15 = vld [vmem:[%s11656_s2 + $0x58] sm:$0xff]  ;;  %v2802_v12 = vld [vmem:[%s11656_s2 + $0x60] sm:$0xff] }
 0x297   : > { %8630 = vtanh.f32 %v7946_v0  ;;  %v7948_v10 = vadd.f32 %v2032_v9, %v9646_v26  ;;  %7784 = vmatpush1.bf16.msra.mxu1 %v7783_v55  ;;  %2694 = vmatprep.mubr.f32.mxu1 %v8805_v17  ;;  %v2800_v55 = vld [vmem:[%s11656_s2 + $0x50] sm:$0xff]  ;;  %v2803_v0 = vld [vmem:[%s11656_s2 + $0x68] sm:$0xff]  ;;  %v2805_v9 = vld [vmem:[%s11656_s2 + $0x78] sm:$0xff] }
 0x298   : > { %v8621_v11 = vpop.eup %8620  ;;  %8632 = vtanh.f32 %v7947_v16  ;;  %v7813_v8 = vpack.c.bf16 %v2801_v15, %v2800_v55  ;;  %v7816_v38 = vpack.c.bf16 %v2803_v0, %v2802_v12  ;;  %v2804_v16 = vld [vmem:[%s11656_s2 + $0x70] sm:$0xff] }
 0x299   : > { %v8623_v29 = vpop.eup %8622  ;;  %8634 = vtanh.f32 %v7948_v10  ;;  %v7819_v10 = vpack.c.bf16 %v2805_v9, %v2804_v16  ;;  %v8344_v16 = vld [vmem:[%s11658_s4 + $0x4] ss:$8 sps:$4 sm:$0xff]   ;;  %v8347_v9 = vld [vmem:[%s11658_s4 + $0x14] ss:$8 sps:$4 sm:$0xff]  }
 0x29a   : > { %v8625_v27 = vpop.eup %8624 }
 0x29b   : > { %v8627_v28 = vpop.eup %8626  ;;  %v2036_v31 = vpop.f32.mrb[60].mxu0  ;;  %v7787_v32 = vpack.c.bf16 %v8625_v27, %v8621_v11  ;;  %v2806_v11 = vld [vmem:[%s11656_s2 + $0x80] sm:$0xff] }
 0x29c   : > { %v7949_v33 = vadd.f32 %v2036_v31, %v9643_v22  ;;  %v2038_v34 = vpop.f32.mrb[61].mxu0  ;;  %v7785_v35 = vpack.c.bf16 %v8627_v28, %v8623_v29  ;;  %v2807_v29 = vld [vmem:[%s11656_s2 + $0x88] sm:$0xff]  ;;  %v2808_v28 = vld [vmem:[%s11656_s2 + $0x90] sm:$0xff]  ;;  %v2809_v31 = vld [vmem:[%s11656_s2 + $0x98] sm:$0xff] }
 0x29d   : > { %v7950_v36 = vadd.f32 %v2038_v34, %v9646_v26  ;;  %v2040_v39 = vpop.f32.mrb[62].mxu0  ;;  %v7822_v27 = vpack.c.bf16 %v2807_v29, %v2806_v11 }
 0x29e   : > { %8636 = vtanh.f32 %v7949_v33  ;;  %v7951_v44 = vadd.f32 %v2040_v39, %v9643_v22  ;;  %v2042_v18 = vpop.f32.mrb[63].mxu0  ;;  %7786 = vmatprep.subr.bf16.mxu1 %v7785_v35  ;;  %v2122_v22 = vld [vmem:[%s11657_s3 + $0x68] sm:$0xff]  ;;  %v2810_v33 = vld [vmem:[%s11656_s2 + $0xa0] sm:$0xff] }
 0x29f   : > { %8638 = vtanh.f32 %v7950_v36  ;;  %v7952_v45 = vadd.f32 %v2042_v18, %v9646_v26  ;;  %7788 = vmatpush1.bf16.msra.mxu1 %v7787_v32  ;;  %v7825_v32 = vpack.c.bf16 %v2809_v31, %v2808_v28  ;;  %v8350_v31 = vld [vmem:[%s11658_s4 + $0x24] ss:$8 sps:$4 sm:$0xff]  }
 0x2a0   : > { %v8629_v42 = vpop.eup %8628  ;;  %8640 = vtanh.f32 %v7951_v44 }
 0x2a1   : > { %v8631_v47 = vpop.eup %8630  ;;  %8642 = vtanh.f32 %v7952_v45 }
 0x2a2   : > { %v8633_v48 = vpop.eup %8632  ;;  %7335 = vmatmul.mubr.msk.f32.vlgmr.msra.gmra.mrb[24].mxu1 %vm2125_vm9, %v2121_v40 }
 0x2a3   : > { %v8635_v49 = vpop.eup %8634  ;;  %2700 = vmatprep.mubr.f32.mxu1 %v8805_v17  ;;  %v7791_v26 = vpack.c.bf16 %v8633_v48, %v8629_v42 }
 0x2a4   : > { %v7789_v56 = vpack.c.bf16 %v8635_v49, %v8631_v47 }
 0x2a6   : > { %7336 = vmatmul.mubr.msk.f32.gmra.mrb[26].mxu1 %vm2125_vm9, %v2122_v22  ;;  %7790 = vmatprep.subr.bf16.mxu1 %v7789_v56 }
 0x2a7   : > { %7792 = vmatpush1.bf16.msra.mxu1 %v7791_v26  ;;  %2777 = vmatprep.mubr.f32.mxu1 %v8805_v17 }
 0x2a8   : > { %v8637_v23 = vpop.eup %8636 }
 0x2a9   : > { %v8639_v37 = vpop.eup %8638 }
 0x2aa   : > { %v8641_v25 = vpop.eup %8640 }
 0x2ab   : > { %v8643_v58 = vpop.eup %8642  ;;  %v7795_v52 = vpack.c.bf16 %v8641_v25, %v8637_v23 }
 0x2ac   : > { %v7793_v53 = vpack.c.bf16 %v8643_v58, %v8639_v37 }
 0x2ae   : > { %7794 = vmatprep.subr.bf16.mxu1 %v7793_v53 }
 0x2af   : > { %7796 = vmatpush1.bf16.msra.mxu1 %v7795_v52 }
 0x2b0   : > { %7797 = vmatprep.subr.bf16.mxu1 %v11671_v2 }
 0x2b2   : > { %7337 = vmatmul.mubr.msk.f32.vlgmr.msra.gmra.mrb[28].mxu1 %vm2125_vm9, %v2123_v60 }
 0x2b3   : > { %2783 = vmatprep.mubr.f32.mxu1 %v8805_v17  ;;  %7799 = vmatpush1.bf16.msra.mxu1 %v7798_v61 }
 0x2b4   : > { %7800 = vmatprep.subr.bf16.mxu1 %v11671_v2 }
 0x2b6   : > { %7338 = vmatmul.mubr.msk.f32.gmra.mrb[30].mxu1 %vm2125_vm9, %v2124_v19 }
 0x2b7   : > { %7802 = vmatpush1.bf16.msra.mxu1 %v7801_v20 }
 0x2b8   : > { %7803 = vmatprep.subr.bf16.mxu1 %v11671_v2 }
 0x2bb   : > { %7805 = vmatpush1.bf16.msra.mxu1 %v7804_v1 }
 0x2bc   : > { %7806 = vmatprep.subr.bf16.mxu1 %v11671_v2 }
 0x2bf   : > { %7808 = vmatpush1.bf16.msra.mxu1 %v7807_v7 }
 0x2c0   : > { %7809 = vmatprep.subr.bf16.mxu1 %v11671_v2 }
 0x2c3   : > { %7811 = vmatpush1.bf16.msra.mxu1 %v7810_v51 }
 0x2c4   : > { %7812 = vmatprep.subr.bf16.mxu1 %v11671_v2 }
 0x2c7   : > { %7814 = vmatpush1.bf16.msra.mxu1 %v7813_v8 }
 0x2c8   : > { %7815 = vmatprep.subr.bf16.mxu1 %v11671_v2 }
 0x2cb   : > { %7817 = vmatpush1.bf16.msra.mxu1 %v7816_v38  ;;  %v8342_v38 = vld [vmem:[%s11658_s4] ss:$8 sps:$4 sm:$0xff]  }
 0x2cc   : > { %7818 = vmatprep.subr.bf16.mxu1 %v11671_v2 }
 0x2cf   : > { %7820 = vmatpush1.bf16.msra.mxu1 %v7819_v10 }
 0x2d0   : > { %7821 = vmatprep.subr.bf16.mxu1 %v11671_v2 }
 0x2d3   : > { %7823 = vmatpush1.bf16.msra.mxu1 %v7822_v27  ;;  %v8345_v27 = vld [vmem:[%s11658_s4 + $0x10] ss:$8 sps:$4 sm:$0xff]  }
 0x2d4   : > { %7824 = vmatprep.subr.bf16.mxu1 %v11671_v2 }
 0x2d7   : > { %7826 = vmatpush1.bf16.msra.mxu1 %v7825_v32 }
 0x2d8   : > { %2900 = vmatprep.subr.mxu1 %v8805_v17 }
 0x2db   : > { %2901 = vmatpush1.msra.mxu1 %v2810_v33 }
 0x2dc   : > { %4288 = vmatprep.subr.bf16.mxu1 %v8344_v16 }
 0x315   : > { %v2198_v34 = vpop.f32.mrb[0].mxu1 }
 0x316   : > { %v2200_v35 = vpop.f32.mrb[1].mxu1 }
 0x317   : > { %7339 = vmatprep.mubr.msk.f32.mxu1 %vm2811_vm10, %v2200_v35 }
 0x318   : > { %2925 = vmatmul.mubr.f32.vlgmr.msra.gmra.mrb[32].mxu1 %v2198_v34 }
 0x319   : > { %v2204_v36 = vpop.f32.mrb[2].mxu1  ;;  %4289 = vmatpush1.bf16.msra.mxu1 %v8342_v38 }
 0x31a   : > { %v2206_v39 = vpop.f32.mrb[3].mxu1  ;;  %4290 = vmatprep.subr.bf16.mxu1 %v8347_v9 }
 0x31b   : > { %7340 = vmatprep.mubr.msk.f32.mxu1 %vm2811_vm10, %v2206_v39 }
 0x31c   : > { %2930 = vmatmul.mubr.f32.gmra.mrb[34].mxu1 %v2204_v36 }
 0x31d   : > { %4291 = vmatpush1.bf16.msra.mxu1 %v8345_v27 }
 0x31e   : > { %4292 = vmatprep.subr.bf16.mxu1 %v8350_v31 }
 0x325   : > { %v2281_v44 = vpop.f32.mrb[4].mxu1 }
 0x326   : > { %v2283_v18 = vpop.f32.mrb[5].mxu1 }
 0x327   : > { %7341 = vmatprep.mubr.msk.f32.mxu1 %vm2811_vm10, %v2283_v18 }
 0x328   : > { %2935 = vmatmul.mubr.f32.gmra.mrb[36].mxu1 %v2281_v44  ;;  %v8348_v44 = vld [vmem:[%s11658_s4 + $0x20] ss:$8 sps:$4 sm:$0xff]  }
 0x329   : > { %v2287_v45 = vpop.f32.mrb[6].mxu1  ;;  %4293 = vmatpush1.bf16.msra.mxu1 %v8348_v44 }
 0x32a   : > { %v2289_v40 = vpop.f32.mrb[7].mxu1 }
 0x32b   : > { %7342 = vmatprep.mubr.msk.f32.mxu1 %vm2811_vm10, %v2289_v40 }
 0x32c   : > { %2940 = vmatmul.mubr.f32.gmra.mrb[38].mxu1 %v2287_v45  ;;  %v8353_v45 = vld [vmem:[%s11658_s4 + $0x34] ss:$8 sps:$4 sm:$0xff]  }
 0x32d   : > { %4294 = vmatprep.subr.bf16.mxu1 %v8353_v45 }
 0x335   : > { %v2364_v42 = vpop.f32.mrb[8].mxu1 }
 0x336   : > { %v2366_v47 = vpop.f32.mrb[9].mxu1 }
 0x337   : > { %7343 = vmatprep.mubr.msk.f32.mxu1 %vm2811_vm10, %v2366_v47 }
 0x338   : > { %2945 = vmatmul.mubr.f32.gmra.mrb[40].mxu1 %v2364_v42 }
 0x339   : > { %v2370_v48 = vpop.f32.mrb[10].mxu1 }
 0x33a   : > { %v2372_v49 = vpop.f32.mrb[11].mxu1 }
 0x33b   : > { %7344 = vmatprep.mubr.msk.f32.mxu1 %vm2811_vm10, %v2372_v49 }
 0x33c   : > { %2950 = vmatmul.mubr.f32.gmra.mrb[42].mxu1 %v2370_v48 }
 0x345   : > { %v2447_v22 = vpop.f32.mrb[12].mxu1 }
 0x346   : > { %v2449_v26 = vpop.f32.mrb[13].mxu1 }
 0x347   : > { %7345 = vmatprep.mubr.msk.f32.mxu1 %vm2811_vm10, %v2449_v26 }
 0x348   : > { %2955 = vmatmul.mubr.f32.gmra.mrb[44].mxu1 %v2447_v22  ;;  %v8351_v22 = vld [vmem:[%s11658_s4 + $0x30] ss:$8 sps:$4 sm:$0xff]  }
 0x349   : > { %v2453_v56 = vpop.f32.mrb[14].mxu1  ;;  %4295 = vmatpush1.bf16.msra.mxu1 %v8351_v22 }
 0x34a   : > { %v2455_v23 = vpop.f32.mrb[15].mxu1 }
 0x34b   : > { %7346 = vmatprep.mubr.msk.f32.mxu1 %vm2811_vm10, %v2455_v23 }
 0x34c   : > { %2960 = vmatmul.mubr.f32.gmra.mrb[46].mxu1 %v2453_v56  ;;  %v8356_v56 = vld [vmem:[%s11658_s4 + $0x44] ss:$8 sps:$4 sm:$0xff]  }
 0x34d   : > { %4296 = vmatprep.subr.bf16.mxu1 %v8356_v56 }
 0x355   : > { %v2530_v37 = vpop.f32.mrb[16].mxu1 }
 0x356   : > { %v2532_v25 = vpop.f32.mrb[17].mxu1 }
 0x357   : > { %7347 = vmatprep.mubr.msk.f32.mxu1 %vm2811_vm10, %v2532_v25  ;;  %v3005_v25 = vld [vmem:[%s11661_s7] sm:$0x3] }
 0x358   : > { %2965 = vmatmul.mubr.f32.gmra.mrb[48].mxu1 %v2530_v37 }
 0x359   : > { %v2536_v58 = vpop.f32.mrb[18].mxu1 }
 0x35a   : > { %v2538_v52 = vpop.f32.mrb[19].mxu1 }
 0x35b   : > { %7348 = vmatprep.mubr.msk.f32.mxu1 %vm2811_vm10, %v2538_v52 }
 0x35c   : > { %2970 = vmatmul.mubr.f32.gmra.mrb[50].mxu1 %v2536_v58 }
 0x365   : > { %v2613_v53 = vpop.f32.mrb[20].mxu1 }
 0x366   : > { %v2615_v54 = vpop.f32.mrb[21].mxu1 }
 0x367   : > { %7349 = vmatprep.mubr.msk.f32.mxu1 %vm2811_vm10, %v2615_v54  ;;  %v8354_v54 = vld [vmem:[%s11658_s4 + $0x40] ss:$8 sps:$4 sm:$0xff]  }
 0x368   : > { %2975 = vmatmul.mubr.f32.gmra.mrb[52].mxu1 %v2613_v53 }
 0x369   : > { %v2619_v59 = vpop.f32.mrb[22].mxu1  ;;  %4297 = vmatpush1.bf16.msra.mxu1 %v8354_v54 }
 0x36a   : > { %v2621_v60 = vpop.f32.mrb[23].mxu1 }
 0x36b   : > { %7350 = vmatprep.mubr.msk.f32.mxu1 %vm2811_vm10, %v2621_v60  ;;  %v9935_v60 = vrot.slane %v3005_v25, %v9634_v5 }
 0x36c   : > { %2980 = vmatmul.mubr.f32.gmra.mrb[54].mxu1 %v2619_v59 }
 0x375   : > { %v2696_v61 = vpop.f32.mrb[24].mxu1 }
 0x376   : > { %v2698_v57 = vpop.f32.mrb[25].mxu1 }
 0x377   : > { %7351 = vmatprep.mubr.msk.f32.mxu1 %vm2811_vm10, %v2698_v57 }
 0x378   : > { %2985 = vmatmul.mubr.f32.gmra.mrb[56].mxu1 %v2696_v61  ;;  %v9938_v61 = vrot.slane %v3005_v25, %v9640_v6 }
 0x379   : > { %v2702_v62 = vpop.f32.mrb[26].mxu1 }
 0x37a   : > { %v2704_v19 = vpop.f32.mrb[27].mxu1 }
 0x37b   : > { %7352 = vmatprep.mubr.msk.f32.mxu1 %vm2811_vm10, %v2704_v19 }
 0x37c   : > { %2990 = vmatmul.mubr.f32.gmra.mrb[58].mxu1 %v2702_v62 }
 0x385   : > { %v2779_v20 = vpop.f32.mrb[28].mxu1 }
 0x386   : > { %v2781_v21 = vpop.f32.mrb[29].mxu1 }
 0x387   : > { %7353 = vmatprep.mubr.msk.f32.mxu1 %vm2811_vm10, %v2781_v21 }
 0x388   : > { %2995 = vmatmul.mubr.f32.gmra.mrb[60].mxu1 %v2779_v20 }
 0x389   : > { %v2785_v63 = vpop.f32.mrb[30].mxu1 }
 0x38a   : > { %v2787_v1 = vpop.f32.mrb[31].mxu1 }
 0x38b   : > { %7354 = vmatprep.mubr.msk.f32.mxu1 %vm2811_vm10, %v2787_v1  ;;  %vm3175_vm10 = vcmask 1047559  }
 0x38c   : > { %3000 = vmatmul.mubr.f32.gmra.mrb[62].mxu1 %v2785_v63 }
 0x3eb   : > { %v9881_v3 = vpop.f32.mrb[32].mxu1 }
 0x3ec   : > { %v2928_v41 = vpop.f32.mrb[33].mxu1  ;;  %v3064_v7 = vmul.f32 %v9881_v3, %v9881_v3 }
 0x3ef   : > { %v9885_v13 = vpop.f32.mrb[34].mxu1 }
 0x3f0   : > { %v3008_v50 = vadd.f32 %v9885_v13, %v9881_v3  ;;  %v3065_v51 = vmul.f32 %v9885_v13, %v9885_v13  ;;  %v2933_v55 = vpop.f32.mrb[35].mxu1 }
 0x3f2   : > { %v3080_v15 = vadd.f32 %v3065_v51, %v3064_v7  ;;  %v3009_v8 = vrot.slane %v3008_v50, 4 }
 0x3f4   : > { %v3081_v12 = vrot.slane %v3080_v15, 4  ;;  %v3010_v0 = vadd.f32 %v3009_v8, %v3008_v50 }
 0x3f6   : > { %v3082_v10 = vadd.f32 %v3081_v12, %v3080_v15  ;;  %v3011_v28 = vrot.slane %v3010_v0, 2 }
 0x3f8   : > { %v3083_v33 = vrot.slane %v3082_v10, 2  ;;  %v3012_v18 = vadd.f32 %v3011_v28, %v3010_v0 }
 0x3fa   : > { %v3084_v47 = vadd.f32 %v3083_v33, %v3082_v10  ;;  %v3013_v26 = vrot.slane %v3012_v18, 1 }
 0x3fb   : > { %v9900_v11 = vpop.f32.mrb[36].mxu1 }
 0x3fc   : > { %v2938_v29 = vpop.f32.mrb[37].mxu1  ;;  %v3066_v32 = vmul.f32 %v9900_v11, %v9900_v11  ;;  %v3085_v58 = vrot.slane %v3084_v47, 1  ;;  %v3014_v59 = vadd.f32 %v3013_v26, %v3012_v18 }
 0x3fe   : > { %v3086_v19 = vadd.f32 %v3085_v58, %v3084_v47  ;;  %v3140_v41 = vmul.f32 %v9935_v60, %v3014_v59  ;;  %v3227_v7 = vmul.f32 %v9938_v61, %v3014_v59 }
 0x3ff   : > { %v9910_v34 = vpop.f32.mrb[38].mxu1 }
 0x400   : > { %v3015_v35 = vadd.f32 %v9910_v34, %v9900_v11  ;;  %v3067_v36 = vmul.f32 %v9910_v34, %v9910_v34  ;;  %v2943_v39 = vpop.f32.mrb[39].mxu1  ;;  %v3180_v15 = vmul.f32 %v9935_v60, %v3086_v19  ;;  %v3260_v8 = vmul.f32 %v9938_v61, %v3086_v19 }
 0x402   : > { %v3016_v40 = vrot.slane %v3015_v35, 4  ;;  %v3087_v42 = vadd.f32 %v3067_v36, %v3066_v32 }
 0x404   : > { %v3017_v48 = vadd.f32 %v3016_v40, %v3015_v35  ;;  %v3088_v49 = vrot.slane %v3087_v42, 4 }
 0x406   : > { %v3018_v23 = vrot.slane %v3017_v48, 2  ;;  %v3089_v37 = vadd.f32 %v3088_v49, %v3087_v42 }
 0x408   : > { %v3019_v52 = vadd.f32 %v3018_v23, %v3017_v48  ;;  %v3090_v53 = vrot.slane %v3089_v37, 2 }
 0x40a   : > { %v3020_v57 = vrot.slane %v3019_v52, 1  ;;  %v3091_v62 = vadd.f32 %v3090_v53, %v3089_v37 }
 0x40b   : > { %v9940_v20 = vpop.f32.mrb[40].mxu1 }
 0x40c   : > { %v3021_v21 = vadd.f32 %v3020_v57, %v3019_v52  ;;  %v3092_v63 = vrot.slane %v3091_v62, 1  ;;  %v2948_v1 = vpop.f32.mrb[41].mxu1  ;;  %v3068_v12 = vmul.f32 %v9940_v20, %v9940_v20 }
 0x40e   : > { %v3093_v50 = vadd.f32 %v3092_v63, %v3091_v62  ;;  %v3141_v51 = vmul.f32 %v9935_v60, %v3021_v21  ;;  %v3228_v55 = vmul.f32 %v9938_v61, %v3021_v21 }
 0x40f   : > { %v9950_v0 = vpop.f32.mrb[42].mxu1 }
 0x410   : > { %v3156_v38 = vrot.slane %v3141_v51, 7  ;;  %v3181_v16 = vmul.f32 %v9935_v60, %v3093_v50  ;;  %v3243_v9 = vrot.slane %v3228_v55, 7  ;;  %v3261_v10 = vmul.f32 %v9938_v61, %v3093_v50  ;;  %v2953_v29 = vpop.f32.mrb[43].mxu1 }
 0x411   : > { %v3022_v27 = vadd.f32 %v9950_v0, %v9940_v20  ;;  %v3069_v28 = vmul.f32 %v9950_v0, %v9950_v0 }
 0x412   : > { %v3196_v31 = vrot.slane %v3181_v16, 7  ;;  %v3276_v32 = vrot.slane %v3261_v10, 7  ;;  %v3158_v33 = vsel %vm3157_vm11, %v3156_v38, %v3140_v41  ;;  %v3244_v35 = vsel %vm3157_vm11, %v3243_v9, %v3227_v7 }
 0x413   : > { %v3023_v36 = vrot.slane %v3022_v27, 4  ;;  %v3094_v39 = vadd.f32 %v3069_v28, %v3068_v12 }
 0x414   : > { %v3197_v44 = vsel %vm3157_vm11, %v3196_v31, %v3180_v15  ;;  %v3277_v18 = vsel %vm3157_vm11, %v3276_v32, %v3260_v8 }
 0x415   : > { %v3024_v45 = vadd.f32 %v3023_v36, %v3022_v27  ;;  %v3095_v40 = vrot.slane %v3094_v39, 4 }
 0x417   : > { %v3025_v42 = vrot.slane %v3024_v45, 2  ;;  %v3096_v47 = vadd.f32 %v3095_v40, %v3094_v39 }
 0x419   : > { %v3026_v48 = vadd.f32 %v3025_v42, %v3024_v45  ;;  %v3097_v49 = vrot.slane %v3096_v47, 2 }
 0x41b   : > { %v3027_v22 = vrot.slane %v3026_v48, 1  ;;  %v3098_v26 = vadd.f32 %v3097_v49, %v3096_v47  ;;  %v9962_v56 = vpop.f32.mrb[44].mxu1 }
 0x41c   : > { %v2958_v23 = vpop.f32.mrb[45].mxu1  ;;  %v3070_v58 = vmul.f32 %v9962_v56, %v9962_v56 }
 0x41d   : > { %v3028_v37 = vadd.f32 %v3027_v22, %v3026_v48  ;;  %v3099_v25 = vrot.slane %v3098_v26, 1 }
 0x41f   : > { %v3100_v52 = vadd.f32 %v3099_v25, %v3098_v26  ;;  %v3142_v53 = vmul.f32 %v9935_v60, %v3028_v37  ;;  %v3229_v54 = vmul.f32 %v9938_v61, %v3028_v37  ;;  %v9968_v59 = vpop.f32.mrb[46].mxu1 }
 0x420   : > { %v3029_v57 = vadd.f32 %v9968_v59, %v9962_v56  ;;  %v3071_v62 = vmul.f32 %v9968_v59, %v9968_v59  ;;  %v2963_v19 = vpop.f32.mrb[47].mxu1 }
 0x421   : > { %v3159_v21 = vrot.slane %v3142_v53, 6  ;;  %v3182_v63 = vmul.f32 %v9935_v60, %v3100_v52  ;;  %v3245_v1 = vrot.slane %v3229_v54, 6  ;;  %v3262_v41 = vmul.f32 %v9938_v61, %v3100_v52 }
 0x422   : > { %v3030_v7 = vrot.slane %v3029_v57, 4  ;;  %v3101_v50 = vadd.f32 %v3071_v62, %v3070_v58 }
 0x423   : > { %v3198_v51 = vrot.slane %v3182_v63, 6  ;;  %v3278_v55 = vrot.slane %v3262_v41, 6  ;;  %v3161_v15 = vsel %vm3160_vm12, %v3159_v21, %v3158_v33  ;;  %v3246_v8 = vsel %vm3160_vm12, %v3245_v1, %v3244_v35 }
 0x424   : > { %v3031_v12 = vadd.f32 %v3030_v7, %v3029_v57  ;;  %v3102_v38 = vrot.slane %v3101_v50, 4 }
 0x425   : > { %v3199_v16 = vsel %vm3160_vm12, %v3198_v51, %v3197_v44  ;;  %v3279_v9 = vsel %vm3160_vm12, %v3278_v55, %v3277_v18 }
 0x426   : > { %v3032_v10 = vrot.slane %v3031_v12, 2  ;;  %v3103_v29 = vadd.f32 %v3102_v38, %v3101_v50 }
 0x428   : > { %v3033_v27 = vadd.f32 %v3032_v10, %v3031_v12  ;;  %v3104_v28 = vrot.slane %v3103_v29, 2 }
 0x42a   : > { %v3034_v31 = vrot.slane %v3033_v27, 1  ;;  %v3105_v32 = vadd.f32 %v3104_v28, %v3103_v29 }
 0x42b   : > { %v9980_v36 = vpop.f32.mrb[48].mxu1 }
 0x42c   : > { %v3035_v39 = vadd.f32 %v3034_v31, %v3033_v27  ;;  %v3106_v45 = vrot.slane %v3105_v32, 1  ;;  %v2968_v40 = vpop.f32.mrb[49].mxu1  ;;  %v3072_v44 = vmul.f32 %v9980_v36, %v9980_v36 }
 0x42e   : > { %v3107_v33 = vadd.f32 %v3106_v45, %v3105_v32  ;;  %v3143_v35 = vmul.f32 %v9935_v60, %v3035_v39  ;;  %v3230_v42 = vmul.f32 %v9938_v61, %v3035_v39 }
 0x42f   : > { %v9986_v18 = vpop.f32.mrb[50].mxu1 }
 0x430   : > { %v3162_v47 = vrot.slane %v3143_v35, 5  ;;  %v3183_v48 = vmul.f32 %v9935_v60, %v3107_v33  ;;  %v3247_v49 = vrot.slane %v3230_v42, 5  ;;  %v3263_v22 = vmul.f32 %v9938_v61, %v3107_v33  ;;  %v2973_v26 = vpop.f32.mrb[51].mxu1 }
 0x431   : > { %v3036_v23 = vadd.f32 %v9986_v18, %v9980_v36  ;;  %v3073_v37 = vmul.f32 %v9986_v18, %v9986_v18 }
 0x432   : > { %v3164_v25 = vsel %vm3163_vm13, %v3162_v47, %v3161_v15  ;;  %v3200_v58 = vrot.slane %v3183_v48, 5  ;;  %v3248_v52 = vsel %vm3163_vm13, %v3247_v49, %v3246_v8  ;;  %v3280_v53 = vrot.slane %v3263_v22, 5 }
 0x433   : > { %v3037_v54 = vrot.slane %v3036_v23, 4  ;;  %v3108_v57 = vadd.f32 %v3073_v37, %v3072_v44 }
 0x434   : > { %v3201_v62 = vsel %vm3163_vm13, %v3200_v58, %v3199_v16  ;;  %v3281_v19 = vsel %vm3163_vm13, %v3280_v53, %v3279_v9 }
 0x435   : > { %v3038_v21 = vadd.f32 %v3037_v54, %v3036_v23  ;;  %v3109_v63 = vrot.slane %v3108_v57, 4 }
 0x437   : > { %v3039_v1 = vrot.slane %v3038_v21, 2  ;;  %v3110_v41 = vadd.f32 %v3109_v63, %v3108_v57 }
 0x439   : > { %v3040_v7 = vadd.f32 %v3039_v1, %v3038_v21  ;;  %v3111_v50 = vrot.slane %v3110_v41, 2 }
 0x43b   : > { %v3041_v51 = vrot.slane %v3040_v7, 1  ;;  %v3112_v55 = vadd.f32 %v3111_v50, %v3110_v41  ;;  %v9998_v12 = vpop.f32.mrb[52].mxu1 }
 0x43c   : > { %v2978_v15 = vpop.f32.mrb[53].mxu1  ;;  %v3074_v10 = vmul.f32 %v9998_v12, %v9998_v12 }
 0x43d   : > { %v3042_v38 = vadd.f32 %v3041_v51, %v3040_v7  ;;  %v3113_v8 = vrot.slane %v3112_v55, 1 }
 0x43f   : > { %v3114_v29 = vadd.f32 %v3113_v8, %v3112_v55  ;;  %v3231_v16 = vmul.f32 %v9938_v61, %v3042_v38  ;;  %v10003_v9 = vpop.f32.mrb[54].mxu1  ;;  %v3144_v27 = vmul.f32 %v9935_v60, %v3042_v38 }
 0x440   : > { %v3043_v28 = vadd.f32 %v10003_v9, %v9998_v12  ;;  %v3075_v31 = vmul.f32 %v10003_v9, %v10003_v9  ;;  %v2983_v32 = vpop.f32.mrb[55].mxu1 }
 0x441   : > { %v3165_v39 = vrot.slane %v3144_v27, 4  ;;  %v3184_v45 = vmul.f32 %v9935_v60, %v3114_v29  ;;  %v3249_v40 = vrot.slane %v3231_v16, 4  ;;  %v3264_v33 = vmul.f32 %v9938_v61, %v3114_v29 }
 0x442   : > { %v3044_v35 = vrot.slane %v3043_v28, 4  ;;  %v3115_v42 = vadd.f32 %v3075_v31, %v3074_v10 }
 0x443   : > { %v3167_v44 = vsel %vm3166_vm14, %v3165_v39, %v3164_v25  ;;  %v3202_v47 = vrot.slane %v3184_v45, 4  ;;  %v3250_v48 = vsel %vm3166_vm14, %v3249_v40, %v3248_v52  ;;  %v3282_v49 = vrot.slane %v3264_v33, 4 }
 0x444   : > { %v3045_v22 = vadd.f32 %v3044_v35, %v3043_v28  ;;  %v3116_v26 = vrot.slane %v3115_v42, 4 }
 0x445   : > { %v3203_v23 = vsel %vm3166_vm14, %v3202_v47, %v3201_v62  ;;  %v3283_v37 = vsel %vm3166_vm14, %v3282_v49, %v3281_v19 }
 0x446   : > { %v3046_v58 = vrot.slane %v3045_v22, 2  ;;  %v3117_v53 = vadd.f32 %v3116_v26, %v3115_v42 }
 0x448   : > { %v3047_v54 = vadd.f32 %v3046_v58, %v3045_v22  ;;  %v3118_v57 = vrot.slane %v3117_v53, 2 }
 0x44a   : > { %v3048_v21 = vrot.slane %v3047_v54, 1  ;;  %v3119_v63 = vadd.f32 %v3118_v57, %v3117_v53 }
 0x44b   : > { %v10016_v1 = vpop.f32.mrb[56].mxu1 }
 0x44c   : > { %v3049_v41 = vadd.f32 %v3048_v21, %v3047_v54  ;;  %v3120_v25 = vrot.slane %v3119_v63, 1  ;;  %v2988_v7 = vpop.f32.mrb[57].mxu1  ;;  %v3076_v52 = vmul.f32 %v10016_v1, %v10016_v1 }
 0x44e   : > { %v3145_v50 = vmul.f32 %v9935_v60, %v3049_v41  ;;  %v3121_v51 = vadd.f32 %v3120_v25, %v3119_v63  ;;  %v3232_v62 = vmul.f32 %v9938_v61, %v3049_v41 }
 0x44f   : > { %v10022_v19 = vpop.f32.mrb[58].mxu1 }
 0x450   : > { %v3050_v55 = vadd.f32 %v10022_v19, %v10016_v1  ;;  %v3077_v15 = vmul.f32 %v10022_v19, %v10022_v19  ;;  %v2993_v38 = vpop.f32.mrb[59].mxu1  ;;  %v3168_v8 = vrot.slane %v3145_v50, 3  ;;  %v3185_v10 = vmul.f32 %v9935_v60, %v3121_v51 }
 0x451   : > { %v3251_v29 = vrot.slane %v3232_v62, 3  ;;  %v3265_v16 = vmul.f32 %v9938_v61, %v3121_v51 }
 0x452   : > { %v3051_v27 = vrot.slane %v3050_v55, 4  ;;  %v3122_v28 = vadd.f32 %v3077_v15, %v3076_v52  ;;  %v3170_v31 = vsel %vm3169_vm15, %v3168_v8, %v3167_v44  ;;  %v3204_v32 = vrot.slane %v3185_v10, 3 }
 0x453   : > { %v3252_v39 = vsel %vm3169_vm15, %v3251_v29, %v3250_v48  ;;  %v3284_v45 = vrot.slane %v3265_v16, 3 }
 0x454   : > { %v3052_v40 = vadd.f32 %v3051_v27, %v3050_v55  ;;  %v3123_v33 = vrot.slane %v3122_v28, 4  ;;  %v3205_v35 = vsel %vm3169_vm15, %v3204_v32, %v3203_v23 }
 0x455   : > { %v3285_v42 = vsel %vm3169_vm15, %v3284_v45, %v3283_v37 }
 0x456   : > { %v3053_v47 = vrot.slane %v3052_v40, 2  ;;  %v3124_v49 = vadd.f32 %v3123_v33, %v3122_v28 }
 0x458   : > { %v3054_v22 = vadd.f32 %v3053_v47, %v3052_v40  ;;  %v3125_v26 = vrot.slane %v3124_v49, 2 }
 0x45a   : > { %v3055_v58 = vrot.slane %v3054_v22, 1  ;;  %v3126_v53 = vadd.f32 %v3125_v26, %v3124_v49 }
 0x45b   : > { %v10034_v54 = vpop.f32.mrb[60].mxu1 }
 0x45c   : > { %v2998_v57 = vpop.f32.mrb[61].mxu1  ;;  %v3056_v44 = vadd.f32 %v3055_v58, %v3054_v22  ;;  %v3127_v21 = vrot.slane %v3126_v53, 1  ;;  %v3078_v23 = vmul.f32 %v10034_v54, %v10034_v54 }
 0x45e   : > { %v3146_v48 = vmul.f32 %v9935_v60, %v3056_v44  ;;  %v3128_v63 = vadd.f32 %v3127_v21, %v3126_v53  ;;  %v3233_v41 = vmul.f32 %v9938_v61, %v3056_v44 }
 0x45f   : > { %v10040_v37 = vpop.f32.mrb[62].mxu1 }
 0x460   : > { %v3057_v25 = vadd.f32 %v10040_v37, %v10034_v54  ;;  %v3079_v7 = vmul.f32 %v10040_v37, %v10040_v37  ;;  %v3003_v52 = vpop.f32.mrb[63].mxu1  ;;  %v3171_v50 = vrot.slane %v3146_v48, 2  ;;  %v3186_v51 = vmul.f32 %v9935_v60, %v3128_v63 }
 0x461   : > { %v3253_v62 = vrot.slane %v3233_v41, 2  ;;  %v3266_v55 = vmul.f32 %v9938_v61, %v3128_v63  ;;  %v8359_v52 = vld [vmem:[%s11658_s4 + $0x54] ss:$8 sps:$4 sm:$0xff]  }
 0x462   : > { %v3058_v15 = vrot.slane %v3057_v25, 4  ;;  %v3129_v38 = vadd.f32 %v3079_v7, %v3078_v23  ;;  %v3173_v8 = vsel %vm3172_vm1, %v3171_v50, %v3170_v31  ;;  %v3206_v10 = vrot.slane %v3186_v51, 2  ;;  %v8357_v50 = vld [vmem:[%s11658_s4 + $0x50] ss:$8 sps:$4 sm:$0xff]   ;;  %4298 = vmatprep.subr.bf16.mxu1 %v8359_v52  ;;  %v8362_v51 = vld [vmem:[%s11658_s4 + $0x64] ss:$8 sps:$4 sm:$0xff]  }
 0x463   : > { %v3254_v29 = vsel %vm3172_vm1, %v3253_v62, %v3252_v39  ;;  %v3286_v16 = vrot.slane %v3266_v55, 2  ;;  %4299 = vmatpush1.bf16.msra.mxu1 %v8357_v50  ;;  %v8360_v62 = vld [vmem:[%s11658_s4 + $0x60] ss:$8 sps:$4 sm:$0xff]   ;;  %v8365_v55 = vld [vmem:[%s11658_s4 + $0x74] ss:$8 sps:$4 sm:$0xff]  }
 0x464   : > { %v3059_v27 = vadd.f32 %v3058_v15, %v3057_v25  ;;  %v3130_v28 = vrot.slane %v3129_v38, 4  ;;  %v3207_v32 = vsel %vm3172_vm1, %v3206_v10, %v3205_v35  ;;  %4300 = vmatprep.subr.bf16.mxu1 %v8362_v51  ;;  %v8363_v15 = vld [vmem:[%s11658_s4 + $0x70] ss:$8 sps:$4 sm:$0xff]   ;;  %v8371_v10 = vld [vmem:[%s11658_s4 + $0x94] ss:$8 sps:$4 sm:$0xff]  }
 0x465   : > { %v3287_v45 = vsel %vm3172_vm1, %v3286_v16, %v3285_v42  ;;  %v8374_v16 = vld [vmem:[%s11658_s4 + $0xa4] ss:$8 sps:$4 sm:$0xff]  }
 0x466   : > { %v3060_v40 = vrot.slane %v3059_v27, 2  ;;  %v3131_v33 = vadd.f32 %v3130_v28, %v3129_v38  ;;  %v8368_v38 = vld [vmem:[%s11658_s4 + $0x84] ss:$8 sps:$4 sm:$0xff]   ;;  %v8377_v28 = vld [vmem:[%s11658_s4 + $0xb4] ss:$8 sps:$4 sm:$0xff]  }
 0x467   : > { %4301 = vmatpush1.bf16.msra.mxu1 %v8360_v62 }
 0x468   : > { %v3061_v47 = vadd.f32 %v3060_v40, %v3059_v27  ;;  %v3132_v49 = vrot.slane %v3131_v33, 2  ;;  %4302 = vmatprep.subr.bf16.mxu1 %v8365_v55  ;;  %v8372_v27 = vld [vmem:[%s11658_s4 + $0xa0] ss:$8 sps:$4 sm:$0xff]  }
 0x469   : > { %v8378_v40 = vld [vmem:[%s11658_s4 + $0xc0] ss:$8 sps:$4 sm:$0xff]  }
 0x46a   : > { %v3062_v22 = vrot.slane %v3061_v47, 1  ;;  %v3133_v26 = vadd.f32 %v3132_v49, %v3131_v33  ;;  %v8383_v33 = vld [vmem:[%s11658_s4 + $0xd4] ss:$8 sps:$4 sm:$0xff]   ;;  %v8384_v49 = vld [vmem:[%s11658_s4 + $0xe0] ss:$8 sps:$4 sm:$0xff]  }
 0x46b   : > { %4303 = vmatpush1.bf16.msra.mxu1 %v8363_v15 }
 0x46c   : > { %v3063_v58 = vadd.f32 %v3062_v22, %v3061_v47  ;;  %v3134_v53 = vrot.slane %v3133_v26, 1  ;;  %4304 = vmatprep.subr.bf16.mxu1 %v8368_v38  ;;  %v8381_v47 = vld [vmem:[%s11658_s4 + $0xd0] ss:$8 sps:$4 sm:$0xff]   ;;  %v8386_v22 = vld [vmem:[%s11658_s4 + $0xe4] ss:$8 sps:$4 sm:$0xff]  }
 0x46e   : > { %v3147_v31 = vmul.f32 %v9935_v60, %v3063_v58  ;;  %v3135_v57 = vadd.f32 %v3134_v53, %v3133_v26  ;;  %v3234_v39 = vmul.f32 %v9938_v61, %v3063_v58  ;;  %v8389_v26 = vld [vmem:[%s11658_s4 + $0xf4] ss:$8 sps:$4 sm:$0xff]   ;;  %v8387_v58 = vld [vmem:[%s11658_s4 + $0xf0] ss:$8 sps:$4 sm:$0xff]   ;;  %v8392_v53 = vld [vmem:[%s11658_s4 + $0x104] ss:$8 sps:$4 sm:$0xff]  }
 0x470   : > { %v3174_v44 = vrot.slane %v3147_v31, 1  ;;  %v3187_v21 = vmul.f32 %v9935_v60, %v3135_v57  ;;  %v3255_v35 = vrot.slane %v3234_v39, 1  ;;  %v3267_v42 = vmul.f32 %v9938_v61, %v3135_v57 }
 0x471   : > { %v8807_v31 = vmov 1966171168  }
 0x472   : > { %v3176_v48 = vsel %vm3175_vm10, %v3174_v44, %v3173_v8  ;;  %v3208_v63 = vrot.slane %v3187_v21, 1  ;;  %v3256_v41 = vsel %vm3175_vm10, %v3255_v35, %v3254_v29  ;;  %v3288_v23 = vrot.slane %v3267_v42, 1  ;;  %v8366_v8 = vld [vmem:[%s11658_s4 + $0x80] ss:$8 sps:$4 sm:$0xff]   ;;  %v8369_v29 = vld [vmem:[%s11658_s4 + $0x90] ss:$8 sps:$4 sm:$0xff]  }
 0x473   : > { %3178 = vadd.xlane.f32.xlu0 %v3176_v48  ;;  %4305 = vmatpush1.bf16.msra.mxu1 %v8366_v8  ;;  %v3306_v57 = vunpack.c.l.s4 %v8807_v31 }
 0x474   : > { %v3209_v25 = vsel %vm3175_vm10, %v3208_v63, %v3207_v32  ;;  %v3289_v7 = vsel %vm3175_vm10, %v3288_v23, %v3287_v45  ;;  %4306 = vmatprep.subr.bf16.mxu1 %v8371_v10  ;;  %v8375_v32 = vld [vmem:[%s11658_s4 + $0xb0] ss:$8 sps:$4 sm:$0xff]   ;;  %v8380_v45 = vld [vmem:[%s11658_s4 + $0xc4] ss:$8 sps:$4 sm:$0xff]  }
 0x475   : > { %3211 = vadd.xlane.f32.xlu1 %v3209_v25  ;;  %v3307_v35 = vunpack.c.0.s8 %v3306_v57 }
 0x477   : > { %3258 = vadd.xlane.f32.xlu0 %v3256_v41  ;;  %4307 = vmatpush1.bf16.msra.mxu1 %v8369_v29 }
 0x478   : > { %4308 = vmatprep.subr.bf16.mxu1 %v8374_v16 }
 0x479   : > { %3291 = vadd.xlane.f32.xlu1 %v3289_v7  ;;  %v10131_v7 = vsub.s32 %v3307_v35, %v9631_v4 }
 0x47b   : > { %4309 = vmatpush1.bf16.msra.mxu1 %v8372_v27 }
 0x47c   : > { %4310 = vmatprep.subr.bf16.mxu1 %v8377_v28 }
 0x47f   : > { %4311 = vmatpush1.bf16.msra.mxu1 %v8375_v32 }
 0x480   : > { %4312 = vmatprep.subr.bf16.mxu1 %v8380_v45 }
 0x483   : > { %4313 = vmatpush1.bf16.msra.mxu1 %v8378_v40 }
 0x484   : > { %4314 = vmatprep.subr.bf16.mxu1 %v8383_v33 }
 0x487   : > { %4315 = vmatpush1.bf16.msra.mxu1 %v8381_v47 }
 0x488   : > { %4316 = vmatprep.subr.bf16.mxu1 %v8386_v22 }
 0x48b   : > { %4317 = vmatpush1.bf16.msra.mxu1 %v8384_v49 }
 0x48c   : > { %4318 = vmatprep.subr.bf16.mxu1 %v8389_v26 }
 0x48f   : > { %4319 = vmatpush1.bf16.msra.mxu1 %v8387_v58 }
 0x490   : > { %4401 = vmatprep.subr.bf16.mxu1 %v8392_v53 }
 0x500   : > { %v3179_v39 = vpop.xlane.xlu0 %3178 }
 0x501   : > { %v3213_v44 = vmul.f32 0.0017006802, %v3179_v39 }
 0x502   : > { %v3212_v21 = vpop.xlane.xlu1 %3211 }
 0x503   : > { %v3215_v42 = vmul.f32 %v3213_v44, %v3213_v44  ;;  %v3214_v48 = vmul.f32 0.0017006802, %v3212_v21  ;;  %v3219_v25 = vmul.f32 %v3213_v44, %v9935_v60 }
 0x504   : > { %v3259_v63 = vpop.xlane.xlu0 %3258 }
 0x505   : > { %v3216_v41 = vsub.f32 %v3214_v48, %v3215_v42  ;;  %v3293_v23 = vmul.f32 0.0017006802, %v3259_v63 }
 0x506   : > { %v3292_v52 = vpop.xlane.xlu1 %3291 }
 0x507   : > { %v3217_v50 = vadd.f32 1e-05, %v3216_v41  ;;  %v3295_v51 = vmul.f32 %v3293_v23, %v3293_v23  ;;  %v3299_v62 = vmul.f32 %v3293_v23, %v9938_v61  ;;  %v3294_v55 = vmul.f32 0.0017006802, %v3292_v52 }
 0x509   : > { %v3300_v15 = vadd.f32 %v3299_v62, %v3219_v25  ;;  %v3296_v38 = vsub.f32 %v3294_v55, %v3295_v51  ;;  %8644 = vrsqrt.f32 %v3217_v50 }
 0x50b   : > { %v3304_v8 = vcombine.high %v3300_v15, %v3300_v15  ;;  %v3311_v10 = vrot.slane %v3300_v15, %v10131_v7  ;;  %v3297_v29 = vadd.f32 1e-05, %v3296_v38 }
 0x50d   : > { %v3318_v16 = vrot.slane %v3304_v8, %v10131_v7  ;;  %v3319_v27 = vcombine.high %v3311_v10, %v3311_v10  ;;  %8646 = vrsqrt.f32 %v3297_v29  ;;  %v3327_v28 = vrot.slane %v3311_v10, %v10131_v7 }
 0x50f   : > { %v3320_v32 = vcombine.high %v3318_v16, %v3318_v16  ;;  %v3341_v45 = vrot.slane %v3319_v27, %v10131_v7  ;;  %v3334_v40 = vrot.slane %v3318_v16, %v10131_v7  ;;  %v3349_v33 = vcombine.high %v3327_v28, %v3327_v28 }
 0x510   : > { %v3356_v26 = vrot.slane %v3327_v28, %v9634_v5 }
 0x511   : > { %v3348_v49 = vrot.slane %v3320_v32, %v10131_v7  ;;  %v3351_v22 = vcombine.high %v3341_v45, %v3341_v45  ;;  %v3350_v53 = vcombine.high %v3334_v40, %v3334_v40  ;;  %v3360_v31 = vrot.slane %v3341_v45, %v9634_v5 }
 0x512   : > { %v3364_v39 = vrot.slane %v3349_v33, %v9634_v5  ;;  %v10147_v42 = vrot.slane %v3334_v40, %v9634_v5  ;;  %v3393_v48 = vsub.f32 %v9881_v3, %v3356_v26 }
 0x513   : > { %v8645_v47 = vpop.eup %8644  ;;  %v3352_v21 = vcombine.high %v3348_v49, %v3348_v49  ;;  %v3368_v35 = vrot.slane %v3351_v22, %v9634_v5  ;;  %v10151_v41 = vrot.slane %v3348_v49, %v9634_v5  ;;  %v10154_v23 = vrot.slane %v3350_v53, %v9634_v5 }
 0x514   : > { %v3221_v57 = vmul.f32 %v8645_v47, %v9935_v60  ;;  %v3394_v60 = vsub.f32 %v9885_v13, %v3356_v26  ;;  %v3395_v25 = vsub.f32 %v9900_v11, %v3360_v31  ;;  %v3397_v52 = vsub.f32 %v9940_v20, %v3364_v39 }
 0x515   : > { %v10162_v3 = vrot.slane %v3352_v21, %v9634_v5  ;;  %v3398_v62 = vsub.f32 %v9950_v0, %v3364_v39  ;;  %v3399_v55 = vsub.f32 %v9962_v56, %v3368_v35  ;;  %v3400_v15 = vsub.f32 %v9968_v59, %v3368_v35 }
 0x516   : > { %v3401_v13 = vsub.f32 %v9980_v36, %v10147_v42  ;;  %v3402_v38 = vsub.f32 %v9986_v18, %v10147_v42  ;;  %v3403_v8 = vsub.f32 %v9998_v12, %v10151_v41  ;;  %v3404_v0 = vsub.f32 %v10003_v9, %v10151_v41  ;;  %v8398_v9 = vld [vmem:[%s11658_s4 + $0x124] ss:$8 sps:$4 sm:$0xff]  }
 0x517   : > { %v8647_v58 = vpop.eup %8646  ;;  %v3405_v56 = vsub.f32 %v10016_v1, %v10154_v23  ;;  %v3406_v16 = vsub.f32 %v10022_v19, %v10154_v23  ;;  %v3407_v18 = vsub.f32 %v10034_v54, %v10162_v3  ;;  %v3408_v12 = vsub.f32 %v10040_v37, %v10162_v3  ;;  %v10191_v1 = vld [vmem:[%s11666_s12 + $0x1] ss:$0 sm:$0xff]  ;;  %v8399_v54 = vld [vmem:[%s11658_s4 + $0x130] ss:$8 sps:$4 sm:$0xff]  }
 0x518   : > { %v3301_v44 = vmul.f32 %v8647_v58, %v9938_v61  ;;  %v3396_v61 = vsub.f32 %v9910_v34, %v3360_v31 }
 0x51a   : > { %v3302_v63 = vadd.f32 %v3301_v44, %v3221_v57  ;;  %v10210_v57 = vld [vmem:[%s11666_s12 + $0x2] ss:$0 sm:$0xff] }
 0x51c   : > { %v3410_v50 = vcombine.high %v3302_v63, %v3302_v63  ;;  %v3417_v51 = vrot.slane %v3302_v63, %v10131_v7 }
 0x51e   : > { %v3424_v11 = vrot.slane %v3410_v50, %v10131_v7  ;;  %v3425_v34 = vcombine.high %v3417_v51, %v3417_v51  ;;  %v3433_v20 = vrot.slane %v3417_v51, %v10131_v7 }
 0x520   : > { %v3426_v59 = vcombine.high %v3424_v11, %v3424_v11  ;;  %v3440_v36 = vrot.slane %v3424_v11, %v10131_v7  ;;  %v3447_v10 = vrot.slane %v3425_v34, %v10131_v7  ;;  %v3455_v29 = vcombine.high %v3433_v20, %v3433_v20 }
 0x521   : > { %v3462_v27 = vrot.slane %v3433_v20, %v9634_v5 }
 0x522   : > { %v10194_v28 = vrot.slane %v3426_v59, %v10131_v7  ;;  %v3456_v32 = vcombine.high %v3440_v36, %v3440_v36  ;;  %v3457_v45 = vcombine.high %v3447_v10, %v3447_v10  ;;  %v3466_v40 = vrot.slane %v3447_v10, %v9634_v5 }
 0x523   : > { %v3470_v33 = vrot.slane %v3455_v29, %v9634_v5  ;;  %v3478_v47 = vrot.slane %v3440_v36, %v9634_v5  ;;  %v3499_v49 = vmul.f32 %v3462_v27, %v3393_v48  ;;  %v3500_v22 = vmul.f32 %v3462_v27, %v3394_v60 }
 0x524   : > { %v3458_v26 = vcombine.high %v10194_v28, %v10194_v28  ;;  %v3474_v58 = vrot.slane %v3457_v45, %v9634_v5  ;;  %v3482_v53 = vrot.slane %v10194_v28, %v9634_v5  ;;  %v10205_v31 = vrot.slane %v3456_v32, %v9634_v5 }
 0x525   : > { %v3501_v39 = vmul.f32 %v3466_v40, %v3395_v25  ;;  %v3503_v44 = vmul.f32 %v3470_v33, %v3397_v52  ;;  %v3507_v21 = vmul.f32 %v3478_v47, %v3401_v13  ;;  %v3515_v35 = vmul.f32 %v3499_v49, %v10191_v1 }
 0x526   : > { %v3505_v42 = vmul.f32 %v3474_v58, %v3399_v55  ;;  %v3509_v48 = vmul.f32 %v3482_v53, %v3403_v8  ;;  %v3511_v63 = vmul.f32 %v10205_v31, %v3405_v56  ;;  %v3516_v60 = vmul.f32 %v3500_v22, %v10191_v1 }
 0x527   : > { %v10216_v50 = vadd.f32 %v3515_v35, %v10210_v57  ;;  %v3502_v51 = vmul.f32 %v3466_v40, %v3396_v61  ;;  %v3517_v11 = vmul.f32 %v3501_v39, %v10191_v1  ;;  %v3504_v34 = vmul.f32 %v3470_v33, %v3398_v62 }
 0x528   : > { %v10220_v20 = vadd.f32 %v3516_v60, %v10210_v57  ;;  %v3519_v25 = vmul.f32 %v3503_v44, %v10191_v1  ;;  %v3506_v52 = vmul.f32 %v3474_v58, %v3400_v15  ;;  %v3521_v55 = vmul.f32 %v3505_v42, %v10191_v1  ;;  %v8390_v58 = vld [vmem:[%s11658_s4 + $0x100] ss:$8 sps:$4 sm:$0xff]   ;;  %v8395_v42 = vld [vmem:[%s11658_s4 + $0x114] ss:$8 sps:$4 sm:$0xff]  }
 0x529   : > { %v3565_v13 = vrot.slane %v10216_v50, 1  ;;  %v3518_v8 = vmul.f32 %v3502_v51, %v10191_v1  ;;  %v10227_v56 = vadd.f32 %v3517_v11, %v10210_v57  ;;  %v3520_v61 = vmul.f32 %v3504_v34, %v10191_v1 }
 0x52a   : > { %v3566_v59 = vrot.slane %v10220_v20, 1  ;;  %v3757_v62 = vpack.c.bf16 %v10220_v20, %v10216_v50  ;;  %v10234_v36 = vadd.f32 %v3519_v25, %v10210_v57  ;;  %v3522_v15 = vmul.f32 %v3506_v52, %v10191_v1 }
 0x52b   : > { %v10238_v10 = vadd.f32 %v3518_v8, %v10210_v57  ;;  %v3568_v29 = vrot.slane %v10227_v56, 1  ;;  %v10242_v27 = vadd.f32 %v3520_v61, %v10210_v57  ;;  %v10245_v32 = vadd.f32 %v3521_v55, %v10210_v57 }
 0x52c   : > { %v3567_v45 = vsel %vm507_vm0, %v3565_v13, %v3566_v59  ;;  %v3571_v40 = vrot.slane %v10234_v36, 1  ;;  %v10250_v33 = vadd.f32 %v3522_v15, %v10210_v57  ;;  %v3508_v49 = vmul.f32 %v3478_v47, %v3402_v38 }
 0x52d   : > { %v7437_v22 = vpack.c.bf16 %v3566_v59, %v3567_v45  ;;  %v3569_v39 = vrot.slane %v10238_v10, 1  ;;  %v3762_v44 = vpack.c.bf16 %v10238_v10, %v10227_v56  ;;  %v3572_v35 = vrot.slane %v10242_v27, 1  ;;  %v8393_v59 = vld [vmem:[%s11658_s4 + $0x110] ss:$8 sps:$4 sm:$0xff]  }
 0x52e   : > { %v3767_v60 = vpack.c.bf16 %v10242_v27, %v10234_v36  ;;  %v3574_v38 = vrot.slane %v10245_v32, 1  ;;  %v3575_v47 = vrot.slane %v10250_v33, 1  ;;  %v3772_v51 = vpack.c.bf16 %v10250_v33, %v10245_v32 }
 0x52f   : > { %7438 = vmatprep.mubr.msk.bf16.mxu1 %vm9050_vm2, %v7437_v22  ;;  %v3570_v11 = vsel %vm507_vm0, %v3568_v29, %v3569_v39  ;;  %v3573_v34 = vsel %vm507_vm0, %v3571_v40, %v3572_v35  ;;  %v3523_v25 = vmul.f32 %v3507_v21, %v10191_v1  ;;  %v3524_v52 = vmul.f32 %v3508_v49, %v10191_v1 }
 0x530   : > { %4321 = vmatmul.mubr.bf16.vlgmr.msra.gmra.mrb[64].mxu1 %v3757_v62  ;;  %v7440_v55 = vpack.c.bf16 %v3569_v39, %v3570_v11  ;;  %v7443_v13 = vpack.c.bf16 %v3572_v35, %v3573_v34  ;;  %v3576_v8 = vsel %vm507_vm0, %v3574_v38, %v3575_v47  ;;  %v3510_v61 = vmul.f32 %v3482_v53, %v3404_v0  ;;  %v8401_v38 = vld [vmem:[%s11658_s4 + $0x134] ss:$8 sps:$4 sm:$0xff]  }
 0x531   : > { %4402 = vmatpush1.bf16.msra.mxu1 %v8390_v58  ;;  %v10281_v15 = vpack.c.bf16 %v3575_v47, %v3576_v8  ;;  %v10284_v21 = vadd.f32 %v3523_v25, %v10210_v57  ;;  %v10287_v62 = vadd.f32 %v3524_v52, %v10210_v57  ;;  %v3525_v29 = vmul.f32 %v3509_v48, %v10191_v1 }
 0x532   : > { %7441 = vmatprep.mubr.msk.bf16.mxu1 %vm9050_vm2, %v7440_v55  ;;  %4403 = vmatprep.subr.bf16.mxu1 %v8395_v42  ;;  %v3526_v41 = vmul.f32 %v3510_v61, %v10191_v1  ;;  %v3512_v0 = vmul.f32 %v10205_v31, %v3406_v16  ;;  %v3527_v53 = vmul.f32 %v3511_v63, %v10191_v1  ;;  %v3661_v45 = vrot.slane %v10216_v50, 3  ;;  %v8396_v31 = vld [vmem:[%s11658_s4 + $0x120] ss:$8 sps:$4 sm:$0xff]  }
 0x533   : > { %v3577_v48 = vrot.slane %v10284_v21, 1  ;;  %v3578_v40 = vrot.slane %v10287_v62, 1  ;;  %v3777_v49 = vpack.c.bf16 %v10287_v62, %v10284_v21  ;;  %v10307_v22 = vadd.f32 %v3525_v29, %v10210_v57 }
 0x534   : > { %v10310_v58 = vadd.f32 %v3526_v41, %v10210_v57  ;;  %v3528_v19 = vmul.f32 %v3512_v0, %v10191_v1  ;;  %v10314_v23 = vadd.f32 %v3527_v53, %v10210_v57  ;;  %v3490_v16 = vrot.slane %v3458_v26, %v9634_v5 }
 0x535   : > { %4404 = vmatpush1.bf16.msra.mxu1 %v8393_v59  ;;  %v3579_v63 = vsel %vm507_vm0, %v3577_v48, %v3578_v40  ;;  %v3580_v39 = vrot.slane %v10307_v22, 1  ;;  %v3662_v35 = vrot.slane %v10220_v20, 3  ;;  %v3613_v42 = vrot.slane %v10216_v50, 2 }
 0x536   : > { %4405 = vmatprep.subr.bf16.mxu1 %v8398_v9  ;;  %v10330_v28 = vpack.c.bf16 %v3578_v40, %v3579_v63  ;;  %v3581_v26 = vrot.slane %v10310_v58, 1  ;;  %v3782_v47 = vpack.c.bf16 %v10310_v58, %v10307_v22  ;;  %v10336_v11 = vadd.f32 %v3528_v19, %v10210_v57  ;;  %v8402_v63 = vld [vmem:[%s11658_s4 + $0x140] ss:$8 sps:$4 sm:$0xff]  }
 0x537   : > { %v3583_v34 = vrot.slane %v10314_v23, 1  ;;  %v3513_v25 = vmul.f32 %v3490_v16, %v3407_v18  ;;  %v3514_v52 = vmul.f32 %v3490_v16, %v3408_v12  ;;  %v3663_v55 = vsel %vm701_vm3, %v3661_v45, %v3662_v35 }
 0x538   : > { %4331 = vmatmul.mubr.bf16.gmra.mrb[68].mxu1 %v3762_v44  ;;  %v3582_v8 = vsel %vm507_vm0, %v3580_v39, %v3581_v26  ;;  %v3584_v61 = vrot.slane %v10336_v11, 1  ;;  %v3787_v59 = vpack.c.bf16 %v10336_v11, %v10314_v23  ;;  %v10350_v29 = vpack.c.bf16 %v3662_v35, %v3663_v55  ;;  %v8404_v44 = vld [vmem:[%s11658_s4 + $0x144] ss:$8 sps:$4 sm:$0xff]  }
 0x539   : > { %7444 = vmatprep.mubr.msk.bf16.mxu1 %vm9050_vm2, %v7443_v13  ;;  %4406 = vmatpush1.bf16.msra.mxu1 %v8396_v31  ;;  %v10357_v37 = vpack.c.bf16 %v3581_v26, %v3582_v8  ;;  %v3529_v3 = vmul.f32 %v3513_v25, %v10191_v1  ;;  %v3530_v18 = vmul.f32 %v3514_v52, %v10191_v1  ;;  %v3614_v12 = vrot.slane %v10220_v20, 2 }
 0x53a   : > { %4407 = vmatprep.subr.bf16.mxu1 %v8401_v38  ;;  %v3585_v13 = vsel %vm507_vm0, %v3583_v34, %v3584_v61  ;;  %v3664_v9 = vrot.slane %v10227_v56, 3  ;;  %v3665_v41 = vrot.slane %v10238_v10, 3  ;;  %v3616_v0 = vrot.slane %v10227_v56, 2  ;;  %v8407_v38 = vld [vmem:[%s11658_s4 + $0x154] ss:$8 sps:$4 sm:$0xff]  }
 0x53b   : > { %v10369_v53 = vpack.c.bf16 %v3584_v61, %v3585_v13  ;;  %v10372_v45 = vadd.f32 %v3529_v3, %v10210_v57  ;;  %v10375_v1 = vadd.f32 %v3530_v18, %v10210_v57  ;;  %v3615_v48 = vsel %vm604_vm4, %v3613_v42, %v3614_v12  ;;  %v8405_v13 = vld [vmem:[%s11658_s4 + $0x150] ss:$8 sps:$4 sm:$0xff]  }
 0x53c   : > { %v10378_v40 = vpack.c.bf16 %v3614_v12, %v3615_v48  ;;  %v3666_v19 = vsel %vm701_vm3, %v3664_v9, %v3665_v41  ;;  %v3617_v16 = vrot.slane %v10238_v10, 2  ;;  %v3667_v31 = vrot.slane %v10234_v36, 3  ;;  %v8410_v48 = vld [vmem:[%s11658_s4 + $0x164] ss:$8 sps:$4 sm:$0xff]  }
 0x53d   : > { %4408 = vmatpush1.bf16.msra.mxu1 %v8399_v54  ;;  %v3586_v39 = vrot.slane %v10372_v45, 1  ;;  %v3587_v57 = vrot.slane %v10375_v1, 1  ;;  %v3792_v35 = vpack.c.bf16 %v10375_v1, %v10372_v45  ;;  %v10390_v42 = vpack.c.bf16 %v3665_v41, %v3666_v19 }
 0x53e   : > { %4409 = vmatprep.subr.bf16.mxu1 %v8404_v44  ;;  %v3618_v26 = vsel %vm604_vm4, %v3616_v0, %v3617_v16  ;;  %v3668_v34 = vrot.slane %v10242_v27, 3  ;;  %v3619_v25 = vrot.slane %v10234_v36, 2  ;;  %v3620_v52 = vrot.slane %v10242_v27, 2 }
 0x53f   : > { %v3588_v55 = vsel %vm507_vm0, %v3586_v39, %v3587_v57  ;;  %v10400_v8 = vpack.c.bf16 %v3617_v16, %v3618_v26  ;;  %v3670_v61 = vrot.slane %v10245_v32, 3  ;;  %v3671_v54 = vrot.slane %v10250_v33, 3 }
 0x540   : > { %4341 = vmatmul.mubr.bf16.gmra.mrb[72].mxu1 %v3767_v60  ;;  %v10407_v3 = vpack.c.bf16 %v3587_v57, %v3588_v55  ;;  %v3669_v18 = vsel %vm701_vm3, %v3667_v31, %v3668_v34  ;;  %v3621_v12 = vsel %vm604_vm4, %v3619_v25, %v3620_v52  ;;  %v3622_v44 = vrot.slane %v10245_v32, 2  ;;  %v8408_v55 = vld [vmem:[%s11658_s4 + $0x160] ss:$8 sps:$4 sm:$0xff]  }
 0x541   : > { %7447 = vmatprep.mubr.msk.bf16.mxu1 %vm9050_vm2, %v10281_v15  ;;  %4410 = vmatpush1.bf16.msra.mxu1 %v8402_v63  ;;  %v10418_v9 = vpack.c.bf16 %v3668_v34, %v3669_v18  ;;  %v10420_v60 = vpack.c.bf16 %v3620_v52, %v3621_v12  ;;  %v3672_v41 = vsel %vm701_vm3, %v3670_v61, %v3671_v54  ;;  %v3623_v0 = vrot.slane %v10250_v33, 2 }
 0x542   : > { %4411 = vmatprep.subr.bf16.mxu1 %v8407_v38  ;;  %v10427_v19 = vpack.c.bf16 %v3671_v54, %v3672_v41  ;;  %v3673_v15 = vrot.slane %v10284_v21, 3  ;;  %v3674_v16 = vrot.slane %v10287_v62, 3  ;;  %v3625_v31 = vrot.slane %v10284_v21, 2 }
 0x543   : > { %v3624_v63 = vsel %vm604_vm4, %v3622_v44, %v3623_v0  ;;  %v3626_v39 = vrot.slane %v10287_v62, 2  ;;  %v3676_v57 = vrot.slane %v10307_v22, 3  ;;  %v3677_v38 = vrot.slane %v10310_v58, 3  ;;  %v8413_v44 = vld [vmem:[%s11658_s4 + $0x174] ss:$8 sps:$4 sm:$0xff]  }
 0x544   : > { %v10436_v26 = vpack.c.bf16 %v3623_v0, %v3624_v63  ;;  %v3675_v34 = vsel %vm701_vm3, %v3673_v15, %v3674_v16  ;;  %v3628_v25 = vrot.slane %v10307_v22, 2  ;;  %v3629_v52 = vrot.slane %v10310_v58, 2 }
 0x545   : > { %4412 = vmatpush1.bf16.msra.mxu1 %v8405_v13  ;;  %v10444_v61 = vpack.c.bf16 %v3674_v16, %v3675_v34  ;;  %v3627_v54 = vsel %vm604_vm4, %v3625_v31, %v3626_v39  ;;  %v3678_v18 = vsel %vm701_vm3, %v3676_v57, %v3677_v38  ;;  %v3679_v12 = vrot.slane %v10314_v23, 3 }
 0x546   : > { %4413 = vmatprep.subr.bf16.mxu1 %v8410_v48  ;;  %v10452_v41 = vpack.c.bf16 %v3626_v39, %v3627_v54  ;;  %v10454_v13 = vpack.c.bf16 %v3677_v38, %v3678_v18  ;;  %v3630_v0 = vsel %vm604_vm4, %v3628_v25, %v3629_v52  ;;  %v3680_v15 = vrot.slane %v10336_v11, 3  ;;  %v8411_v25 = vld [vmem:[%s11658_s4 + $0x170] ss:$8 sps:$4 sm:$0xff]  }
 0x547   : > { %v10458_v16 = vpack.c.bf16 %v3629_v52, %v3630_v0  ;;  %v3631_v31 = vrot.slane %v10314_v23, 2  ;;  %v3632_v63 = vrot.slane %v10336_v11, 2  ;;  %v3682_v48 = vrot.slane %v10372_v45, 3 }
 0x548   : > { %4351 = vmatmul.mubr.bf16.gmra.mrb[76].mxu1 %v3772_v51  ;;  %v3681_v39 = vsel %vm701_vm3, %v3679_v12, %v3680_v15  ;;  %v3683_v57 = vrot.slane %v10375_v1, 3  ;;  %v3634_v38 = vrot.slane %v10372_v45, 2  ;;  %v3635_v34 = vrot.slane %v10375_v1, 2  ;;  %v8416_v12 = vld [vmem:[%s11658_s4 + $0x184] ss:$8 sps:$4 sm:$0xff]  }
 0x549   : > { %7450 = vmatprep.mubr.msk.bf16.mxu1 %vm9050_vm2, %v10330_v28  ;;  %4414 = vmatpush1.bf16.msra.mxu1 %v8408_v55  ;;  %v10476_v52 = vpack.c.bf16 %v3680_v15, %v3681_v39  ;;  %v3633_v51 = vsel %vm604_vm4, %v3631_v31, %v3632_v63  ;;  %v3709_v54 = vrot.slane %v10216_v50, 4  ;;  %v3710_v18 = vrot.slane %v10220_v20, 4 }
 0x54a   : > { %4415 = vmatprep.subr.bf16.mxu1 %v8413_v44  ;;  %v10484_v0 = vpack.c.bf16 %v3632_v63, %v3633_v51  ;;  %v3684_v28 = vsel %vm701_vm3, %v3682_v48, %v3683_v57  ;;  %v3636_v55 = vsel %vm604_vm4, %v3634_v38, %v3635_v34  ;;  %v3712_v15 = vrot.slane %v10227_v56, 4  ;;  %v8414_v56 = vld [vmem:[%s11658_s4 + $0x180] ss:$8 sps:$4 sm:$0xff]  }
 0x54b   : > { %v10489_v39 = vpack.c.bf16 %v3683_v57, %v3684_v28  ;;  %v10491_v31 = vpack.c.bf16 %v3635_v34, %v3636_v55  ;;  %v3711_v50 = vsel %vm798_vm7, %v3709_v54, %v3710_v18  ;;  %v3713_v20 = vrot.slane %v10238_v10, 4 }
 0x54c   : > { %v10495_v44 = vpack.c.bf16 %v3710_v18, %v3711_v50  ;;  %v3715_v2 = vrot.slane %v10234_v36, 4  ;;  %v3716_v63 = vrot.slane %v10242_v27, 4  ;;  %v3718_v48 = vrot.slane %v10245_v32, 4  ;;  %v8419_v36 = vld [vmem:[%s11658_s4 + $0x194] ss:$8 sps:$4 sm:$0xff]  }
 0x54d   : > { %4416 = vmatpush1.bf16.msra.mxu1 %v8411_v25  ;;  %v3714_v57 = vsel %vm798_vm7, %v3712_v15, %v3713_v20  ;;  %v3719_v38 = vrot.slane %v10250_v33, 4  ;;  %v3721_v34 = vrot.slane %v10284_v21, 4  ;;  %v3722_v10 = vrot.slane %v10287_v62, 4  ;;  %v8417_v50 = vld [vmem:[%s11658_s4 + $0x190] ss:$8 sps:$4 sm:$0xff]  }
 0x54e   : > { %4417 = vmatprep.subr.bf16.mxu1 %v8416_v12  ;;  %v10510_v27 = vpack.c.bf16 %v3713_v20, %v3714_v57  ;;  %v3717_v32 = vsel %vm798_vm7, %v3715_v2, %v3716_v63  ;;  %v3724_v25 = vrot.slane %v10307_v22, 4  ;;  %v3725_v51 = vrot.slane %v10310_v58, 4  ;;  %v8420_v57 = vld [vmem:[%s11658_s4 + $0x1a0] ss:$8 sps:$4 sm:$0xff]   ;;  %v8431_v58 = vld [vmem:[%s11658_s4 + $0x1d4] ss:$8 sps:$4 sm:$0xff]  }
 0x54f   : > { %v10515_v54 = vpack.c.bf16 %v3716_v63, %v3717_v32  ;;  %v3720_v33 = vsel %vm798_vm7, %v3718_v48, %v3719_v38  ;;  %v3723_v18 = vsel %vm798_vm7, %v3721_v34, %v3722_v10  ;;  %v3727_v12 = vrot.slane %v10314_v23, 4  ;;  %v8423_v34 = vld [vmem:[%s11658_s4 + $0x1b0] ss:$8 sps:$4 sm:$0xff]   ;;  %v8426_v22 = vld [vmem:[%s11658_s4 + $0x1c0] ss:$8 sps:$4 sm:$0xff]  }
 0x550   : > { %4361 = vmatmul.mubr.bf16.gmra.mrb[80].mxu1 %v3777_v49  ;;  %v10523_v28 = vpack.c.bf16 %v3719_v38, %v3720_v33  ;;  %v10525_v55 = vpack.c.bf16 %v3722_v10, %v3723_v18  ;;  %v3726_v2 = vsel %vm798_vm7, %v3724_v25, %v3725_v51  ;;  %v3728_v15 = vrot.slane %v10336_v11, 4  ;;  %v8422_v49 = vld [vmem:[%s11658_s4 + $0x1a4] ss:$8 sps:$4 sm:$0xff]   ;;  %v8425_v38 = vld [vmem:[%s11658_s4 + $0x1b4] ss:$8 sps:$4 sm:$0xff]  }
 0x551   : > { %7453 = vmatprep.mubr.msk.bf16.mxu1 %vm9050_vm2, %v10357_v37  ;;  %4418 = vmatpush1.bf16.msra.mxu1 %v8414_v56  ;;  %v10535_v20 = vpack.c.bf16 %v3725_v51, %v3726_v2  ;;  %v3730_v21 = vrot.slane %v10372_v45, 4  ;;  %v3731_v62 = vrot.slane %v10375_v1, 4  ;;  %v8428_v10 = vld [vmem:[%s11658_s4 + $0x1c4] ss:$8 sps:$4 sm:$0xff]   ;;  %v8432_v23 = vld [vmem:[%s11658_s4 + $0x1e0] ss:$8 sps:$4 sm:$0xff]  }
 0x552   : > { %4419 = vmatprep.subr.bf16.mxu1 %v8419_v36  ;;  %v3729_v63 = vsel %vm798_vm7, %v3727_v12, %v3728_v15  ;;  %v8435_v11 = vld [vmem:[%s11658_s4 + $0x1f0] ss:$8 sps:$4 sm:$0xff]   ;;  %v8438_v45 = vld [vmem:[%s11658_s4 + $0x200] ss:$8 sps:$4 sm:$0xff]   ;;  %v8443_v1 = vld [vmem:[%s11658_s4 + $0x214] ss:$8 sps:$4 sm:$0xff]  }
 0x553   : > { %v10543_v48 = vpack.c.bf16 %v3728_v15, %v3729_v63  ;;  %v3732_v37 = vsel %vm798_vm7, %v3730_v21, %v3731_v62  ;;  %v8452_v36 = vld [vmem:[%s11658_s4 + $0x244] ss:$8 sps:$4 sm:$0xff]   ;;  %v8450_v32 = vld [vmem:[%s11658_s4 + $0x240] ss:$8 sps:$4 sm:$0xff]   ;;  %vm4667_vm0 = vcmask 130048   ;;  %vm6164_vm3 = vcmp.eq.s32.totalorder %v9631_v4, 2 }
 0x554   : > { %v10546_v56 = vpack.c.bf16 %v3731_v62, %v3732_v37  ;;  %v8458_v25 = vld [vmem:[%s11658_s4 + $0x264] ss:$8 sps:$4 sm:$0xff]   ;;  %v8456_v51 = vld [vmem:[%s11658_s4 + $0x260] ss:$8 sps:$4 sm:$0xff]   ;;  %vm6278_vm4 = vcmp.eq.s32.totalorder %v9631_v4, 4 }
 0x555   : > { %4420 = vmatpush1.bf16.msra.mxu1 %v8417_v50 }
 0x556   : > { %4421 = vmatprep.subr.bf16.mxu1 %v8422_v49 }
 0x558   : > { %4371 = vmatmul.mubr.bf16.gmra.mrb[84].mxu1 %v3782_v47  ;;  %v8429_v47 = vld [vmem:[%s11658_s4 + $0x1d0] ss:$8 sps:$4 sm:$0xff]  }
 0x559   : > { %7456 = vmatprep.mubr.msk.bf16.mxu1 %vm9050_vm2, %v10369_v53  ;;  %4422 = vmatpush1.bf16.msra.mxu1 %v8420_v57  ;;  %v8434_v53 = vld [vmem:[%s11658_s4 + $0x1e4] ss:$8 sps:$4 sm:$0xff]  }
 0x55a   : > { %4423 = vmatprep.subr.bf16.mxu1 %v8425_v38  ;;  %v4659_v38 = vld [vmem:[%s11660_s6] sm:$0xff] }
 0x55d   : > { %4424 = vmatpush1.bf16.msra.mxu1 %v8423_v34 }
 0x55e   : > { %4425 = vmatprep.subr.bf16.mxu1 %v8428_v10 }
 0x560   : > { %4381 = vmatmul.mubr.bf16.gmra.mrb[88].mxu1 %v3787_v59  ;;  %v8440_v59 = vld [vmem:[%s11658_s4 + $0x204] ss:$8 sps:$4 sm:$0xff]  }
 0x561   : > { %7459 = vmatprep.mubr.msk.bf16.mxu1 %vm9050_vm2, %v10407_v3  ;;  %4426 = vmatpush1.bf16.msra.mxu1 %v8426_v22  ;;  %v8444_v3 = vld [vmem:[%s11658_s4 + $0x220] ss:$8 sps:$4 sm:$0xff]   ;;  %vm6050_vm2 = vcmp.eq.s32.totalorder %v9631_v4, 0 }
 0x562   : > { %4427 = vmatprep.subr.bf16.mxu1 %v8431_v58 }
 0x565   : > { %4428 = vmatpush1.bf16.msra.mxu1 %v8429_v47 }
 0x566   : > { %4429 = vmatprep.subr.bf16.mxu1 %v8434_v53 }
 0x568   : > { %4391 = vmatmul.mubr.bf16.gmra.mrb[92].mxu1 %v3792_v35  ;;  %v8446_v35 = vld [vmem:[%s11658_s4 + $0x224] ss:$8 sps:$4 sm:$0xff]  }
 0x569   : > { %4430 = vmatpush1.bf16.msra.mxu1 %v8432_v23  ;;  %7462 = vmatprep.mubr.msk.bf16.mxu1 %vm9353_vm5, %v10350_v29  ;;  %v8441_v29 = vld [vmem:[%s11658_s4 + $0x210] ss:$8 sps:$4 sm:$0xff]  }
 0x56a   : > { %4431 = vmatprep.subr.bf16.mxu1 %v8437_v43 }
 0x56d   : > { %4432 = vmatpush1.bf16.msra.mxu1 %v8435_v11 }
 0x56e   : > { %4514 = vmatprep.subr.bf16.mxu1 %v8440_v59 }
 0x570   : > { %7465 = vmatmul.mubr.msk.bf16.vlgmr.msra.gmra.mrb[64].mxu1 %vm9376_vm6, %v10378_v40  ;;  %v8449_v40 = vld [vmem:[%s11658_s4 + $0x234] ss:$8 sps:$4 sm:$0xff]  }
 0x571   : > { %7468 = vmatprep.mubr.msk.bf16.mxu1 %vm9353_vm5, %v10390_v42  ;;  %4515 = vmatpush1.bf16.msra.mxu1 %v8438_v45  ;;  %v8447_v42 = vld [vmem:[%s11658_s4 + $0x230] ss:$8 sps:$4 sm:$0xff]  }
 0x572   : > { %4516 = vmatprep.subr.bf16.mxu1 %v8443_v1 }
 0x575   : > { %4517 = vmatpush1.bf16.msra.mxu1 %v8441_v29 }
 0x576   : > { %4518 = vmatprep.subr.bf16.mxu1 %v8446_v35 }
 0x578   : > { %7471 = vmatmul.mubr.msk.bf16.gmra.mrb[68].mxu1 %vm9376_vm6, %v10400_v8  ;;  %v8455_v8 = vld [vmem:[%s11658_s4 + $0x254] ss:$8 sps:$4 sm:$0xff]  }
 0x579   : > { %7474 = vmatprep.mubr.msk.bf16.mxu1 %vm9353_vm5, %v10418_v9  ;;  %4519 = vmatpush1.bf16.msra.mxu1 %v8444_v3  ;;  %v8453_v9 = vld [vmem:[%s11658_s4 + $0x250] ss:$8 sps:$4 sm:$0xff]   ;;  %v4660_v3 = vld [vmem:[%s11660_s6 + $0x8] sm:$0xff] }
 0x57a   : > { %4520 = vmatprep.subr.bf16.mxu1 %v8449_v40 }
 0x57d   : > { %4521 = vmatpush1.bf16.msra.mxu1 %v8447_v42 }
 0x57e   : > { %4522 = vmatprep.subr.bf16.mxu1 %v8452_v36 }
 0x580   : > { %7477 = vmatmul.mubr.msk.bf16.gmra.mrb[72].mxu1 %vm9376_vm6, %v10420_v60  ;;  %v8461_v60 = vld [vmem:[%s11658_s4 + $0x274] ss:$8 sps:$4 sm:$0xff]  }
 0x581   : > { %7480 = vmatprep.mubr.msk.bf16.mxu1 %vm9353_vm5, %v10427_v19  ;;  %4523 = vmatpush1.bf16.msra.mxu1 %v8450_v32  ;;  %v8459_v19 = vld [vmem:[%s11658_s4 + $0x270] ss:$8 sps:$4 sm:$0xff]  }
 0x582   : > { %4524 = vmatprep.subr.bf16.mxu1 %v8455_v8 }
 0x585   : > { %4525 = vmatpush1.bf16.msra.mxu1 %v8453_v9 }
 0x586   : > { %4526 = vmatprep.subr.bf16.mxu1 %v8458_v25 }
 0x588   : > { %7483 = vmatmul.mubr.msk.bf16.gmra.mrb[76].mxu1 %vm9376_vm6, %v10436_v26  ;;  %v10732_v26 = vrot.slane %v7355_v14, %v9640_v6 }
 0x589   : > { %7486 = vmatprep.mubr.msk.bf16.mxu1 %vm9353_vm5, %v10444_v61  ;;  %4527 = vmatpush1.bf16.msra.mxu1 %v8456_v51 }
 0x58a   : > { %4528 = vmatprep.subr.bf16.mxu1 %v8461_v60 }
 0x58d   : > { %4529 = vmatpush1.bf16.msra.mxu1 %v8459_v19 }
 0x590   : > { %7489 = vmatmul.mubr.msk.bf16.gmra.mrb[80].mxu1 %vm9376_vm6, %v10452_v41 }
 0x591   : > { %7492 = vmatprep.mubr.msk.bf16.mxu1 %vm9353_vm5, %v10454_v13 }
 0x598   : > { %7495 = vmatmul.mubr.msk.bf16.gmra.mrb[84].mxu1 %vm9376_vm6, %v10458_v16 }
 0x599   : > { %7498 = vmatprep.mubr.msk.bf16.mxu1 %vm9353_vm5, %v10476_v52 }
 0x5a0   : > { %7501 = vmatmul.mubr.msk.bf16.gmra.mrb[88].mxu1 %vm9376_vm6, %v10484_v0 }
 0x5a1   : > { %7504 = vmatprep.mubr.msk.bf16.mxu1 %vm9353_vm5, %v10489_v39  ;;  %vm6107_vm5 = vcmp.eq.s32.totalorder %v9631_v4, 1 }
 0x5a8   : > { %7507 = vmatmul.mubr.msk.bf16.gmra.mrb[92].mxu1 %vm9376_vm6, %v10491_v31  ;;  %vm6221_vm6 = vcmp.eq.s32.totalorder %v9631_v4, 3 }
 0x5a9   : > { %4546 = vmatprep.mubr.bf16.mxu1 %v8804_v46 }
 0x5b0   : > { %7510 = vmatmul.mubr.msk.bf16.vlgmr.msra.gmra.mrb[64].mxu1 %vm9547_vm8, %v10495_v44 }
 0x5b1   : > { %4556 = vmatprep.mubr.bf16.mxu1 %v8804_v46 }
 0x5b8   : > { %7513 = vmatmul.mubr.msk.bf16.gmra.mrb[68].mxu1 %vm9547_vm8, %v10510_v27 }
 0x5b9   : > { %4566 = vmatprep.mubr.bf16.mxu1 %v8804_v46 }
 0x5c0   : > { %7516 = vmatmul.mubr.msk.bf16.gmra.mrb[72].mxu1 %vm9547_vm8, %v10515_v54 }
 0x5c1   : > { %4576 = vmatprep.mubr.bf16.mxu1 %v8804_v46 }
 0x5c8   : > { %7519 = vmatmul.mubr.msk.bf16.gmra.mrb[76].mxu1 %vm9547_vm8, %v10523_v28 }
 0x5c9   : > { %4586 = vmatprep.mubr.bf16.mxu1 %v8804_v46 }
 0x5d0   : > { %7522 = vmatmul.mubr.msk.bf16.gmra.mrb[80].mxu1 %vm9547_vm8, %v10525_v55 }
 0x5d1   : > { %4596 = vmatprep.mubr.bf16.mxu1 %v8804_v46 }
 0x5d8   : > { %7525 = vmatmul.mubr.msk.bf16.gmra.mrb[84].mxu1 %vm9547_vm8, %v10535_v20 }
 0x5d9   : > { %4606 = vmatprep.mubr.bf16.mxu1 %v8804_v46 }
 0x5e0   : > { %7528 = vmatmul.mubr.msk.bf16.gmra.mrb[88].mxu1 %vm9547_vm8, %v10543_v48 }
 0x5e1   : > { %4616 = vmatprep.mubr.bf16.mxu1 %v8804_v46 }
 0x5e8   : > { %7531 = vmatmul.mubr.msk.bf16.gmra.mrb[92].mxu1 %vm9547_vm8, %v10546_v56  ;;  %vm8808_vm8 = vmmov 0  }
 0x5e9   : > { %4735 = vmatprep.mubr.f32.mxu1 %v8805_v17 }
 0x683   : > { %v4548_v61 = vpop.f32.mrb[64].mxu1 }
 0x684   : > { %v7953_v41 = vadd.f32 %v4548_v61, %v10729_v30  ;;  %v4550_v46 = vpop.f32.mrb[65].mxu1 }
 0x685   : > { %v7954_v13 = vadd.f32 %v4550_v46, %v10732_v26  ;;  %v4552_v24 = vpop.f32.mrb[66].mxu1 }
 0x686   : > { %8648 = vtanh.f32 %v7953_v41  ;;  %v7955_v16 = vadd.f32 %v4552_v24, %v10729_v30  ;;  %v4554_v52 = vpop.f32.mrb[67].mxu1 }
 0x687   : > { %8650 = vtanh.f32 %v7954_v13  ;;  %v7956_v0 = vadd.f32 %v4554_v52, %v10732_v26  ;;  %v4661_v13 = vld [vmem:[%s11660_s6 + $0x10] sm:$0xff] }
 0x688   : > { %8652 = vtanh.f32 %v7955_v16 }
 0x689   : > { %8654 = vtanh.f32 %v7956_v0 }
 0x68b   : > { %v4558_v39 = vpop.f32.mrb[68].mxu1 }
 0x68c   : > { %v7957_v31 = vadd.f32 %v4558_v39, %v10729_v30  ;;  %v4560_v44 = vpop.f32.mrb[69].mxu1 }
 0x68d   : > { %v7958_v27 = vadd.f32 %v4560_v44, %v10732_v26  ;;  %v4562_v54 = vpop.f32.mrb[70].mxu1 }
 0x68e   : > { %8656 = vtanh.f32 %v7957_v31  ;;  %v7959_v33 = vadd.f32 %v4562_v54, %v10729_v30  ;;  %v4564_v18 = vpop.f32.mrb[71].mxu1 }
 0x68f   : > { %8658 = vtanh.f32 %v7958_v27  ;;  %v7960_v12 = vadd.f32 %v4564_v18, %v10732_v26 }
 0x690   : > { %v8649_v28 = vpop.eup %8648  ;;  %8660 = vtanh.f32 %v7959_v33 }
 0x691   : > { %v8651_v55 = vpop.eup %8650  ;;  %8662 = vtanh.f32 %v7960_v12 }
 0x692   : > { %v8653_v2 = vpop.eup %8652 }
 0x693   : > { %v8655_v15 = vpop.eup %8654  ;;  %v4568_v50 = vpop.f32.mrb[72].mxu1  ;;  %v7829_v20 = vpack.c.bf16 %v8653_v2, %v8649_v28  ;;  %v4662_v2 = vld [vmem:[%s11660_s6 + $0x18] sm:$0xff] }
 0x694   : > { %v7961_v21 = vadd.f32 %v4568_v50, %v10729_v30  ;;  %v4570_v62 = vpop.f32.mrb[73].mxu1  ;;  %v7827_v49 = vpack.c.bf16 %v8655_v15, %v8651_v55 }
 0x695   : > { %v7962_v63 = vadd.f32 %v4570_v62, %v10732_v26  ;;  %v4572_v48 = vpop.f32.mrb[74].mxu1 }
 0x696   : > { %8664 = vtanh.f32 %v7961_v21  ;;  %v7963_v37 = vadd.f32 %v4572_v48, %v10729_v30  ;;  %v4574_v56 = vpop.f32.mrb[75].mxu1  ;;  %7828 = vmatprep.subr.bf16.mxu1 %v7827_v49 }
 0x697   : > { %8666 = vtanh.f32 %v7962_v63  ;;  %v7964_v57 = vadd.f32 %v4574_v56, %v10732_v26  ;;  %7830 = vmatpush1.bf16.msra.mxu1 %v7829_v20 }
 0x698   : > { %v8657_v34 = vpop.eup %8656  ;;  %8668 = vtanh.f32 %v7963_v37 }
 0x699   : > { %v8659_v10 = vpop.eup %8658  ;;  %8670 = vtanh.f32 %v7964_v57 }
 0x69a   : > { %v8661_v22 = vpop.eup %8660  ;;  %7532 = vmatmul.mubr.msk.f32.vlgmr.msra.gmra.mrb[96].mxu1 %vm4667_vm0, %v4659_v38 }
 0x69b   : > { %v8663_v58 = vpop.eup %8662  ;;  %v4578_v47 = vpop.f32.mrb[76].mxu1  ;;  %v7833_v53 = vpack.c.bf16 %v8661_v22, %v8657_v34  ;;  %4809 = vmatprep.mubr.f32.mxu1 %v8805_v17  ;;  %v4663_v22 = vld [vmem:[%s11660_s6 + $0x20] sm:$0xff] }
 0x69c   : > { %v7965_v23 = vadd.f32 %v4578_v47, %v10729_v30  ;;  %v4580_v43 = vpop.f32.mrb[77].mxu1  ;;  %v7831_v11 = vpack.c.bf16 %v8663_v58, %v8659_v10 }
 0x69d   : > { %v7966_v59 = vadd.f32 %v4580_v43, %v10732_v26  ;;  %v4582_v45 = vpop.f32.mrb[78].mxu1 }
 0x69e   : > { %8672 = vtanh.f32 %v7965_v23  ;;  %v7967_v1 = vadd.f32 %v4582_v45, %v10729_v30  ;;  %v4584_v29 = vpop.f32.mrb[79].mxu1  ;;  %7832 = vmatprep.subr.bf16.mxu1 %v7831_v11 }
 0x69f   : > { %8674 = vtanh.f32 %v7966_v59  ;;  %v7968_v35 = vadd.f32 %v4584_v29, %v10732_v26  ;;  %7834 = vmatpush1.bf16.msra.mxu1 %v7833_v53 }
 0x6a0   : > { %v8665_v40 = vpop.eup %8664  ;;  %8676 = vtanh.f32 %v7967_v1 }
 0x6a1   : > { %v8667_v42 = vpop.eup %8666  ;;  %8678 = vtanh.f32 %v7968_v35 }
 0x6a2   : > { %v8669_v36 = vpop.eup %8668  ;;  %7533 = vmatmul.mubr.msk.f32.vlgmr.msra.gmra.mrb[98].mxu1 %vm4667_vm0, %v4660_v3 }
 0x6a3   : > { %v8671_v32 = vpop.eup %8670  ;;  %v4588_v8 = vpop.f32.mrb[80].mxu1  ;;  %v7837_v9 = vpack.c.bf16 %v8669_v36, %v8665_v40  ;;  %4883 = vmatprep.mubr.f32.mxu1 %v8805_v17  ;;  %v4664_v36 = vld [vmem:[%s11660_s6 + $0x28] sm:$0xff] }
 0x6a4   : > { %v7969_v25 = vadd.f32 %v4588_v8, %v10729_v30  ;;  %v4590_v51 = vpop.f32.mrb[81].mxu1  ;;  %v7835_v60 = vpack.c.bf16 %v8671_v32, %v8667_v42 }
 0x6a5   : > { %v7970_v19 = vadd.f32 %v4590_v51, %v10732_v26  ;;  %v4592_v14 = vpop.f32.mrb[82].mxu1 }
 0x6a6   : > { %8680 = vtanh.f32 %v7969_v25  ;;  %v7971_v61 = vadd.f32 %v4592_v14, %v10729_v30  ;;  %v4594_v41 = vpop.f32.mrb[83].mxu1  ;;  %7836 = vmatprep.subr.bf16.mxu1 %v7835_v60 }
 0x6a7   : > { %8682 = vtanh.f32 %v7970_v19  ;;  %v7972_v46 = vadd.f32 %v4594_v41, %v10732_v26  ;;  %7838 = vmatpush1.bf16.msra.mxu1 %v7837_v9 }
 0x6a8   : > { %v8673_v24 = vpop.eup %8672  ;;  %8684 = vtanh.f32 %v7971_v61 }
 0x6a9   : > { %v8675_v16 = vpop.eup %8674  ;;  %8686 = vtanh.f32 %v7972_v46 }
 0x6aa   : > { %v8677_v52 = vpop.eup %8676  ;;  %7534 = vmatmul.mubr.msk.f32.vlgmr.msra.gmra.mrb[100].mxu1 %vm4667_vm0, %v4661_v13  ;;  %v5260_v13 = vld [vmem:[%s11659_s5] sm:$0xff] }
 0x6ab   : > { %v8679_v0 = vpop.eup %8678  ;;  %v4598_v39 = vpop.f32.mrb[84].mxu1  ;;  %v7841_v31 = vpack.c.bf16 %v8677_v52, %v8673_v24  ;;  %4957 = vmatprep.mubr.f32.mxu1 %v8805_v17  ;;  %v5261_v24 = vld [vmem:[%s11659_s5 + $0x8] sm:$0xff] }
 0x6ac   : > { %v7973_v44 = vadd.f32 %v4598_v39, %v10729_v30  ;;  %v4600_v27 = vpop.f32.mrb[85].mxu1  ;;  %v7839_v54 = vpack.c.bf16 %v8679_v0, %v8675_v16  ;;  %v4666_v16 = vld [vmem:[%s11660_s6 + $0x38] sm:$0xff]  ;;  %v7860_v52 = vpack.c.bf16 %v5261_v24, %v5260_v13  ;;  %v11686_v0 = vmov 0.0|0.0   ;;  %v5262_v39 = vld [vmem:[%s11659_s5 + $0x10] sm:$0xff] }
 0x6ad   : > { %v7974_v33 = vadd.f32 %v4600_v27, %v10732_v26  ;;  %v4602_v18 = vpop.f32.mrb[86].mxu1  ;;  %v5264_v27 = vld [vmem:[%s11659_s5 + $0x20] sm:$0xff] }
 0x6ae   : > { %8688 = vtanh.f32 %v7973_v44  ;;  %v7975_v12 = vadd.f32 %v4602_v18, %v10729_v30  ;;  %v4604_v28 = vpop.f32.mrb[87].mxu1  ;;  %7840 = vmatprep.subr.bf16.mxu1 %v7839_v54  ;;  %v5265_v54 = vld [vmem:[%s11659_s5 + $0x28] sm:$0xff]  ;;  %v5266_v18 = vld [vmem:[%s11659_s5 + $0x30] sm:$0xff] }
 0x6af   : > { %8690 = vtanh.f32 %v7974_v33  ;;  %v7976_v55 = vadd.f32 %v4604_v28, %v10732_v26  ;;  %7842 = vmatpush1.bf16.msra.mxu1 %v7841_v31  ;;  %v5263_v31 = vld [vmem:[%s11659_s5 + $0x18] sm:$0xff]  ;;  %v7866_v33 = vpack.c.bf16 %v5265_v54, %v5264_v27 }
 0x6b0   : > { %v8681_v15 = vpop.eup %8680  ;;  %8692 = vtanh.f32 %v7975_v12  ;;  %v7863_v44 = vpack.c.bf16 %v5263_v31, %v5262_v39  ;;  %v5267_v12 = vld [vmem:[%s11659_s5 + $0x38] sm:$0xff] }
 0x6b1   : > { %v8683_v50 = vpop.eup %8682  ;;  %8694 = vtanh.f32 %v7976_v55  ;;  %v7869_v28 = vpack.c.bf16 %v5267_v12, %v5266_v18  ;;  %v5268_v55 = vld [vmem:[%s11659_s5 + $0x40] sm:$0xff] }
 0x6b2   : > { %v8685_v20 = vpop.eup %8684  ;;  %7535 = vmatmul.mubr.msk.f32.vlgmr.msra.gmra.mrb[102].mxu1 %vm4667_vm0, %v4662_v2  ;;  %v5269_v2 = vld [vmem:[%s11659_s5 + $0x48] sm:$0xff]  ;;  %v5409_v12 = vld [vmem:[%s11662_s8] sm:$0xf] }
 0x6b3   : > { %v8687_v21 = vpop.eup %8686  ;;  %v4608_v62 = vpop.f32.mrb[88].mxu1  ;;  %v7845_v49 = vpack.c.bf16 %v8685_v20, %v8681_v15  ;;  %5031 = vmatprep.mubr.f32.mxu1 %v8805_v17  ;;  %v7872_v15 = vpack.c.bf16 %v5269_v2, %v5268_v55  ;;  %v5271_v20 = vld [vmem:[%s11659_s5 + $0x58] sm:$0xff]  ;;  %v5758_v2 = vsub.s32 3, %v9631_v4 }
 0x6b4   : > { %v7977_v63 = vadd.f32 %v4608_v62, %v10729_v30  ;;  %v4610_v48 = vpop.f32.mrb[89].mxu1  ;;  %v7843_v37 = vpack.c.bf16 %v8687_v21, %v8683_v50  ;;  %v5270_v50 = vld [vmem:[%s11659_s5 + $0x50] sm:$0xff]  ;;  %v5272_v62 = vld [vmem:[%s11659_s5 + $0x60] sm:$0xff] }
 0x6b5   : > { %v7978_v56 = vadd.f32 %v4610_v48, %v10732_v26  ;;  %v4612_v57 = vpop.f32.mrb[90].mxu1  ;;  %v7875_v21 = vpack.c.bf16 %v5271_v20, %v5270_v50  ;;  %v5274_v48 = vld [vmem:[%s11659_s5 + $0x70] sm:$0xff] }
 0x6b6   : > { %8696 = vtanh.f32 %v7977_v63  ;;  %v7979_v38 = vadd.f32 %v4612_v57, %v10729_v30  ;;  %v4614_v34 = vpop.f32.mrb[91].mxu1  ;;  %7844 = vmatprep.subr.bf16.mxu1 %v7843_v37  ;;  %v5275_v37 = vld [vmem:[%s11659_s5 + $0x78] sm:$0xff]  ;;  %v5276_v57 = vld [vmem:[%s11659_s5 + $0x80] sm:$0xff] }
 0x6b7   : > { %8698 = vtanh.f32 %v7978_v56  ;;  %v7980_v10 = vadd.f32 %v4614_v34, %v10732_v26  ;;  %7846 = vmatpush1.bf16.msra.mxu1 %v7845_v49  ;;  %v5273_v49 = vld [vmem:[%s11659_s5 + $0x68] sm:$0xff]  ;;  %v7881_v56 = vpack.c.bf16 %v5275_v37, %v5274_v48  ;;  %v10918_v48 = vrot.slane %v5409_v12, %v9640_v6 }
 0x6b8   : > { %v8689_v58 = vpop.eup %8688  ;;  %8700 = vtanh.f32 %v7979_v38  ;;  %v7878_v63 = vpack.c.bf16 %v5273_v49, %v5272_v62  ;;  %v5277_v38 = vld [vmem:[%s11659_s5 + $0x88] sm:$0xff] }
 0x6b9   : > { %v8691_v47 = vpop.eup %8690  ;;  %8702 = vtanh.f32 %v7980_v10  ;;  %v7884_v34 = vpack.c.bf16 %v5277_v38, %v5276_v57  ;;  %v5278_v10 = vld [vmem:[%s11659_s5 + $0x90] sm:$0xff] }
 0x6ba   : > { %v8693_v53 = vpop.eup %8692  ;;  %7536 = vmatmul.mubr.msk.f32.vlgmr.msra.gmra.mrb[104].mxu1 %vm4667_vm0, %v4663_v22  ;;  %v5279_v22 = vld [vmem:[%s11659_s5 + $0x98] sm:$0xff] }
 0x6bb   : > { %v8695_v23 = vpop.eup %8694  ;;  %v4618_v43 = vpop.f32.mrb[92].mxu1  ;;  %v7849_v11 = vpack.c.bf16 %v8693_v53, %v8689_v58  ;;  %5105 = vmatprep.mubr.f32.mxu1 %v8805_v17  ;;  %v7887_v58 = vpack.c.bf16 %v5279_v22, %v5278_v10  ;;  %v10926_v10 = vrot.slane %v5409_v12, %v5758_v2 }
 0x6bc   : > { %v7981_v59 = vadd.f32 %v4618_v43, %v10729_v30  ;;  %v4620_v45 = vpop.f32.mrb[93].mxu1  ;;  %v7847_v1 = vpack.c.bf16 %v8695_v23, %v8691_v47 }
 0x6bd   : > { %v7982_v29 = vadd.f32 %v4620_v45, %v10732_v26  ;;  %v4622_v35 = vpop.f32.mrb[94].mxu1 }
 0x6be   : > { %8704 = vtanh.f32 %v7981_v59  ;;  %v7983_v3 = vadd.f32 %v4622_v35, %v10729_v30  ;;  %v4624_v40 = vpop.f32.mrb[95].mxu1  ;;  %7848 = vmatprep.subr.bf16.mxu1 %v7847_v1 }
 0x6bf   : > { %8706 = vtanh.f32 %v7982_v29  ;;  %v7984_v42 = vadd.f32 %v4624_v40, %v10732_v26  ;;  %7850 = vmatpush1.bf16.msra.mxu1 %v7849_v11  ;;  %v4665_v26 = vld [vmem:[%s11660_s6 + $0x30] sm:$0xff] }
 0x6c0   : > { %v8697_v32 = vpop.eup %8696  ;;  %8708 = vtanh.f32 %v7983_v3 }
 0x6c1   : > { %v8699_v8 = vpop.eup %8698  ;;  %8710 = vtanh.f32 %v7984_v42 }
 0x6c2   : > { %v8701_v9 = vpop.eup %8700  ;;  %7537 = vmatmul.mubr.msk.f32.vlgmr.msra.gmra.mrb[106].mxu1 %vm4667_vm0, %v4664_v36 }
 0x6c3   : > { %v8703_v25 = vpop.eup %8702  ;;  %v7853_v51 = vpack.c.bf16 %v8701_v9, %v8697_v32  ;;  %5179 = vmatprep.mubr.f32.mxu1 %v8805_v17  ;;  %v8462_v9 = vld [vmem:[%s11663_s9 + $0x40] sm:$0xff]  }
 0x6c4   : > { %v7851_v30 = vpack.c.bf16 %v8703_v25, %v8699_v8  ;;  %v8463_v25 = vld [vmem:[%s11663_s9] sm:$0xff]   ;;  %7608 = vmatprep.subr.bf16.mxu0 %v8462_v9 }
 0x6c5   : > { %7609 = vmatpush3.bf16.msra.mxu0 %v8463_v25 }
 0x6c6   : > { %7852 = vmatprep.subr.bf16.mxu1 %v7851_v30  ;;  %v8465_v30 = vld [vmem:[%s11663_s9 + $0x8] sm:$0xff]  }
 0x6c7   : > { %7854 = vmatpush1.bf16.msra.mxu1 %v7853_v51  ;;  %v8464_v51 = vld [vmem:[%s11663_s9 + $0x48] sm:$0xff]  }
 0x6c8   : > { %v8705_v60 = vpop.eup %8704  ;;  %7610 = vmatprep.subr.bf16.mxu0 %v8464_v51 }
 0x6c9   : > { %v8707_v19 = vpop.eup %8706  ;;  %7611 = vmatpush3.bf16.msra.mxu0 %v8465_v30 }
 0x6ca   : > { %v8709_v14 = vpop.eup %8708  ;;  %7538 = vmatmul.mubr.msk.f32.vlgmr.msra.gmra.mrb[108].mxu1 %vm4667_vm0, %v4665_v26 }
 0x6cb   : > { %v8711_v61 = vpop.eup %8710  ;;  %v7857_v41 = vpack.c.bf16 %v8709_v14, %v8705_v60  ;;  %5253 = vmatprep.mubr.f32.mxu1 %v8805_v17 }
 0x6cc   : > { %v7855_v46 = vpack.c.bf16 %v8711_v61, %v8707_v19 }
 0x6ce   : > { %7856 = vmatprep.subr.bf16.mxu1 %v7855_v46 }
 0x6cf   : > { %7858 = vmatpush1.bf16.msra.mxu1 %v7857_v41 }
 0x6d0   : > { %7859 = vmatprep.subr.bf16.mxu1 %v11686_v0 }
 0x6d2   : > { %7539 = vmatmul.mubr.msk.f32.vlgmr.msra.gmra.mrb[110].mxu1 %vm4667_vm0, %v4666_v16 }
 0x6d3   : > { %7861 = vmatpush1.bf16.msra.mxu1 %v7860_v52 }
 0x6d4   : > { %7862 = vmatprep.subr.bf16.mxu1 %v11686_v0 }
 0x6d7   : > { %7864 = vmatpush1.bf16.msra.mxu1 %v7863_v44 }
 0x6d8   : > { %7865 = vmatprep.subr.bf16.mxu1 %v11686_v0 }
 0x6db   : > { %7867 = vmatpush1.bf16.msra.mxu1 %v7866_v33 }
 0x6dc   : > { %7868 = vmatprep.subr.bf16.mxu1 %v11686_v0 }
 0x6df   : > { %7870 = vmatpush1.bf16.msra.mxu1 %v7869_v28  ;;  %v5678_v28 = vsub.s32 2, %v9631_v4 }
 0x6e0   : > { %7871 = vmatprep.subr.bf16.mxu1 %v11686_v0 }
 0x6e1   : > { %v10920_v37 = vrot.slane %v5409_v12, %v5678_v28 }
 0x6e3   : > { %7873 = vmatpush1.bf16.msra.mxu1 %v7872_v15 }
 0x6e4   : > { %7874 = vmatprep.subr.bf16.mxu1 %v11686_v0 }
 0x6e7   : > { %7876 = vmatpush1.bf16.msra.mxu1 %v7875_v21  ;;  %v10913_v21 = vrot.slane %v5409_v12, %v9634_v5 }
 0x6e8   : > { %7877 = vmatprep.subr.bf16.mxu1 %v11686_v0 }
 0x6eb   : > { %7879 = vmatpush1.bf16.msra.mxu1 %v7878_v63 }
 0x6ec   : > { %7880 = vmatprep.subr.bf16.mxu1 %v11686_v0 }
 0x6ef   : > { %7882 = vmatpush1.bf16.msra.mxu1 %v7881_v56 }
 0x6f0   : > { %7883 = vmatprep.subr.bf16.mxu1 %v11686_v0 }
 0x6f3   : > { %7885 = vmatpush1.bf16.msra.mxu1 %v7884_v34 }
 0x6f4   : > { %7886 = vmatprep.subr.bf16.mxu1 %v11686_v0 }
 0x6f7   : > { %7888 = vmatpush1.bf16.msra.mxu1 %v7887_v58 }
 0x76d   : > { %v4737_v47 = vpop.f32.mrb[96].mxu1 }
 0x76e   : > { %v4739_v53 = vpop.f32.mrb[97].mxu1 }
 0x76f   : > { %7540 = vmatprep.mubr.msk.f32.mxu1 %vm2125_vm9, %v4739_v53 }
 0x770   : > { %5369 = vmatmul.mubr.f32.vlgmr.msra.gmra.mrb[112].mxu1 %v4737_v47 }
 0x775   : > { %v4811_v23 = vpop.f32.mrb[98].mxu1 }
 0x776   : > { %v4813_v43 = vpop.f32.mrb[99].mxu1 }
 0x777   : > { %7541 = vmatprep.mubr.msk.f32.mxu1 %vm2125_vm9, %v4813_v43 }
 0x778   : > { %5374 = vmatmul.mubr.f32.gmra.mrb[114].mxu1 %v4811_v23 }
 0x77d   : > { %v4885_v11 = vpop.f32.mrb[100].mxu1 }
 0x77e   : > { %v4887_v59 = vpop.f32.mrb[101].mxu1 }
 0x77f   : > { %7542 = vmatprep.mubr.msk.f32.mxu1 %vm2125_vm9, %v4887_v59 }
 0x780   : > { %5379 = vmatmul.mubr.f32.gmra.mrb[116].mxu1 %v4885_v11 }
 0x785   : > { %v4959_v45 = vpop.f32.mrb[102].mxu1 }
 0x786   : > { %v4961_v1 = vpop.f32.mrb[103].mxu1 }
 0x787   : > { %7543 = vmatprep.mubr.msk.f32.mxu1 %vm2125_vm9, %v4961_v1 }
 0x788   : > { %5384 = vmatmul.mubr.f32.gmra.mrb[118].mxu1 %v4959_v45 }
 0x78d   : > { %v5033_v29 = vpop.f32.mrb[104].mxu1 }
 0x78e   : > { %v5035_v35 = vpop.f32.mrb[105].mxu1 }
 0x78f   : > { %7544 = vmatprep.mubr.msk.f32.mxu1 %vm2125_vm9, %v5035_v35 }
 0x790   : > { %5389 = vmatmul.mubr.f32.gmra.mrb[120].mxu1 %v5033_v29 }
 0x795   : > { %v5107_v3 = vpop.f32.mrb[106].mxu1 }
 0x796   : > { %v5109_v40 = vpop.f32.mrb[107].mxu1 }
 0x797   : > { %7545 = vmatprep.mubr.msk.f32.mxu1 %vm2125_vm9, %v5109_v40 }
 0x798   : > { %5394 = vmatmul.mubr.f32.gmra.mrb[122].mxu1 %v5107_v3 }
 0x79d   : > { %v5181_v42 = vpop.f32.mrb[108].mxu1 }
 0x79e   : > { %v5183_v36 = vpop.f32.mrb[109].mxu1 }
 0x79f   : > { %7546 = vmatprep.mubr.msk.f32.mxu1 %vm2125_vm9, %v5183_v36 }
 0x7a0   : > { %5399 = vmatmul.mubr.f32.gmra.mrb[124].mxu1 %v5181_v42 }
 0x7a5   : > { %v5255_v32 = vpop.f32.mrb[110].mxu1 }
 0x7a6   : > { %v5257_v8 = vpop.f32.mrb[111].mxu1 }
 0x7a7   : > { %7547 = vmatprep.mubr.msk.f32.mxu1 %vm2125_vm9, %v5257_v8  ;;  %vm7022_vm9 = vcmask 1041408  }
 0x7a8   : > { %5404 = vmatmul.mubr.f32.gmra.mrb[126].mxu1 %v5255_v32 }
 0x843   : > { %v10895_v26 = vpop.f32.mrb[112].mxu1 }
 0x844   : > { %v5412_v60 = vrot.slane %v10895_v26, 4  ;;  %v5460_v19 = vmul.f32 %v10895_v26, %v10895_v26  ;;  %v5372_v14 = vpop.f32.mrb[113].mxu1 }
 0x846   : > { %v5413_v61 = vadd.f32 %v5412_v60, %v10895_v26  ;;  %v5468_v41 = vrot.slane %v5460_v19, 4 }
 0x848   : > { %v5414_v46 = vrot.slane %v5413_v61, 2  ;;  %v5469_v13 = vadd.f32 %v5468_v41, %v5460_v19 }
 0x84a   : > { %v5415_v24 = vadd.f32 %v5414_v46, %v5413_v61  ;;  %v5470_v16 = vrot.slane %v5469_v13, 2 }
 0x84b   : > { %v10901_v52 = vpop.f32.mrb[114].mxu1 }
 0x84c   : > { %v5471_v0 = vadd.f32 %v5470_v16, %v5469_v13  ;;  %v5418_v39 = vrot.slane %v10901_v52, 4  ;;  %v5461_v31 = vmul.f32 %v10901_v52, %v10901_v52  ;;  %v5377_v44 = vpop.f32.mrb[115].mxu1  ;;  %v5416_v27 = vrot.slane %v5415_v24, 1 }
 0x84e   : > { %v5419_v54 = vadd.f32 %v5418_v39, %v10901_v52  ;;  %v5474_v33 = vrot.slane %v5461_v31, 4  ;;  %v5472_v18 = vrot.slane %v5471_v0, 1  ;;  %v5417_v55 = vadd.f32 %v5416_v27, %v5415_v24 }
 0x850   : > { %v5420_v15 = vrot.slane %v5419_v54, 2  ;;  %v5475_v50 = vadd.f32 %v5474_v33, %v5461_v31  ;;  %v5473_v20 = vadd.f32 %v5472_v18, %v5471_v0  ;;  %v5520_v34 = vmul.f32 %v10913_v21, %v5417_v55 }
 0x851   : > { %v5600_v47 = vmul.f32 %v10918_v48, %v5417_v55  ;;  %v5680_v53 = vmul.f32 %v10920_v37, %v5417_v55  ;;  %v10932_v43 = vmul.f32 %v10926_v10, %v5417_v55 }
 0x852   : > { %v5421_v62 = vadd.f32 %v5420_v15, %v5419_v54  ;;  %v5476_v49 = vrot.slane %v5475_v50, 2  ;;  %v5633_v45 = vmul.f32 %v10918_v48, %v5473_v20  ;;  %v5713_v35 = vmul.f32 %v10920_v37, %v5473_v20 }
 0x853   : > { %v10915_v63 = vpop.f32.mrb[116].mxu1  ;;  %v10937_v3 = vmul.f32 %v10913_v21, %v5473_v20  ;;  %v10948_v51 = vmul.f32 %v10926_v10, %v5473_v20 }
 0x854   : > { %v5424_v56 = vrot.slane %v10915_v63, 4  ;;  %v5462_v57 = vmul.f32 %v10915_v63, %v10915_v63  ;;  %v5382_v38 = vpop.f32.mrb[117].mxu1  ;;  %v5422_v22 = vrot.slane %v5421_v62, 1  ;;  %v5477_v58 = vadd.f32 %v5476_v49, %v5475_v50 }
 0x856   : > { %v5425_v6 = vadd.f32 %v5424_v56, %v10915_v63  ;;  %v5480_v23 = vrot.slane %v5462_v57, 4  ;;  %v5423_v11 = vadd.f32 %v5422_v22, %v5421_v62  ;;  %v5478_v59 = vrot.slane %v5477_v58, 1 }
 0x858   : > { %v5426_v1 = vrot.slane %v5425_v6, 2  ;;  %v5481_v29 = vadd.f32 %v5480_v23, %v5462_v57  ;;  %v10939_v40 = vadd.f32 %v5478_v59, %v5477_v58  ;;  %v5521_v42 = vmul.f32 %v10913_v21, %v5423_v11 }
 0x859   : > { %v5601_v36 = vmul.f32 %v10918_v48, %v5423_v11  ;;  %v5681_v32 = vmul.f32 %v10920_v37, %v5423_v11  ;;  %v10945_v8 = vmul.f32 %v10926_v10, %v5423_v11 }
 0x85a   : > { %v5427_v9 = vadd.f32 %v5426_v1, %v5425_v6  ;;  %v5482_v25 = vrot.slane %v5481_v29, 2  ;;  %v5536_v30 = vrot.slane %v5521_v42, 7  ;;  %v5634_v61 = vmul.f32 %v10918_v48, %v10939_v40 }
 0x85b   : > { %v5616_v60 = vrot.slane %v5601_v36, 7  ;;  %v5696_v19 = vrot.slane %v5681_v32, 7  ;;  %v10950_v14 = vpop.f32.mrb[118].mxu1  ;;  %v5776_v41 = vrot.slane %v10945_v8, 7  ;;  %v5714_v55 = vmul.f32 %v10920_v37, %v10939_v40 }
 0x85c   : > { %v5428_v46 = vrot.slane %v5427_v9, 1  ;;  %v5483_v13 = vadd.f32 %v5482_v25, %v5481_v29  ;;  %v5430_v24 = vrot.slane %v10950_v14, 4  ;;  %v5387_v16 = vpop.f32.mrb[119].mxu1  ;;  %v5463_v0 = vmul.f32 %v10950_v14, %v10950_v14 }
 0x85d   : > { %v5617_v39 = vsel %vm3157_vm11, %v5616_v60, %v5600_v47  ;;  %v5537_v31 = vsel %vm3157_vm11, %v5536_v30, %v5520_v34  ;;  %v5649_v44 = vrot.slane %v5634_v61, 7  ;;  %v5697_v18 = vsel %vm3157_vm11, %v5696_v19, %v5680_v53 }
 0x85e   : > { %v10960_v27 = vadd.f32 %v5428_v46, %v5427_v9  ;;  %v5484_v54 = vrot.slane %v5483_v13, 1  ;;  %v5431_v33 = vadd.f32 %v5430_v24, %v10950_v14  ;;  %v5486_v12 = vrot.slane %v5463_v0, 4 }
 0x85f   : > { %v5650_v28 = vsel %vm3157_vm11, %v5649_v44, %v5633_v45  ;;  %v5554_v2 = vmul.f32 %v10913_v21, %v10939_v40  ;;  %v5729_v57 = vrot.slane %v5714_v55, 7 }
 0x860   : > { %v10969_v15 = vadd.f32 %v5484_v54, %v5483_v13  ;;  %v5432_v50 = vrot.slane %v5431_v33, 2  ;;  %v5602_v20 = vmul.f32 %v10918_v48, %v10960_v27  ;;  %v5522_v62 = vmul.f32 %v10913_v21, %v10960_v27 }
 0x861   : > { %v5487_v49 = vadd.f32 %v5486_v12, %v5463_v0  ;;  %v5682_v56 = vmul.f32 %v10920_v37, %v10960_v27  ;;  %v5569_v38 = vrot.slane %v5554_v2, 7  ;;  %v5730_v59 = vsel %vm3157_vm11, %v5729_v57, %v5713_v35 }
 0x862   : > { %v5433_v34 = vadd.f32 %v5432_v50, %v5431_v33  ;;  %v5618_v22 = vrot.slane %v5602_v20, 6  ;;  %v5538_v58 = vrot.slane %v5522_v62, 6  ;;  %v5635_v47 = vmul.f32 %v10918_v48, %v10969_v15 }
 0x863   : > { %v5488_v53 = vrot.slane %v5487_v49, 2  ;;  %v10979_v6 = vpop.f32.mrb[120].mxu1  ;;  %v5698_v23 = vrot.slane %v5682_v56, 6  ;;  %v5715_v11 = vmul.f32 %v10920_v37, %v10969_v15  ;;  %v5555_v24 = vmul.f32 %v10913_v21, %v10969_v15 }
 0x864   : > { %v5434_v45 = vrot.slane %v5433_v34, 1  ;;  %v5436_v1 = vrot.slane %v10979_v6, 4  ;;  %v5464_v29 = vmul.f32 %v10979_v6, %v10979_v6  ;;  %v5392_v42 = vpop.f32.mrb[121].mxu1  ;;  %v5619_v36 = vsel %vm3160_vm12, %v5618_v22, %v5617_v39 }
 0x865   : > { %v5489_v32 = vadd.f32 %v5488_v53, %v5487_v49  ;;  %v5539_v9 = vsel %vm3160_vm12, %v5538_v58, %v5537_v31  ;;  %v5651_v25 = vrot.slane %v5635_v47, 6  ;;  %v5699_v30 = vsel %vm3160_vm12, %v5698_v23, %v5697_v18 }
 0x866   : > { %v10990_v60 = vadd.f32 %v5434_v45, %v5433_v34  ;;  %v5437_v19 = vadd.f32 %v5436_v1, %v10979_v6  ;;  %v5492_v35 = vrot.slane %v5464_v29, 4  ;;  %v5731_v61 = vrot.slane %v5715_v11, 6 }
 0x867   : > { %v5490_v46 = vrot.slane %v5489_v32, 1  ;;  %v5652_v13 = vsel %vm3160_vm12, %v5651_v25, %v5650_v28  ;;  %v5570_v16 = vsel %vm3157_vm11, %v5569_v38, %v10937_v3  ;;  %v5571_v12 = vrot.slane %v5555_v24, 6 }
 0x868   : > { %v5438_v0 = vrot.slane %v5437_v19, 2  ;;  %v5493_v39 = vadd.f32 %v5492_v35, %v5464_v29  ;;  %v5603_v31 = vmul.f32 %v10918_v48, %v10990_v60  ;;  %v5523_v44 = vmul.f32 %v10913_v21, %v10990_v60 }
 0x869   : > { %v11002_v54 = vadd.f32 %v5490_v46, %v5489_v32  ;;  %v5683_v33 = vmul.f32 %v10920_v37, %v10990_v60  ;;  %v5732_v18 = vsel %vm3160_vm12, %v5731_v61, %v5730_v59  ;;  %v5572_v25 = vsel %vm3160_vm12, %v5571_v12, %v5570_v16 }
 0x86a   : > { %v5439_v28 = vadd.f32 %v5438_v0, %v5437_v19  ;;  %v5494_v55 = vrot.slane %v5493_v39, 2  ;;  %v5620_v2 = vrot.slane %v5603_v31, 5  ;;  %v5540_v3 = vrot.slane %v5523_v44, 5 }
 0x86b   : > { %v11007_v50 = vpop.f32.mrb[122].mxu1  ;;  %v5636_v20 = vmul.f32 %v10918_v48, %v11002_v54  ;;  %v5700_v62 = vrot.slane %v5683_v33, 5  ;;  %v5716_v49 = vmul.f32 %v10920_v37, %v11002_v54  ;;  %v5556_v56 = vmul.f32 %v10913_v21, %v11002_v54 }
 0x86c   : > { %v5440_v57 = vrot.slane %v5439_v28, 1  ;;  %v5495_v38 = vadd.f32 %v5494_v55, %v5493_v39  ;;  %v5442_v34 = vrot.slane %v11007_v50, 4  ;;  %v5465_v22 = vmul.f32 %v11007_v50, %v11007_v50  ;;  %v5397_v58 = vpop.f32.mrb[123].mxu1 }
 0x86d   : > { %v5621_v47 = vsel %vm3163_vm13, %v5620_v2, %v5619_v36  ;;  %v5541_v53 = vsel %vm3163_vm13, %v5540_v3, %v5539_v9  ;;  %v5653_v23 = vrot.slane %v5636_v20, 5  ;;  %v5701_v11 = vsel %vm3163_vm13, %v5700_v62, %v5699_v30 }
 0x86e   : > { %v11021_v59 = vadd.f32 %v5440_v57, %v5439_v28  ;;  %v5496_v45 = vrot.slane %v5495_v38, 1  ;;  %v5443_v1 = vadd.f32 %v5442_v34, %v11007_v50  ;;  %v5498_v29 = vrot.slane %v5465_v22, 4 }
 0x86f   : > { %v5654_v42 = vsel %vm3163_vm13, %v5653_v23, %v5652_v13  ;;  %v5733_v32 = vrot.slane %v5716_v49, 5  ;;  %v5573_v19 = vrot.slane %v5556_v56, 5 }
 0x870   : > { %v11026_v35 = vadd.f32 %v5496_v45, %v5495_v38  ;;  %v5444_v36 = vrot.slane %v5443_v1, 2  ;;  %v5499_v61 = vadd.f32 %v5498_v29, %v5465_v22  ;;  %v5604_v9 = vmul.f32 %v10918_v48, %v11021_v59 }
 0x871   : > { %v5524_v30 = vmul.f32 %v10913_v21, %v11021_v59  ;;  %v5684_v46 = vmul.f32 %v10920_v37, %v11021_v59  ;;  %v5734_v24 = vsel %vm3163_vm13, %v5733_v32, %v5732_v18  ;;  %v5574_v13 = vsel %vm3163_vm13, %v5573_v19, %v5572_v25 }
 0x872   : > { %v5445_v0 = vadd.f32 %v5444_v36, %v5443_v1  ;;  %v5500_v16 = vrot.slane %v5499_v61, 2  ;;  %v5622_v39 = vrot.slane %v5604_v9, 4  ;;  %v5637_v31 = vmul.f32 %v10918_v48, %v11026_v35 }
 0x873   : > { %v11038_v44 = vpop.f32.mrb[124].mxu1  ;;  %v5542_v33 = vrot.slane %v5524_v30, 4  ;;  %v5702_v12 = vrot.slane %v5684_v46, 4  ;;  %v5717_v28 = vmul.f32 %v10920_v37, %v11026_v35  ;;  %v5557_v55 = vmul.f32 %v10913_v21, %v11026_v35 }
 0x874   : > { %v5446_v2 = vrot.slane %v5445_v0, 1  ;;  %v5501_v18 = vadd.f32 %v5500_v16, %v5499_v61  ;;  %v5448_v3 = vrot.slane %v11038_v44, 4  ;;  %v5466_v20 = vmul.f32 %v11038_v44, %v11038_v44  ;;  %v5402_v62 = vpop.f32.mrb[125].mxu1 }
 0x875   : > { %v5623_v49 = vsel %vm3166_vm14, %v5622_v39, %v5621_v47  ;;  %v5543_v56 = vsel %vm3166_vm14, %v5542_v33, %v5541_v53  ;;  %v5655_v57 = vrot.slane %v5637_v31, 4  ;;  %v5703_v38 = vsel %vm3166_vm14, %v5702_v12, %v5701_v11 }
 0x876   : > { %v11050_v34 = vadd.f32 %v5446_v2, %v5445_v0  ;;  %v5502_v22 = vrot.slane %v5501_v18, 1  ;;  %v5449_v58 = vadd.f32 %v5448_v3, %v11038_v44  ;;  %v5504_v23 = vrot.slane %v5466_v20, 4 }
 0x877   : > { %v5656_v45 = vsel %vm3166_vm14, %v5655_v57, %v5654_v42  ;;  %v5735_v1 = vrot.slane %v5717_v28, 4  ;;  %v5575_v29 = vrot.slane %v5557_v55, 4  ;;  %v11056_v32 = vmul.f32 %v10926_v10, %v10939_v40 }
 0x878   : > { %v11058_v47 = vadd.f32 %v5502_v22, %v5501_v18  ;;  %v5450_v53 = vrot.slane %v5449_v58, 2  ;;  %v5505_v25 = vadd.f32 %v5504_v23, %v5466_v20  ;;  %v5605_v11 = vmul.f32 %v10918_v48, %v11050_v34 }
 0x879   : > { %v5525_v19 = vmul.f32 %v10913_v21, %v11050_v34  ;;  %v5685_v36 = vmul.f32 %v10920_v37, %v11050_v34  ;;  %v5736_v42 = vsel %vm3166_vm14, %v5735_v1, %v5734_v24  ;;  %v5576_v61 = vsel %vm3166_vm14, %v5575_v29, %v5574_v13 }
 0x87a   : > { %v5451_v9 = vadd.f32 %v5450_v53, %v5449_v58  ;;  %v5506_v40 = vrot.slane %v5505_v25, 2  ;;  %v5624_v30 = vrot.slane %v5605_v11, 3  ;;  %v5638_v46 = vmul.f32 %v10918_v48, %v11058_v47 }
 0x87b   : > { %v11070_v0 = vpop.f32.mrb[126].mxu1  ;;  %v5544_v16 = vrot.slane %v5525_v19, 3  ;;  %v5704_v39 = vrot.slane %v5685_v36, 3  ;;  %v5718_v31 = vmul.f32 %v10920_v37, %v11058_v47  ;;  %v5558_v33 = vmul.f32 %v10913_v21, %v11058_v47 }
 0x87c   : > { %v5452_v12 = vrot.slane %v5451_v9, 1  ;;  %v5507_v24 = vadd.f32 %v5506_v40, %v5505_v25  ;;  %v5454_v13 = vrot.slane %v11070_v0, 4  ;;  %v5467_v28 = vmul.f32 %v11070_v0, %v11070_v0  ;;  %v5407_v55 = vpop.f32.mrb[127].mxu1 }
 0x87d   : > { %v5625_v2 = vsel %vm3169_vm15, %v5624_v30, %v5623_v49  ;;  %v5545_v18 = vsel %vm3169_vm15, %v5544_v16, %v5543_v56  ;;  %v5657_v3 = vrot.slane %v5638_v46, 3  ;;  %v5705_v20 = vsel %vm3169_vm15, %v5704_v39, %v5703_v38 }
 0x87e   : > { %v11082_v62 = vadd.f32 %v5452_v12, %v5451_v9  ;;  %v5508_v57 = vrot.slane %v5507_v24, 1  ;;  %v5455_v22 = vadd.f32 %v5454_v13, %v11070_v0  ;;  %v5510_v58 = vrot.slane %v5467_v28, 4 }
 0x87f   : > { %v5658_v23 = vsel %vm3169_vm15, %v5657_v3, %v5656_v45  ;;  %v5737_v1 = vrot.slane %v5718_v31, 3  ;;  %v5577_v29 = vrot.slane %v5558_v33, 3  ;;  %v5795_v53 = vmul.f32 %v10926_v10, %v10969_v15 }
 0x880   : > { %v5509_v25 = vadd.f32 %v5508_v57, %v5507_v24  ;;  %v5456_v49 = vrot.slane %v5455_v22, 2  ;;  %v5511_v11 = vadd.f32 %v5510_v58, %v5467_v28  ;;  %v5606_v56 = vmul.f32 %v10918_v48, %v11082_v62 }
 0x881   : > { %v5526_v38 = vmul.f32 %v10913_v21, %v11082_v62  ;;  %v5686_v19 = vmul.f32 %v10920_v37, %v11082_v62  ;;  %v5738_v36 = vsel %vm3169_vm15, %v5737_v1, %v5736_v42  ;;  %v5578_v45 = vsel %vm3169_vm15, %v5577_v29, %v5576_v61 }
 0x882   : > { %v5457_v9 = vadd.f32 %v5456_v49, %v5455_v22  ;;  %v5512_v40 = vrot.slane %v5511_v11, 2  ;;  %v5626_v30 = vrot.slane %v5606_v56, 2  ;;  %v5639_v15 = vmul.f32 %v10918_v48, %v5509_v25 }
 0x883   : > { %v5546_v46 = vrot.slane %v5526_v38, 2  ;;  %v5706_v16 = vrot.slane %v5686_v19, 2  ;;  %v5719_v39 = vmul.f32 %v10920_v37, %v5509_v25  ;;  %v5559_v31 = vmul.f32 %v10913_v21, %v5509_v25 }
 0x884   : > { %v5458_v33 = vrot.slane %v5457_v9, 1  ;;  %v5513_v12 = vadd.f32 %v5512_v40, %v5511_v11  ;;  %v5627_v24 = vsel %vm3172_vm1, %v5626_v30, %v5625_v2  ;;  %v5659_v13 = vrot.slane %v5639_v15, 2 }
 0x885   : > { %v5547_v42 = vsel %vm3172_vm1, %v5546_v46, %v5545_v18  ;;  %v5707_v61 = vsel %vm3172_vm1, %v5706_v16, %v5705_v20  ;;  %v5739_v28 = vrot.slane %v5719_v39, 2  ;;  %v5579_v55 = vrot.slane %v5559_v31, 2 }
 0x886   : > { %v5459_v3 = vadd.f32 %v5458_v33, %v5457_v9  ;;  %v5514_v57 = vrot.slane %v5513_v12, 1  ;;  %v5660_v22 = vsel %vm3172_vm1, %v5659_v13, %v5658_v23  ;;  %v5796_v58 = vmul.f32 %v10926_v10, %v11002_v54 }
 0x887   : > { %v5740_v1 = vsel %vm3172_vm1, %v5739_v28, %v5738_v36  ;;  %v5580_v29 = vsel %vm3172_vm1, %v5579_v55, %v5578_v45  ;;  %v5797_v2 = vmul.f32 %v10926_v10, %v11026_v35  ;;  %v5798_v18 = vmul.f32 %v10926_v10, %v11058_v47 }
 0x888   : > { %v5515_v20 = vadd.f32 %v5514_v57, %v5513_v12  ;;  %v5607_v49 = vmul.f32 %v10918_v48, %v5459_v3  ;;  %v5527_v11 = vmul.f32 %v10913_v21, %v5459_v3  ;;  %v5687_v23 = vmul.f32 %v10920_v37, %v5459_v3 }
 0x889   : > { %v5799_v56 = vmul.f32 %v10926_v10, %v5509_v25  ;;  %v5809_v54 = vrot.slane %v11056_v32, 7  ;;  %v5811_v38 = vrot.slane %v5795_v53, 6  ;;  %v5813_v19 = vrot.slane %v5796_v58, 5 }
 0x88a   : > { %v5628_v36 = vrot.slane %v5607_v49, 1  ;;  %v5548_v45 = vrot.slane %v5527_v11, 1  ;;  %v5640_v35 = vmul.f32 %v10918_v48, %v5515_v20  ;;  %v5708_v9 = vrot.slane %v5687_v23, 1 }
 0x88b   : > { %v5720_v47 = vmul.f32 %v10920_v37, %v5515_v20  ;;  %v5560_v40 = vmul.f32 %v10913_v21, %v5515_v20  ;;  %v5800_v30 = vmul.f32 %v10926_v10, %v5515_v20  ;;  %v5810_v15 = vsel %vm3157_vm11, %v5809_v54, %v10948_v51 }
 0x88c   : > { %v5629_v25 = vsel %vm3175_vm10, %v5628_v36, %v5627_v24  ;;  %v5549_v32 = vsel %vm3175_vm10, %v5548_v45, %v5547_v42  ;;  %v5661_v53 = vrot.slane %v5640_v35, 1  ;;  %v5709_v46 = vsel %vm3175_vm10, %v5708_v9, %v5707_v61  ;;  %v8468_v36 = vld [vmem:[%s11663_s9 + $0x58] sm:$0xff]   ;;  %v8470_v35 = vld [vmem:[%s11663_s9 + $0x60] sm:$0xff]  }
 0x88d   : > { %5631 = vadd.xlane.f32.xlu1 %v5629_v25  ;;  %5551 = vadd.xlane.f32.xlu0 %v5549_v32  ;;  %v5741_v16 = vrot.slane %v5720_v47, 1  ;;  %v5581_v39 = vrot.slane %v5560_v40, 1  ;;  %v5812_v31 = vsel %vm3160_vm12, %v5811_v38, %v5810_v15  ;;  %v5815_v33 = vrot.slane %v5797_v2, 4  ;;  %v8469_v45 = vld [vmem:[%s11663_s9 + $0x18] sm:$0xff]   ;;  %v8471_v9 = vld [vmem:[%s11663_s9 + $0xc0] sm:$0xff]   ;;  %v8474_v40 = vld [vmem:[%s11663_s9 + $0xc8] sm:$0xff]  }
 0x88e   : > { %v5662_v12 = vsel %vm3175_vm10, %v5661_v53, %v5660_v22  ;;  %v5814_v13 = vsel %vm3163_vm13, %v5813_v19, %v5812_v31  ;;  %v5817_v28 = vrot.slane %v5798_v18, 3  ;;  %v5819_v51 = vrot.slane %v5799_v56, 2  ;;  %v8467_v19 = vld [vmem:[%s11663_s9 + $0x10] sm:$0xff]   ;;  %v8473_v47 = vld [vmem:[%s11663_s9 + $0x80] sm:$0xff]   ;;  %7630 = vmatprep.subr.bf16.mxu1 %v8471_v9  ;;  %v8475_v15 = vld [vmem:[%s11663_s9 + $0x88] sm:$0xff]  }
 0x88f   : > { %v5742_v24 = vsel %vm3175_vm10, %v5741_v16, %v5740_v1  ;;  %v5582_v42 = vsel %vm3175_vm10, %v5581_v39, %v5580_v29  ;;  %v5816_v55 = vsel %vm3166_vm14, %v5815_v33, %v5814_v13  ;;  %v5821_v61 = vrot.slane %v5800_v30, 1  ;;  %v8472_v30 = vld [vmem:[%s11663_s9 + $0x20] sm:$0xff]   ;;  %7631 = vmatpush3.bf16.msra.mxu1 %v8473_v47  ;;  %v8480_v25 = vld [vmem:[%s11663_s9 + $0x68] sm:$0xff]   ;;  %v8476_v32 = vld [vmem:[%s11663_s9 + $0xd0] sm:$0xff]  }
 0x890   : > { %v5818_v57 = vsel %vm3169_vm15, %v5817_v28, %v5816_v55  ;;  %v5762_v58 = vmul.f32 %v10926_v10, %v10960_v27  ;;  %v5763_v2 = vmul.f32 %v10926_v10, %v10990_v60  ;;  %v5764_v22 = vmul.f32 %v10926_v10, %v11021_v59  ;;  %7632 = vmatprep.subr.bf16.mxu1 %v8474_v40  ;;  %v8482_v53 = vld [vmem:[%s11663_s9 + $0x28] sm:$0xff]   ;;  %v8486_v16 = vld [vmem:[%s11663_s9 + $0x70] sm:$0xff]   ;;  %v8478_v39 = vld [vmem:[%s11663_s9 + $0xd8] sm:$0xff]  }
 0x891   : > { %5664 = vadd.xlane.f32.xlu1 %v5662_v12  ;;  %5711 = vadd.xlane.f32.xlu0 %v5709_v46  ;;  %v5820_v1 = vsel %vm3172_vm1, %v5819_v51, %v5818_v57  ;;  %v5765_v29 = vmul.f32 %v10926_v10, %v11050_v34  ;;  %v5766_v18 = vmul.f32 %v10926_v10, %v11082_v62  ;;  %v8477_v46 = vld [vmem:[%s11663_s9 + $0x90] sm:$0xff]   ;;  %v8479_v33 = vld [vmem:[%s11663_s9 + $0x98] sm:$0xff]   ;;  %v8481_v13 = vld [vmem:[%s11663_s9 + $0xe0] sm:$0xff]  }
 0x892   : > { %v5822_v20 = vsel %vm3175_vm10, %v5821_v61, %v5820_v1  ;;  %v5767_v27 = vmul.f32 %v10926_v10, %v5459_v3  ;;  %v5777_v60 = vsel %vm3157_vm11, %v5776_v41, %v10932_v43  ;;  %v5778_v59 = vrot.slane %v5762_v58, 6  ;;  %v8466_v41 = vld [vmem:[%s11663_s9 + $0x50] sm:$0xff]   ;;  %v8490_v12 = vld [vmem:[%s11663_s9 + $0x78] sm:$0xff]   ;;  %v8483_v51 = vld [vmem:[%s11663_s9 + $0xa0] sm:$0xff]  }
 0x893   : > { %v5780_v49 = vrot.slane %v5763_v2, 5  ;;  %v5782_v11 = vrot.slane %v5764_v22, 4  ;;  %v5784_v23 = vrot.slane %v5765_v29, 3  ;;  %v5786_v54 = vrot.slane %v5766_v18, 2  ;;  %7612 = vmatprep.subr.bf16.mxu0 %v8466_v41  ;;  %7633 = vmatpush3.bf16.msra.mxu1 %v8475_v15  ;;  %v8487_v31 = vld [vmem:[%s11663_s9 + $0x30] sm:$0xff]   ;;  %v8491_v28 = vld [vmem:[%s11663_s9 + $0x38] sm:$0xff]  }
 0x894   : > { %v5779_v56 = vsel %vm3160_vm12, %v5778_v59, %v5777_v60  ;;  %v5788_v62 = vrot.slane %v5767_v27, 1  ;;  %7613 = vmatpush3.bf16.msra.mxu0 %v8467_v19  ;;  %7634 = vmatprep.subr.bf16.mxu1 %v8476_v32  ;;  %v8488_v55 = vld [vmem:[%s11663_s9 + $0xf0] sm:$0xff]   ;;  %v8492_v57 = vld [vmem:[%s11663_s9 + $0xf8] sm:$0xff]  }
 0x895   : > { %5744 = vadd.xlane.f32.xlu1 %v5742_v24  ;;  %5584 = vadd.xlane.f32.xlu0 %v5582_v42  ;;  %v5781_v34 = vsel %vm3163_vm13, %v5780_v49, %v5779_v56  ;;  %v8484_v24 = vld [vmem:[%s11663_s9 + $0xe8] sm:$0xff]   ;;  %v8489_v61 = vld [vmem:[%s11663_s9 + $0xb0] sm:$0xff]   ;;  %v8493_v58 = vld [vmem:[%s11663_s9 + $0xb8] sm:$0xff]  }
 0x896   : > { %v5783_v38 = vsel %vm3166_vm14, %v5782_v11, %v5781_v34  ;;  %7614 = vmatprep.subr.bf16.mxu0 %v8468_v36  ;;  %v8485_v42 = vld [vmem:[%s11663_s9 + $0xa8] sm:$0xff]  }
 0x897   : > { %v5785_v3 = vsel %vm3169_vm15, %v5784_v23, %v5783_v38  ;;  %7635 = vmatpush3.bf16.msra.mxu1 %v8477_v46 }
 0x898   : > { %v5787_v8 = vsel %vm3172_vm1, %v5786_v54, %v5785_v3  ;;  %7615 = vmatpush3.bf16.msra.mxu0 %v8469_v45  ;;  %7636 = vmatprep.subr.bf16.mxu1 %v8478_v39 }
 0x899   : > { %5824 = vadd.xlane.f32.xlu1 %v5822_v20  ;;  %v5789_v43 = vsel %vm3175_vm10, %v5788_v62, %v5787_v8  ;;  %7616 = vmatprep.subr.bf16.mxu0 %v8470_v35 }
 0x89a   : > { %5791 = vadd.xlane.f32.xlu0 %v5789_v43 }
 0x89b   : > { %7637 = vmatpush3.bf16.msra.mxu1 %v8479_v33 }
 0x89c   : > { %7617 = vmatpush3.bf16.msra.mxu0 %v8472_v30  ;;  %7638 = vmatprep.subr.bf16.mxu1 %v8481_v13 }
 0x89d   : > { %7618 = vmatprep.subr.bf16.mxu0 %v8480_v25 }
 0x89f   : > { %7639 = vmatpush3.bf16.msra.mxu1 %v8483_v51 }
 0x8a0   : > { %7619 = vmatpush3.bf16.msra.mxu0 %v8482_v53  ;;  %7640 = vmatprep.subr.bf16.mxu1 %v8484_v24 }
 0x8a1   : > { %7620 = vmatprep.subr.bf16.mxu0 %v8486_v16 }
 0x8a3   : > { %7641 = vmatpush3.bf16.msra.mxu1 %v8485_v42 }
 0x8a4   : > { %7621 = vmatpush3.bf16.msra.mxu0 %v8487_v31  ;;  %7642 = vmatprep.subr.bf16.mxu1 %v8488_v55 }
 0x8a5   : > { %7622 = vmatprep.subr.bf16.mxu0 %v8490_v12 }
 0x8a7   : > { %7643 = vmatpush3.bf16.msra.mxu1 %v8489_v61 }
 0x8a8   : > { %7623 = vmatpush3.bf16.msra.mxu0 %v8491_v28  ;;  %7644 = vmatprep.subr.bf16.mxu1 %v8492_v57 }
 0x8a9   : > { %7677 = vmatprep.subr.bf16.mxu0 %v8805_v17 }
 0x8ab   : > { %7645 = vmatpush3.bf16.msra.mxu1 %v8493_v58 }
 0x8ac   : > { %7697 = vmatprep.subr.bf16.mxu1 %v8805_v17 }
 0x91a   : > { %v5632_v2 = vpop.xlane.xlu1 %5631  ;;  %v5552_v22 = vpop.xlane.xlu0 %5551 }
 0x91b   : > { %v5666_v1 = vmul.f32 0.01, %v5632_v2  ;;  %v5586_v29 = vmul.f32 0.01, %v5552_v22 }
 0x91d   : > { %v5668_v27 = vmul.f32 %v5666_v1, %v5666_v1  ;;  %v5672_v11 = vmul.f32 %v5666_v1, %v10918_v48  ;;  %v5588_v23 = vmul.f32 %v5586_v29, %v5586_v29  ;;  %v5592_v34 = vmul.f32 %v5586_v29, %v10913_v21 }
 0x91e   : > { %v5665_v18 = vpop.xlane.xlu1 %5664  ;;  %v5712_v20 = vpop.xlane.xlu0 %5711 }
 0x91f   : > { %v5667_v60 = vmul.f32 0.01, %v5665_v18  ;;  %v5746_v59 = vmul.f32 0.01, %v5712_v20  ;;  %v5673_v36 = vadd.f32 %v5672_v11, %v5592_v34 }
 0x921   : > { %v5669_v49 = vsub.f32 %v5667_v60, %v5668_v27  ;;  %v5748_v62 = vmul.f32 %v5746_v59, %v5746_v59  ;;  %v5752_v43 = vmul.f32 %v5746_v59, %v10920_v37 }
 0x922   : > { %v5745_v56 = vpop.xlane.xlu1 %5744  ;;  %v5585_v54 = vpop.xlane.xlu0 %5584 }
 0x923   : > { %v5747_v38 = vmul.f32 0.01, %v5745_v56  ;;  %v5587_v3 = vmul.f32 0.01, %v5585_v54  ;;  %v5670_v8 = vadd.f32 1e-05, %v5669_v49  ;;  %v5753_v30 = vadd.f32 %v5752_v43, %v5673_v36 }
 0x925   : > { %v5749_v41 = vsub.f32 %v5747_v38, %v5748_v62  ;;  %v5589_v19 = vsub.f32 %v5587_v3, %v5588_v23  ;;  %8712 = vrsqrt.f32 %v5670_v8 }
 0x926   : > { %v5825_v35 = vpop.xlane.xlu1 %5824 }
 0x927   : > { %v5590_v45 = vadd.f32 1e-05, %v5589_v19  ;;  %v5792_v9 = vpop.xlane.xlu0 %5791  ;;  %v5750_v47 = vadd.f32 1e-05, %v5749_v41  ;;  %v5827_v15 = vmul.f32 0.01, %v5825_v35 }
 0x928   : > { %v5826_v40 = vmul.f32 0.01, %v5792_v9 }
 0x929   : > { %8714 = vrsqrt.f32 %v5590_v45 }
 0x92a   : > { %v5828_v25 = vmul.f32 %v5826_v40, %v5826_v40  ;;  %v5832_v32 = vmul.f32 %v5826_v40, %v10926_v10  ;;  %8716 = vrsqrt.f32 %v5750_v47 }
 0x92c   : > { %v5829_v53 = vsub.f32 %v5827_v15, %v5828_v25  ;;  %v5833_v46 = vadd.f32 %v5832_v32, %v5753_v30 }
 0x92e   : > { %v5830_v16 = vadd.f32 1e-05, %v5829_v53  ;;  %v5837_v39 = vcombine.high %v5833_v46, %v5833_v46  ;;  %v5844_v31 = vrot.slane %v5833_v46, %v10131_v7 }
 0x92f   : > { %v8713_v33 = vpop.eup %8712 }
 0x930   : > { %8718 = vrsqrt.f32 %v5830_v16  ;;  %v5851_v12 = vrot.slane %v5837_v39, %v10131_v7  ;;  %v5852_v13 = vcombine.high %v5844_v31, %v5844_v31  ;;  %v5674_v51 = vmul.f32 %v8713_v33, %v10918_v48  ;;  %v5411_v16 = vld [vmem:[%s11666_s12 + $0x5] ss:$0 sm:$0xff] }
 0x931   : > { %v5860_v61 = vrot.slane %v5844_v31, %v10131_v7 }
 0x932   : > { %v5853_v55 = vcombine.high %v5851_v12, %v5851_v12  ;;  %v5874_v57 = vrot.slane %v5852_v13, %v10131_v7  ;;  %v5867_v2 = vrot.slane %v5851_v12, %v10131_v7 }
 0x933   : > { %v8715_v28 = vpop.eup %8714  ;;  %v5882_v18 = vcombine.high %v5860_v61, %v5860_v61  ;;  %v5889_v59 = vrot.slane %v5860_v61, %v9634_v5 }
 0x934   : > { %v5594_v24 = vmul.f32 %v8715_v28, %v10913_v21  ;;  %v8717_v42 = vpop.eup %8716  ;;  %v5881_v29 = vrot.slane %v5853_v55, %v10131_v7  ;;  %v5884_v20 = vcombine.high %v5874_v57, %v5874_v57  ;;  %v5883_v21 = vcombine.high %v5867_v2, %v5867_v2 }
 0x935   : > { %v5754_v22 = vmul.f32 %v8717_v42, %v10920_v37  ;;  %v5893_v11 = vrot.slane %v5874_v57, %v9634_v5  ;;  %v5897_v23 = vrot.slane %v5882_v18, %v9634_v5  ;;  %v5905_v34 = vrot.slane %v5867_v2, %v9634_v5 }
 0x936   : > { %v5675_v58 = vadd.f32 %v5674_v51, %v5594_v24  ;;  %v5885_v49 = vcombine.high %v5881_v29, %v5881_v29  ;;  %v5901_v56 = vrot.slane %v5884_v20, %v9634_v5  ;;  %v5909_v62 = vrot.slane %v5881_v29, %v9634_v5 }
 0x937   : > { %v5926_v38 = vsub.f32 %v10895_v26, %v5889_v59  ;;  %v5927_v19 = vsub.f32 %v10901_v52, %v5893_v11  ;;  %v5928_v36 = vsub.f32 %v10915_v63, %v5897_v23  ;;  %v5930_v40 = vsub.f32 %v10979_v6, %v5905_v34  ;;  %v5410_v63 = vld [vmem:[%s11666_s12 + $0x4] ss:$0 sm:$0xff] }
 0x938   : > { %v5755_v27 = vadd.f32 %v5754_v22, %v5675_v58  ;;  %v5917_v41 = vrot.slane %v5885_v49, %v9634_v5  ;;  %v5929_v45 = vsub.f32 %v10950_v14, %v5901_v56  ;;  %v5931_v30 = vsub.f32 %v11007_v50, %v5909_v62 }
 0x93a   : > { %v8719_v1 = vpop.eup %8718  ;;  %v5933_v6 = vsub.f32 %v11070_v0, %v5917_v41 }
 0x93b   : > { %v5834_v48 = vmul.f32 %v8719_v1, %v10926_v10  ;;  %v5913_v10 = vrot.slane %v5883_v21, %v9634_v5 }
 0x93d   : > { %v5835_v60 = vadd.f32 %v5834_v48, %v5755_v27  ;;  %v5932_v15 = vsub.f32 %v11038_v44, %v5913_v10 }
 0x93f   : > { %v5935_v37 = vcombine.high %v5835_v60, %v5835_v60  ;;  %v5942_v54 = vrot.slane %v5835_v60, %v10131_v7 }
 0x941   : > { %v5949_v3 = vrot.slane %v5935_v37, %v10131_v7  ;;  %v5950_v8 = vcombine.high %v5942_v54, %v5942_v54  ;;  %v5958_v43 = vrot.slane %v5942_v54, %v10131_v7 }
 0x943   : > { %v5951_v35 = vcombine.high %v5949_v3, %v5949_v3  ;;  %v5965_v9 = vrot.slane %v5949_v3, %v10131_v7  ;;  %v5972_v26 = vrot.slane %v5950_v8, %v10131_v7  ;;  %v5980_v47 = vcombine.high %v5958_v43, %v5958_v43 }
 0x944   : > { %v5987_v52 = vrot.slane %v5958_v43, %v9634_v5 }
 0x945   : > { %v5979_v14 = vrot.slane %v5951_v35, %v10131_v7  ;;  %v5981_v25 = vcombine.high %v5965_v9, %v5965_v9  ;;  %v5982_v32 = vcombine.high %v5972_v26, %v5972_v26  ;;  %v5991_v53 = vrot.slane %v5972_v26, %v9634_v5 }
 0x946   : > { %v5995_v50 = vrot.slane %v5980_v47, %v9634_v5  ;;  %v6003_v44 = vrot.slane %v5965_v9, %v9634_v5  ;;  %v6024_v46 = vmul.f32 %v5987_v52, %v5926_v38 }
 0x947   : > { %v5983_v7 = vcombine.high %v5979_v14, %v5979_v14  ;;  %v5999_v39 = vrot.slane %v5982_v32, %v9634_v5  ;;  %v6007_v31 = vrot.slane %v5979_v14, %v9634_v5  ;;  %v6011_v33 = vrot.slane %v5981_v25, %v9634_v5 }
 0x948   : > { %v6025_v12 = vmul.f32 %v5991_v53, %v5927_v19  ;;  %v6026_v0 = vmul.f32 %v5995_v50, %v5928_v36  ;;  %v6028_v13 = vmul.f32 %v6003_v44, %v5930_v40  ;;  %v6032_v28 = vmul.f32 %v6024_v46, %v5410_v63 }
 0x949   : > { %v6015_v51 = vrot.slane %v5983_v7, %v9634_v5  ;;  %v6027_v24 = vmul.f32 %v5999_v39, %v5929_v45  ;;  %v6029_v42 = vmul.f32 %v6007_v31, %v5931_v30  ;;  %v6030_v55 = vmul.f32 %v6011_v33, %v5932_v15 }
 0x94a   : > { %v6033_v61 = vmul.f32 %v6025_v12, %v5410_v63  ;;  %v6034_v57 = vmul.f32 %v6026_v0, %v5410_v63  ;;  %v6036_v58 = vmul.f32 %v6028_v13, %v5410_v63  ;;  %v11295_v2 = vadd.f32 %v6032_v28, %v5411_v16 }
 0x94b   : > { %v6031_v22 = vmul.f32 %v6015_v51, %v5933_v6  ;;  %v6035_v1 = vmul.f32 %v6027_v24, %v5410_v63  ;;  %v6037_v29 = vmul.f32 %v6029_v42, %v5410_v63  ;;  %v6038_v18 = vmul.f32 %v6030_v55, %v5410_v63 }
 0x94c   : > { %v11297_v20 = vadd.f32 %v6033_v61, %v5411_v16  ;;  %v11299_v27 = vadd.f32 %v6034_v57, %v5411_v16  ;;  %v11301_v48 = vadd.f32 %v6036_v58, %v5411_v16  ;;  %v6051_v5 = vsel %vm6050_vm2, %v11295_v2, 0.0 }
 0x94d   : > { %v6039_v21 = vmul.f32 %v6031_v22, %v5410_v63  ;;  %v11306_v60 = vadd.f32 %v6035_v1, %v5411_v16  ;;  %v11308_v59 = vadd.f32 %v6037_v29, %v5411_v16  ;;  %v11310_v49 = vadd.f32 %v6038_v18, %v5411_v16 }
 0x94e   : > { %v6052_v11 = vsel %vm6050_vm2, %v11297_v20, 0.0  ;;  %v11318_v23 = vsel %vm6050_vm2, %v11299_v27, 0.0  ;;  %v6059_v56 = vrot.slane %v6051_v5, 4  ;;  %v6165_v37 = vsel %vm6164_vm3, %v11295_v2, 0.0 }
 0x94f   : > { %v11323_v54 = vadd.f32 %v6039_v21, %v5411_v16  ;;  %v6065_v34 = vrot.slane %v6052_v11, 4  ;;  %v6071_v62 = vrot.slane %v11318_v23, 4  ;;  %v6166_v10 = vsel %vm6164_vm3, %v11297_v20, 0.0 }
 0x950   : > { %v11329_v38 = vadd.f32 %v6059_v56, %v6051_v5  ;;  %v11334_v3 = vsel %vm6164_vm3, %v11299_v27, 0.0  ;;  %v6173_v8 = vrot.slane %v6165_v37, 4  ;;  %v6179_v43 = vrot.slane %v6166_v10, 4 }
 0x951   : > { %v11336_v41 = vadd.f32 %v6065_v34, %v6052_v11  ;;  %v6185_v19 = vrot.slane %v11334_v3, 4  ;;  %v11342_v36 = vsel %vm6278_vm4, %v11295_v2, 0.0  ;;  %v6108_v45 = vsel %vm6107_vm5, %v11295_v2, 0.0 }
 0x952   : > { %v6061_v35 = vrot.slane %v11329_v38, 2  ;;  %v11348_v9 = vadd.f32 %v6173_v8, %v6165_v37  ;;  %v11350_v26 = vadd.f32 %v6179_v43, %v6166_v10  ;;  %v6287_v47 = vrot.slane %v11342_v36, 4 }
 0x953   : > { %v6109_v40 = vsel %vm6107_vm5, %v11297_v20, 0.0  ;;  %v6110_v30 = vsel %vm6107_vm5, %v11299_v27, 0.0  ;;  %v6111_v15 = vsel %vm6107_vm5, %v11306_v60, 0.0  ;;  %v6112_v52 = vsel %vm6107_vm5, %v11301_v48, 0.0 }
 0x954   : > { %v6175_v63 = vrot.slane %v11348_v9, 2  ;;  %v6113_v14 = vsel %vm6107_vm5, %v11308_v59, 0.0  ;;  %v6114_v25 = vsel %vm6107_vm5, %v11310_v49, 0.0  ;;  %v6115_v32 = vsel %vm6107_vm5, %v11323_v54, 0.0 }
 0x955   : > { %v6116_v53 = vrot.slane %v6108_v45, 4  ;;  %v6122_v6 = vrot.slane %v6109_v40, 4  ;;  %v6128_v50 = vrot.slane %v6110_v30, 4  ;;  %v6134_v44 = vrot.slane %v6111_v15, 4 }
 0x956   : > { %v6140_v46 = vrot.slane %v6112_v52, 4  ;;  %v6146_v16 = vrot.slane %v6113_v14, 4  ;;  %v6152_v7 = vrot.slane %v6114_v25, 4  ;;  %v6158_v39 = vrot.slane %v6115_v32, 4 }
 0x957   : > { %v6117_v31 = vadd.f32 %v6116_v53, %v6108_v45  ;;  %v6123_v33 = vadd.f32 %v6122_v6, %v6109_v40  ;;  %v6129_v12 = vadd.f32 %v6128_v50, %v6110_v30  ;;  %v6135_v0 = vadd.f32 %v6134_v44, %v6111_v15 }
 0x958   : > { %v6141_v13 = vadd.f32 %v6140_v46, %v6112_v52  ;;  %v6147_v28 = vadd.f32 %v6146_v16, %v6113_v14  ;;  %v6153_v51 = vadd.f32 %v6152_v7, %v6114_v25  ;;  %v6159_v24 = vadd.f32 %v6158_v39, %v6115_v32 }
 0x959   : > { %v6118_v42 = vrot.slane %v6117_v31, 2  ;;  %v6124_v55 = vrot.slane %v6123_v33, 2  ;;  %v6130_v61 = vrot.slane %v6129_v12, 2  ;;  %v6136_v57 = vrot.slane %v6135_v0, 2 }
 0x95a   : > { %v6142_v58 = vrot.slane %v6141_v13, 2  ;;  %v6148_v22 = vrot.slane %v6147_v28, 2  ;;  %v6154_v1 = vrot.slane %v6153_v51, 2  ;;  %v6160_v29 = vrot.slane %v6159_v24, 2 }
 0x95b   : > { %v6119_v18 = vadd.f32 %v6118_v42, %v6117_v31  ;;  %v6125_v5 = vadd.f32 %v6124_v55, %v6123_v33  ;;  %v6131_v21 = vadd.f32 %v6130_v61, %v6129_v12  ;;  %v6137_v11 = vadd.f32 %v6136_v57, %v6135_v0 }
 0x95c   : > { %v6143_v56 = vadd.f32 %v6142_v58, %v6141_v13  ;;  %v6149_v37 = vadd.f32 %v6148_v22, %v6147_v28  ;;  %v6155_v34 = vadd.f32 %v6154_v1, %v6153_v51  ;;  %v6161_v10 = vadd.f32 %v6160_v29, %v6159_v24 }
 0x95d   : > { %v6120_v8 = vrot.slane %v6119_v18, 1  ;;  %v6126_v43 = vrot.slane %v6125_v5, 1  ;;  %v6132_v45 = vrot.slane %v6131_v21, 1  ;;  %v6138_v40 = vrot.slane %v6137_v11, 1 }
 0x95e   : > { %v6144_v30 = vrot.slane %v6143_v56, 1  ;;  %v6150_v15 = vrot.slane %v6149_v37, 1  ;;  %v6156_v52 = vrot.slane %v6155_v34, 1  ;;  %v6162_v14 = vrot.slane %v6161_v10, 1 }
 0x95f   : > { %v6121_v25 = vadd.f32 %v6120_v8, %v6119_v18  ;;  %v6127_v32 = vadd.f32 %v6126_v43, %v6125_v5  ;;  %v6133_v53 = vadd.f32 %v6132_v45, %v6131_v21  ;;  %v6139_v6 = vadd.f32 %v6138_v40, %v6137_v11 }
 0x960   : > { %v6145_v50 = vadd.f32 %v6144_v30, %v6143_v56  ;;  %v6151_v44 = vadd.f32 %v6150_v15, %v6149_v37  ;;  %v6157_v46 = vadd.f32 %v6156_v52, %v6155_v34  ;;  %v6163_v16 = vadd.f32 %v6162_v14, %v6161_v10 }
 0x961   : > { %v6359_v7 = vsel %vm3157_vm11, %v6127_v32, %v6121_v25  ;;  %v6222_v39 = vsel %vm6221_vm6, %v11295_v2, 0.0  ;;  %v6223_v31 = vsel %vm6221_vm6, %v11297_v20, 0.0  ;;  %v6224_v33 = vsel %vm6221_vm6, %v11299_v27, 0.0 }
 0x962   : > { %v6360_v12 = vsel %vm3160_vm12, %v6133_v53, %v6359_v7  ;;  %v6225_v0 = vsel %vm6221_vm6, %v11306_v60, 0.0  ;;  %v6226_v13 = vsel %vm6221_vm6, %v11301_v48, 0.0  ;;  %v6227_v2 = vsel %vm6221_vm6, %v11308_v59, 0.0 }
 0x963   : > { %v6361_v28 = vsel %vm3163_vm13, %v6139_v6, %v6360_v12  ;;  %v6228_v51 = vsel %vm6221_vm6, %v11310_v49, 0.0  ;;  %v6229_v24 = vsel %vm6221_vm6, %v11323_v54, 0.0  ;;  %v6230_v42 = vrot.slane %v6222_v39, 4 }
 0x964   : > { %v6362_v55 = vsel %vm3166_vm14, %v6145_v50, %v6361_v28  ;;  %v6236_v61 = vrot.slane %v6223_v31, 4  ;;  %v6242_v57 = vrot.slane %v6224_v33, 4  ;;  %v6248_v58 = vrot.slane %v6225_v0, 4 }
 0x965   : > { %v6363_v22 = vsel %vm3169_vm15, %v6151_v44, %v6362_v55  ;;  %v6231_v1 = vadd.f32 %v6230_v42, %v6222_v39  ;;  %v6254_v29 = vrot.slane %v6226_v13, 4  ;;  %v6260_v18 = vrot.slane %v6227_v2, 4 }
 0x966   : > { %v6364_v5 = vsel %vm3172_vm1, %v6157_v46, %v6363_v22  ;;  %v6237_v21 = vadd.f32 %v6236_v61, %v6223_v31  ;;  %v6243_v11 = vadd.f32 %v6242_v57, %v6224_v33  ;;  %v6249_v56 = vadd.f32 %v6248_v58, %v6225_v0 }
 0x967   : > { %v6365_v37 = vsel %vm3175_vm10, %v6163_v16, %v6364_v5  ;;  %v6232_v34 = vrot.slane %v6231_v1, 2  ;;  %v6255_v10 = vadd.f32 %v6254_v29, %v6226_v13  ;;  %v6261_v8 = vadd.f32 %v6260_v18, %v6227_v2 }
 0x968   : > { %v6416_v43 = vpack.c.bf16 %v6365_v37, %v6365_v37  ;;  %v6238_v45 = vrot.slane %v6237_v21, 2  ;;  %v6244_v40 = vrot.slane %v6243_v11, 2  ;;  %v6250_v30 = vrot.slane %v6249_v56, 2 }
 0x969   : > { %v6233_v15 = vadd.f32 %v6232_v34, %v6231_v1  ;;  %v6256_v52 = vrot.slane %v6255_v10, 2  ;;  %v6262_v14 = vrot.slane %v6261_v8, 2  ;;  %v6266_v25 = vrot.slane %v6228_v51, 4 }
 0x96a   : > { %6773 = vmatprep.mubr.bf16.mxu0 %v6416_v43  ;;  %v6239_v32 = vadd.f32 %v6238_v45, %v6237_v21  ;;  %v6245_v53 = vadd.f32 %v6244_v40, %v6243_v11  ;;  %v6251_v6 = vadd.f32 %v6250_v30, %v6249_v56  ;;  %v6272_v50 = vrot.slane %v6229_v24, 4 }
 0x96b   : > { %v6234_v44 = vrot.slane %v6233_v15, 1  ;;  %v6257_v46 = vadd.f32 %v6256_v52, %v6255_v10  ;;  %v6263_v7 = vadd.f32 %v6262_v14, %v6261_v8  ;;  %v6267_v16 = vadd.f32 %v6266_v25, %v6228_v51 }
 0x96c   : > { %v6240_v39 = vrot.slane %v6239_v32, 1  ;;  %v6246_v31 = vrot.slane %v6245_v53, 1  ;;  %v6252_v33 = vrot.slane %v6251_v6, 1  ;;  %v6273_v12 = vadd.f32 %v6272_v50, %v6229_v24 }
 0x96d   : > { %v6235_v0 = vadd.f32 %v6234_v44, %v6233_v15  ;;  %v6258_v13 = vrot.slane %v6257_v46, 1  ;;  %v6264_v2 = vrot.slane %v6263_v7, 1  ;;  %v6268_v28 = vrot.slane %v6267_v16, 2 }
 0x96e   : > { %v6241_v42 = vadd.f32 %v6240_v39, %v6239_v32  ;;  %v6247_v55 = vadd.f32 %v6246_v31, %v6245_v53  ;;  %v6253_v61 = vadd.f32 %v6252_v33, %v6251_v6  ;;  %v6274_v57 = vrot.slane %v6273_v12, 2 }
 0x96f   : > { %v6259_v58 = vadd.f32 %v6258_v13, %v6257_v46  ;;  %v6265_v22 = vadd.f32 %v6264_v2, %v6263_v7  ;;  %v6269_v1 = vadd.f32 %v6268_v28, %v6267_v16  ;;  %v6054_v29 = vsel %vm6050_vm2, %v11306_v60, 0.0 }
 0x970   : > { %v6275_v51 = vadd.f32 %v6274_v57, %v6273_v12  ;;  %v6391_v18 = vsel %vm3157_vm11, %v6241_v42, %v6235_v0  ;;  %v6055_v24 = vsel %vm6050_vm2, %v11301_v48, 0.0  ;;  %v6056_v5 = vsel %vm6050_vm2, %v11308_v59, 0.0 }
 0x971   : > { %v6270_v21 = vrot.slane %v6269_v1, 1  ;;  %v6392_v11 = vsel %vm3160_vm12, %v6247_v55, %v6391_v18  ;;  %v6057_v56 = vsel %vm6050_vm2, %v11310_v49, 0.0  ;;  %v6058_v37 = vsel %vm6050_vm2, %v11323_v54, 0.0 }
 0x972   : > { %v6276_v34 = vrot.slane %v6275_v51, 1  ;;  %v6393_v10 = vsel %vm3163_vm13, %v6253_v61, %v6392_v11  ;;  %v6062_v8 = vadd.f32 %v6061_v35, %v11329_v38  ;;  %v6067_v43 = vrot.slane %v11336_v41, 2 }
 0x973   : > { %v6271_v45 = vadd.f32 %v6270_v21, %v6269_v1  ;;  %v6394_v40 = vsel %vm3166_vm14, %v6259_v58, %v6393_v10  ;;  %v6072_v30 = vadd.f32 %v6071_v62, %v11318_v23  ;;  %v6077_v15 = vrot.slane %v6054_v29, 4 }
 0x974   : > { %v6277_v52 = vadd.f32 %v6276_v34, %v6275_v51  ;;  %v6395_v14 = vsel %vm3169_vm15, %v6265_v22, %v6394_v40  ;;  %v6063_v25 = vrot.slane %v6062_v8, 1  ;;  %v6068_v32 = vadd.f32 %v6067_v43, %v11336_v41 }
 0x975   : > { %v6396_v53 = vsel %vm3172_vm1, %v6271_v45, %v6395_v14  ;;  %v6073_v6 = vrot.slane %v6072_v30, 2  ;;  %v6078_v38 = vadd.f32 %v6077_v15, %v6054_v29  ;;  %v6083_v35 = vrot.slane %v6055_v24, 4 }
 0x976   : > { %v6397_v50 = vsel %vm3175_vm10, %v6277_v52, %v6396_v53  ;;  %v6064_v44 = vadd.f32 %v6063_v25, %v6062_v8  ;;  %v6069_v46 = vrot.slane %v6068_v32, 1  ;;  %v6089_v7 = vrot.slane %v6056_v5, 4 }
 0x977   : > { %v6418_v16 = vpack.c.bf16 %v6397_v50, %v6397_v50  ;;  %v6074_v39 = vadd.f32 %v6073_v6, %v6072_v30  ;;  %v6079_v23 = vrot.slane %v6078_v38, 2  ;;  %v6084_v62 = vadd.f32 %v6083_v35, %v6055_v24 }
 0x978   : > { %v6070_v31 = vadd.f32 %v6069_v46, %v6068_v32  ;;  %v6090_v33 = vadd.f32 %v6089_v7, %v6056_v5  ;;  %v6095_v12 = vrot.slane %v6057_v56, 4  ;;  %v6101_v0 = vrot.slane %v6058_v37, 4 }
 0x979   : > { %6813 = vmatprep.mubr.bf16.mxu1 %v6418_v16  ;;  %v6075_v41 = vrot.slane %v6074_v39, 1  ;;  %v6080_v13 = vadd.f32 %v6079_v23, %v6078_v38  ;;  %v6085_v2 = vrot.slane %v6084_v62, 2  ;;  %v6168_v28 = vsel %vm6164_vm3, %v11306_v60, 0.0 }
 0x97a   : > { %v6091_v42 = vrot.slane %v6090_v33, 2  ;;  %v6096_v55 = vadd.f32 %v6095_v12, %v6057_v56  ;;  %v6102_v61 = vadd.f32 %v6101_v0, %v6058_v37  ;;  %v6343_v57 = vsel %vm3157_vm11, %v6070_v31, %v6064_v44  ;;  %v8494_v0 = vld [vmem:[%s11663_s9 + $0x100] sm:$0xff]  }
 0x97b   : > { %v6076_v58 = vadd.f32 %v6075_v41, %v6074_v39  ;;  %v6081_v22 = vrot.slane %v6080_v13, 1  ;;  %v6086_v1 = vadd.f32 %v6085_v2, %v6084_v62  ;;  %v6169_v29 = vsel %vm6164_vm3, %v11301_v48, 0.0 }
 0x97c   : > { %v6092_v51 = vadd.f32 %v6091_v42, %v6090_v33  ;;  %v6097_v18 = vrot.slane %v6096_v55, 2  ;;  %v6103_v24 = vrot.slane %v6102_v61, 2  ;;  %v6170_v5 = vsel %vm6164_vm3, %v11308_v59, 0.0 }
 0x97d   : > { %v6082_v21 = vadd.f32 %v6081_v22, %v6080_v13  ;;  %v6087_v11 = vrot.slane %v6086_v1, 1  ;;  %v6344_v56 = vsel %vm3160_vm12, %v6076_v58, %v6343_v57  ;;  %v6171_v37 = vsel %vm6164_vm3, %v11310_v49, 0.0 }
 0x97e   : > { %v6093_v34 = vrot.slane %v6092_v51, 1  ;;  %v6098_v10 = vadd.f32 %v6097_v18, %v6096_v55  ;;  %v6104_v8 = vadd.f32 %v6103_v24, %v6102_v61  ;;  %v6172_v43 = vsel %vm6164_vm3, %v11323_v54, 0.0 }
 0x97f   : > { %v6088_v45 = vadd.f32 %v6087_v11, %v6086_v1  ;;  %v6345_v40 = vsel %vm3163_vm13, %v6082_v21, %v6344_v56  ;;  %v6176_v30 = vadd.f32 %v6175_v63, %v11348_v9  ;;  %v6181_v15 = vrot.slane %v11350_v26, 2 }
 0x980   : > { %v6094_v52 = vadd.f32 %v6093_v34, %v6092_v51  ;;  %v6099_v14 = vrot.slane %v6098_v10, 1  ;;  %v6105_v25 = vrot.slane %v6104_v8, 1  ;;  %v6186_v32 = vadd.f32 %v6185_v19, %v11334_v3 }
 0x981   : > { %v6346_v53 = vsel %vm3166_vm14, %v6088_v45, %v6345_v40  ;;  %v6177_v6 = vrot.slane %v6176_v30, 1  ;;  %v6182_v38 = vadd.f32 %v6181_v15, %v11350_v26  ;;  %v6191_v35 = vrot.slane %v6168_v28, 4 }
 0x982   : > { %v6100_v50 = vadd.f32 %v6099_v14, %v6098_v10  ;;  %v6106_v44 = vadd.f32 %v6105_v25, %v6104_v8  ;;  %v6347_v46 = vsel %vm3169_vm15, %v6094_v52, %v6346_v53  ;;  %v6187_v9 = vrot.slane %v6186_v32, 2  ;;  %v8496_v14 = vld [vmem:[%s11663_s9 + $0x110] sm:$0xff]  }
 0x983   : > { %v6178_v63 = vadd.f32 %v6177_v6, %v6176_v30  ;;  %v6183_v7 = vrot.slane %v6182_v38, 1  ;;  %v6192_v16 = vadd.f32 %v6191_v35, %v6168_v28  ;;  %v6197_v39 = vrot.slane %v6169_v29, 4 }
 0x984   : > { %v6348_v23 = vsel %vm3172_vm1, %v6100_v50, %v6347_v46  ;;  %v6188_v62 = vadd.f32 %v6187_v9, %v6186_v32  ;;  %v6203_v31 = vrot.slane %v6170_v5, 4  ;;  %v6209_v3 = vrot.slane %v6171_v37, 4 }
 0x985   : > { %v6349_v19 = vsel %vm3175_vm10, %v6106_v44, %v6348_v23  ;;  %v6184_v33 = vadd.f32 %v6183_v7, %v6182_v38  ;;  %v6193_v12 = vrot.slane %v6192_v16, 2  ;;  %v6198_v26 = vadd.f32 %v6197_v39, %v6169_v29 }
 0x986   : > { %v6415_v41 = vpack.c.bf16 %v6349_v19, %v6349_v19  ;;  %v6189_v13 = vrot.slane %v6188_v62, 1  ;;  %v6204_v2 = vadd.f32 %v6203_v31, %v6170_v5  ;;  %v6210_v42 = vadd.f32 %v6209_v3, %v6171_v37  ;;  %v8495_v5 = vld [vmem:[%s11663_s9 + $0x108] sm:$0xff]  }
 0x987   : > { %v6194_v28 = vadd.f32 %v6193_v12, %v6192_v16  ;;  %v6199_v55 = vrot.slane %v6198_v26, 2  ;;  %v6215_v61 = vrot.slane %v6172_v43, 4  ;;  %v6375_v57 = vsel %vm3157_vm11, %v6184_v33, %v6178_v63  ;;  %v8497_v63 = vld [vmem:[%s11663_s9 + $0x118] sm:$0xff]  }
 0x988   : > { %6774 = vmatmul.mubr.bf16.vlgmr.msra.gmra.mrb[64].mxu0 %v6415_v41  ;;  %v6190_v58 = vadd.f32 %v6189_v13, %v6188_v62  ;;  %v6205_v22 = vrot.slane %v6204_v2, 2  ;;  %v6211_v1 = vrot.slane %v6210_v42, 2  ;;  %v6280_v29 = vsel %vm6278_vm4, %v11297_v20, 0.0  ;;  %v8498_v41 = vld [vmem:[%s11663_s9 + $0x120] sm:$0xff]  }
 0x989   : > { %v6195_v51 = vrot.slane %v6194_v28, 1  ;;  %v6200_v18 = vadd.f32 %v6199_v55, %v6198_v26  ;;  %v6216_v24 = vadd.f32 %v6215_v61, %v6172_v43  ;;  %7678 = vmatpush3.bf16.msra.mxu0 %v8494_v0  ;;  %7693 = vmatprep.mubr.msk.bf16.mxu0 %vm8808_vm8, %v8805_v17  ;;  %v6281_v21 = vsel %vm6278_vm4, %v11299_v27, 0.0 }
 0x98a   : > { %v6206_v11 = vadd.f32 %v6205_v22, %v6204_v2  ;;  %v6212_v56 = vadd.f32 %v6211_v1, %v6210_v42  ;;  %v6376_v20 = vsel %vm3160_vm12, %v6190_v58, %v6375_v57  ;;  %7679 = vmatprep.subr.bf16.mxu0 %v8805_v17  ;;  %v6282_v37 = vsel %vm6278_vm4, %v11306_v60, 0.0 }
 0x98b   : > { %v6196_v34 = vadd.f32 %v6195_v51, %v6194_v28  ;;  %v6201_v10 = vrot.slane %v6200_v18, 1  ;;  %v6217_v8 = vrot.slane %v6216_v24, 2  ;;  %v6283_v43 = vsel %vm6278_vm4, %v11301_v48, 0.0 }
 0x98c   : > { %v6207_v45 = vrot.slane %v6206_v11, 1  ;;  %v6213_v40 = vrot.slane %v6212_v56, 1  ;;  %v6284_v27 = vsel %vm6278_vm4, %v11308_v59, 0.0  ;;  %v6285_v30 = vsel %vm6278_vm4, %v11310_v49, 0.0 }
 0x98d   : > { %v6202_v15 = vadd.f32 %v6201_v10, %v6200_v18  ;;  %v6218_v52 = vadd.f32 %v6217_v8, %v6216_v24  ;;  %v6377_v60 = vsel %vm3163_vm13, %v6196_v34, %v6376_v20  ;;  %7680 = vmatpush3.bf16.msra.mxu0 %v8495_v5  ;;  %v6286_v48 = vsel %vm6278_vm4, %v11323_v54, 0.0 }
 0x98e   : > { %v6208_v25 = vadd.f32 %v6207_v45, %v6206_v11  ;;  %v6214_v32 = vadd.f32 %v6213_v40, %v6212_v56  ;;  %7681 = vmatprep.subr.bf16.mxu0 %v8805_v17  ;;  %v6288_v59 = vadd.f32 %v6287_v47, %v11342_v36  ;;  %v6293_v49 = vrot.slane %v6280_v29, 4 }
 0x98f   : > { %v6219_v53 = vrot.slane %v6218_v52, 1  ;;  %v6378_v6 = vsel %vm3166_vm14, %v6202_v15, %v6377_v60  ;;  %v6299_v38 = vrot.slane %v6281_v21, 4  ;;  %v6305_v35 = vrot.slane %v6282_v37, 4  ;;  %v8500_v15 = vld [vmem:[%s11663_s9 + $0x130] sm:$0xff]  }
 0x990   : > { %v6379_v50 = vsel %vm3169_vm15, %v6208_v25, %v6378_v6  ;;  %v6289_v44 = vrot.slane %v6288_v59, 2  ;;  %v6294_v46 = vadd.f32 %v6293_v49, %v6280_v29  ;;  %v6311_v4 = vrot.slane %v6283_v43, 4  ;;  %v8501_v49 = vld [vmem:[%s11663_s9 + $0x138] sm:$0xff]  }
 0x991   : > { %v6220_v54 = vadd.f32 %v6219_v53, %v6218_v52  ;;  %v6380_v9 = vsel %vm3172_vm1, %v6214_v32, %v6379_v50  ;;  %7682 = vmatpush3.bf16.msra.mxu0 %v8496_v14  ;;  %v6300_v36 = vadd.f32 %v6299_v38, %v6281_v21  ;;  %v6306_v47 = vadd.f32 %v6305_v35, %v6282_v37  ;;  %v8499_v21 = vld [vmem:[%s11663_s9 + $0x128] sm:$0xff]   ;;  %v8502_v38 = vld [vmem:[%s11664_s10] sm:$0xff]   ;;  %v8504_v50 = vld [vmem:[%s11664_s10 + $0x10] sm:$0xff]  }
 0x992   : > { %7683 = vmatprep.subr.bf16.mxu0 %v8805_v17  ;;  %v6290_v7 = vadd.f32 %v6289_v44, %v6288_v59  ;;  %v6295_v16 = vrot.slane %v6294_v46, 2  ;;  %v6312_v39 = vadd.f32 %v6311_v4, %v6283_v43  ;;  %v6317_v23 = vrot.slane %v6284_v27, 4  ;;  %v8503_v35 = vld [vmem:[%s11664_s10 + $0x8] sm:$0xff]   ;;  %v8505_v44 = vld [vmem:[%s11664_s10 + $0x18] sm:$0xff]  }
 0x993   : > { %v6381_v62 = vsel %vm3175_vm10, %v6220_v54, %v6380_v9  ;;  %v6301_v31 = vrot.slane %v6300_v36, 2  ;;  %v6307_v3 = vrot.slane %v6306_v47, 2  ;;  %v6323_v19 = vrot.slane %v6285_v30, 4  ;;  %v8507_v4 = vld [vmem:[%s11664_s10 + $0x28] sm:$0xff]   ;;  %v8510_v54 = vld [vmem:[%s11665_s11] sm:$0xff]  }
 0x994   : > { %v6417_v33 = vpack.c.bf16 %v6381_v62, %v6381_v62  ;;  %v6291_v12 = vrot.slane %v6290_v7, 1  ;;  %v6296_v26 = vadd.f32 %v6295_v16, %v6294_v46  ;;  %v6313_v0 = vrot.slane %v6312_v39, 2  ;;  %v8506_v46 = vld [vmem:[%s11664_s10 + $0x20] sm:$0xff]   ;;  %v8511_v9 = vld [vmem:[%s11665_s11 + $0x8] sm:$0xff]  }
 0x995   : > { %7684 = vmatpush3.bf16.msra.mxu0 %v8497_v63  ;;  %v6302_v13 = vadd.f32 %v6301_v31, %v6300_v36  ;;  %v6308_v2 = vadd.f32 %v6307_v3, %v6306_v47  ;;  %v6318_v42 = vadd.f32 %v6317_v23, %v6284_v27  ;;  %v6324_v28 = vadd.f32 %v6323_v19, %v6285_v30  ;;  %v8508_v63 = vld [vmem:[%s11664_s10 + $0x30] sm:$0xff]   ;;  %v8509_v36 = vld [vmem:[%s11664_s10 + $0x38] ss:$0 sps:$4 sm:$0xff]   ;;  %v6500_v31 = vld [vmem:[%s11666_s12 + $0x6] ss:$0 sm:$0xff] }
 0x996   : > { %6814 = vmatmul.mubr.bf16.vlgmr.msra.gmra.mrb[128].mxu1 %v6417_v33  ;;  %7685 = vmatprep.subr.bf16.mxu0 %v8805_v17  ;;  %v6297_v55 = vrot.slane %v6296_v26, 1  ;;  %v6314_v61 = vadd.f32 %v6313_v0, %v6312_v39  ;;  %v6329_v57 = vrot.slane %v6286_v48, 4  ;;  %v6292_v51 = vadd.f32 %v6291_v12, %v6290_v7 }
 0x997   : > { %v6303_v58 = vrot.slane %v6302_v13, 1  ;;  %v6309_v22 = vrot.slane %v6308_v2, 1  ;;  %v6319_v1 = vrot.slane %v6318_v42, 2  ;;  %v6325_v29 = vrot.slane %v6324_v28, 2  ;;  %7713 = vmatprep.mubr.msk.bf16.mxu1 %vm8808_vm8, %v8805_v17  ;;  %7698 = vmatpush3.bf16.msra.mxu1 %v8502_v38 }
 0x998   : > { %v6298_v18 = vadd.f32 %v6297_v55, %v6296_v26  ;;  %v6315_v24 = vrot.slane %v6314_v61, 1  ;;  %v6330_v5 = vadd.f32 %v6329_v57, %v6286_v48  ;;  %7699 = vmatprep.subr.bf16.mxu1 %v8805_v17  ;;  %v6929_v47 = vsel %vm798_vm7, %v8509_v36, 0 }
 0x999   : > { %7686 = vmatpush3.bf16.msra.mxu0 %v8498_v41  ;;  %v6304_v11 = vadd.f32 %v6303_v58, %v6302_v13  ;;  %v6310_v56 = vadd.f32 %v6309_v22, %v6308_v2  ;;  %v6320_v20 = vadd.f32 %v6319_v1, %v6318_v42  ;;  %v6326_v37 = vadd.f32 %v6325_v29, %v6324_v28  ;;  %v8512_v58 = vld [vmem:[%s11665_s11 + $0x10] sm:$0xff]   ;;  %v8513_v22 = vld [vmem:[%s11665_s11 + $0x18] sm:$0xff]   ;;  %v8514_v1 = vld [vmem:[%s11665_s11 + $0x20] sm:$0xff]  }
 0x99a   : > { %7687 = vmatprep.subr.bf16.mxu0 %v8805_v17  ;;  %v6331_v34 = vrot.slane %v6330_v5, 2  ;;  %v6407_v10 = vsel %vm3157_vm11, %v6298_v18, %v6292_v51  ;;  %v6316_v8 = vadd.f32 %v6315_v24, %v6314_v61  ;;  %vm6924_vm7 = vcmask 982016   ;;  %v8515_v29 = vld [vmem:[%s11665_s11 + $0x28] ss:$0 sps:$4 sm:$0x33]  }
 0x99b   : > { %v6321_v43 = vrot.slane %v6320_v20, 1  ;;  %v6327_v45 = vrot.slane %v6326_v37, 1  ;;  %v6408_v40 = vsel %vm3160_vm12, %v6304_v11, %v6407_v10  ;;  %7700 = vmatpush3.bf16.msra.mxu1 %v8503_v35  ;;  %v7024_v51 = vsel %vm7022_vm9, %v8515_v29, 0  ;;  %v6878_v18 = vld [vmem:[%s11666_s12 + $0x7] ss:$0 sm:$0xff] }
 0x99c   : > { %v6332_v27 = vadd.f32 %v6331_v34, %v6330_v5  ;;  %v6409_v30 = vsel %vm3163_vm13, %v6310_v56, %v6408_v40  ;;  %7701 = vmatprep.subr.bf16.mxu1 %v8805_v17  ;;  %vm7018_vm11 = vcmask 687104  }
 0x99d   : > { %7688 = vmatpush3.bf16.msra.mxu0 %v8499_v21  ;;  %v6322_v52 = vadd.f32 %v6321_v43, %v6320_v20  ;;  %v6410_v60 = vsel %vm3166_vm14, %v6316_v8, %v6409_v30  ;;  %v6328_v14 = vadd.f32 %v6327_v45, %v6326_v37 }
 0x99e   : > { %7689 = vmatprep.subr.bf16.mxu0 %v8805_v17  ;;  %v6333_v48 = vrot.slane %v6332_v27, 1 }
 0x99f   : > { %v6411_v25 = vsel %vm3169_vm15, %v6322_v52, %v6410_v60  ;;  %7702 = vmatpush3.bf16.msra.mxu1 %v8504_v50 }
 0x9a0   : > { %v6334_v32 = vadd.f32 %v6333_v48, %v6332_v27  ;;  %v6412_v59 = vsel %vm3172_vm1, %v6328_v14, %v6411_v25  ;;  %7703 = vmatprep.subr.bf16.mxu1 %v8805_v17 }
 0x9a1   : > { %7690 = vmatpush3.bf16.msra.mxu0 %v8500_v15 }
 0x9a2   : > { %7691 = vmatprep.subr.bf16.mxu0 %v8805_v17  ;;  %v6413_v53 = vsel %vm3175_vm10, %v6334_v32, %v6412_v59 }
 0x9a3   : > { %v6419_v6 = vpack.c.bf16 %v6413_v53, %v6413_v53  ;;  %7704 = vmatpush3.bf16.msra.mxu1 %v8505_v44 }
 0x9a4   : > { %7705 = vmatprep.subr.bf16.mxu1 %v8805_v17 }
 0x9a5   : > { %7692 = vmatpush3.bf16.msra.mxu0 %v8501_v49 }
 0x9a6   : > { %7717 = vmatprep.subr.bf16.mxu0 %v8805_v17 }
 0x9a7   : > { %7706 = vmatpush3.bf16.msra.mxu1 %v8506_v46 }
 0x9a8   : > { %7694 = vmatmul.mubr.bf16.vlgmr.msra.gmra.mrb[68].mxu0 %v6419_v6  ;;  %7707 = vmatprep.subr.bf16.mxu1 %v8805_v17 }
 0x9a9   : > { %7729 = vmatprep.mubr.msk.bf16.mxu0 %vm8808_vm8, %v8805_v17  ;;  %7718 = vmatpush3.bf16.msra.mxu0 %v8510_v54 }
 0x9aa   : > { %7719 = vmatprep.subr.bf16.mxu0 %v8805_v17 }
 0x9ab   : > { %7708 = vmatpush3.bf16.msra.mxu1 %v8507_v4 }
 0x9ac   : > { %7709 = vmatprep.subr.bf16.mxu1 %v8805_v17 }
 0x9ad   : > { %7720 = vmatpush3.bf16.msra.mxu0 %v8511_v9 }
 0x9ae   : > { %7721 = vmatprep.subr.bf16.mxu0 %v8805_v17 }
 0x9af   : > { %7710 = vmatpush3.bf16.msra.mxu1 %v8508_v63 }
 0x9b0   : > { %7711 = vmatprep.subr.bf16.mxu1 %v8805_v17 }
 0x9b1   : > { %7722 = vmatpush3.bf16.msra.mxu0 %v8512_v58 }
 0x9b2   : > { %7723 = vmatprep.subr.bf16.mxu0 %v8805_v17 }
 0x9b3   : > { %7712 = vmatpush3.bf16.msra.mxu1 %v6929_v47 }
 0x9b5   : > { %7724 = vmatpush3.bf16.msra.mxu0 %v8513_v22 }
 0x9b6   : > { %7725 = vmatprep.subr.bf16.mxu0 %v8805_v17 }
 0x9b9   : > { %7726 = vmatpush3.bf16.msra.mxu0 %v8514_v1 }
 0x9ba   : > { %7727 = vmatprep.subr.bf16.mxu0 %v8805_v17  ;;  %v6984_v17 = vld [vmem:[%s11666_s12 + $0x10] ss:$0 sm:$0xff] }
 0x9bd   : > { %7728 = vmatpush3.bf16.msra.mxu0 %v7024_v51 }
 0xa5b   : > { %v7624_v7 = vpop.f32.mrb[64].mxu0 }
 0xa5c   : > { %v7625_v16 = vpop.f32.mrb[65].mxu0 }
 0xa5d   : > { %v7626_v39 = vadd.f32 %v7625_v16, %v7624_v7  ;;  %v7627_v23 = vpop.f32.mrb[66].mxu0 }
 0xa5e   : > { %v7628_v62 = vpop.f32.mrb[67].mxu0 }
 0xa5f   : > { %v6776_v19 = vadd.f32 %v7626_v39, %v6500_v31 }
 0xa69   : > { %v7646_v3 = vpop.f32.mrb[128].mxu1 }
 0xa6a   : > { %v7647_v33 = vpop.f32.mrb[129].mxu1 }
 0xa6b   : > { %v7648_v12 = vadd.f32 %v7647_v33, %v7646_v3  ;;  %v7649_v26 = vpop.f32.mrb[130].mxu1 }
 0xa6c   : > { %v7650_v0 = vpop.f32.mrb[131].mxu1 }
 0xa6d   : > { %v6816_v41 = vadd.f32 %v7648_v12, %v6776_v19 }
 0xa7b   : > { %v6855_v13 = vpop.f32.mrb[68].mxu0 }
 0xa7c   : > { %v6856_v2 = vadd.f32 %v6855_v13, %v6816_v41  ;;  %v7695_v42 = vpop.f32.mrb[69].mxu0 }
 0xa7d   : > { %v6858_v28 = vpop.f32.mrb[70].mxu0 }
 0xa7e   : > { %8720 = vtanh.f32 %v6856_v2  ;;  %v7696_v55 = vpop.f32.mrb[71].mxu0 }
 0xa88   : > { %v8721_v61 = vpop.eup %8720 }
 0xa89   : > { %v6862_v57 = vpack.c.bf16 %v8721_v61, %v8721_v61 }
 0xa8b   : > { %7714 = vmatmul.mubr.msk.bf16.vlgmr.msra.gmra.mrb[132].mxu1 %vm6924_vm7, %v6862_v57 }
 0xb5e   : > { %v6965_v24 = vpop.f32.mrb[132].mxu1 }
 0xb5f   : > { %v6966_v5 = vadd.f32 %v6965_v24, %v6878_v18  ;;  %v7715_v21 = vpop.f32.mrb[133].mxu1 }
 0xb60   : > { %v6968_v11 = vpop.f32.mrb[134].mxu1 }
 0xb61   : > { %8722 = vtanh.f32 %v6966_v5  ;;  %v7716_v56 = vpop.f32.mrb[135].mxu1 }
 0xb6b   : > { %v8723_v20 = vpop.eup %8722 }
 0xb6c   : > { %v6972_v37 = vpack.c.bf16 %v8723_v20, %v8723_v20 }
 0xb6e   : > { %7730 = vmatmul.mubr.msk.bf16.vlgmr.msra.gmra.mrb[72].mxu0 %vm7018_vm11, %v6972_v37 }
 0xc41   : > { %v7060_v34 = vpop.f32.mrb[72].mxu0 }
 0xc42   : > { %v7061_v10 = vadd.f32 %v7060_v34, %v6984_v17  ;;  %v7731_v8 = vpop.f32.mrb[73].mxu0 }
 0xc43   : > { %v7063_v43 = vpop.f32.mrb[74].mxu0 }
 0xc44   : > { %7066 = vst [vmem:[%s434_s20] sm:$0xff] %v7061_v10  ;;  %v7732_v45 = vpop.f32.mrb[75].mxu0 }
 0xc45   : > { %8752 = shalt.err (!%p8749_p3)
}
 0xc46   : > { %s8753_s15 = scalar_lea.hbm %s11612_s22, 128  ;;  %s8757_s14 = scalar_lea.hbm %s11667_s13, 256 }
 0xc47   : > { %p8754_p4 = scmp.ne.s32.totalorder %s11612_s22, %s8753_s15  ;;  %p8758_p9 = scmp.lt.u32.totalorder %s11612_s22, %s11667_s13 }
 0xc48   : > { %p8759_p10 = scmp.lt.u32.totalorder %s8757_s14, %s8753_s15  ;;  %p8761_p12 = scmp.lt.u32.totalorder %s8753_s15, %s11612_s22 }
 0xc49   : > { %p8755_p7 = pnand %p8754_p4, %p8918_p5 }
 0xc4a   : > { %p8760_p11 = por %p8759_p10, %p8758_p9 }
 0xc4b   : > { %p8756_p8 = pneg %p8755_p7 }
 0xc4c   : > { %p8762_p13 = por %p8761_p12, %p8760_p11 }
 0xc4e   : > { %p8763_p0 = pnand %p8762_p13, %p8756_p8 }
 0xc50   : > { %8766 = shalt.err (!%p8763_p0)
}
 0xc51   : > { %8177 = dma.vmem_to_hbm [thread:$0]  (%p8918_p5), %s11614_s16, 128, %s11612_s22, %s7068_s23  }
 0xc52 PF: > { %p8183_p1 = scmp.ge.s32.totalorder %s8801_s28, 2  ;;  %s7093_s29 = sand.u32 1, %s8789_s25  }
 0xc53   : > { %s7094_s30 = scalar_lea.sflag [#allocation3], %s7093_s29 }
 0xc54   : > { %p8180_p2 = pnand %p8183_p1, %p8922_p6 }
 0xc56   : > { %8784 = dma.done.wait (!%p8180_p2), %s7094_s30, 128  }
 0xc57   : > { %8786 = vsyncadd (!%p8180_p2), %s7094_s30, 4294967168  ;;  %s11687_s28 = sld [smem:[#allocation6_spill]]  ;;  %s11688_s27 = sld [smem:[#allocation5_spill]] }
 0xc58   : > { %s11689_s15 = sld [smem:[#allocation7_spill]]  ;;  %s11690_s25 = smov %s8793_s26 }
 0xc5d   : > { %p23_p3 = scmp.ge.s32.totalorder %s11687_s28, 4   ;;  %s11691_s26 = smov %s11688_s27 }
 0xc5e   : > { %s11692_s27 = smov %s11689_s15 }
 0xc5f   :  { %25 = sbr.rel (!%p23_p3) target bundleno = 3 (0x3), region = 108 }
 0xc66   :  { %7099 = vsyncpa [#allocation3], 1 }
 0xc67   :  { %7101 = vsyncpa [#allocation3 + $0x1], 1 }

</bundles_post_ra>
